<compile_context>
chip_gen: v7x
topology: tpu7x:2x2x1
jax: 0.10.0
libtpu: 0.0.40
codegen_flags: <defaults>
</compile_context>

<pallas_src>
import functools
import math

import jax
import jax.numpy as jnp
from jax.experimental import pallas as pl
from jax.experimental.pallas import tpu as pltpu

_LN_EPS = 1e-5
_INV_SIG_EPS = 1e-5
_LANE = 128


def _round_up(x, m):
    return ((x + m - 1) // m) * m


# ----------------------------------------------------------------------------
# In-kernel helpers
# ----------------------------------------------------------------------------
def _nan_to_num_f32(x):
    """torch.nan_to_num defaults: nan->0, +inf->f32 max, -inf->f32 min."""
    x = x.astype(jnp.float32)
    x = jnp.where(jnp.isnan(x), jnp.float32(0.0), x)
    fmax = jnp.float32(jnp.finfo(jnp.float32).max)
    return jnp.clip(x, -fmax, fmax)


def _mlp(h, fcw_ref, fcb_ref, w0, num_fcs, lng_ref=None, lnb_ref=None, ln0=0):
    """num_fcs x [Linear (+LayerNorm) + ReLU]; weights read from stacked refs."""
    for f in range(num_fcs):
        w = fcw_ref[w0 + f]            # (E, E)
        b = fcb_ref[w0 + f]            # (1, E)
        h = jnp.dot(h, w, preferred_element_type=jnp.float32) + b
        if lng_ref is not None:        # LayerNorm (eps=1e-5, biased var) — torch
            g = lng_ref[ln0 + f]       # (1, E)
            beta = lnb_ref[ln0 + f]    # (1, E)
            mu = jnp.mean(h, axis=-1, keepdims=True)
            var = jnp.mean((h - mu) ** 2, axis=-1, keepdims=True)
            h = (h - mu) * jax.lax.rsqrt(var + _LN_EPS) * g + beta
        h = jnp.maximum(h, 0.0)        # ReLU
    return h


# ----------------------------------------------------------------------------
# Kernels
# ----------------------------------------------------------------------------
def _make_encoder_kernel(num_fcs, reg_off):
    """One grid step = one encoder level; computes cls + mask + reg branches
    and writes one lane-dense (rows, slab) output."""

    def kernel(mem_ref, refp_ref, fcw_ref, fcb_ref, lng_ref, lnb_ref,
               outw_ref, outb_ref, o_ref):
        x = _nan_to_num_f32(mem_ref[...])                      # (R, E)

        # Three MLP stacks on the SAME input tile (read once).
        h_cls = _mlp(x, fcw_ref, fcb_ref, 0, num_fcs, lng_ref, lnb_ref, 0)
        h_msk = _mlp(x, fcw_ref, fcb_ref, num_fcs, num_fcs, lng_ref, lnb_ref,
                     num_fcs)
        h_reg = _mlp(x, fcw_ref, fcb_ref, 2 * num_fcs, num_fcs)

        # Final projections with column-placed, zero-padded (E, slab) weights:
        # cls -> cols [0, C), mask -> cols [C, C+9), reg -> cols [C+9, C+9+cd).
        cls_p = jnp.dot(h_cls, outw_ref[0],
                        preferred_element_type=jnp.float32) + outb_ref[0]
        msk_p = jnp.dot(h_msk, outw_ref[1],
                        preferred_element_type=jnp.float32) + outb_ref[1]
        reg_p = jnp.dot(h_reg, outw_ref[2],
                        preferred_element_type=jnp.float32) + outb_ref[2]

        # sigmoid(inverse_sigmoid(reference) + tmp) on the reg columns only.
        # refp_ref holds the reference already placed at the reg columns
        # (zeros elsewhere — those columns are masked out below).
        r = jnp.clip(refp_ref[...].astype(jnp.float32), 0.0, 1.0)
        x1 = jnp.maximum(r, _INV_SIG_EPS)
        x2 = jnp.maximum(1.0 - r, _INV_SIG_EPS)
        reg_sig = jax.nn.sigmoid(jnp.log(x1 / x2) + reg_p)

        col = jax.lax.broadcasted_iota(jnp.int32, o_ref.shape, 1)
        slab = jnp.where(col >= reg_off, reg_sig, cls_p + msk_p)
        o_ref[...] = slab.astype(o_ref.dtype)                  # one unmasked store

    return kernel


def _make_decoder_kernel(num_fcs):
    """One grid step = one decoder layer (weights shared across layers);
    computes cls (on per-line mean) and reg (+sigmoid), lane-dense outputs."""

    def kernel(x_ref, avg_ref, fcw_ref, fcb_ref, lng_ref, lnb_ref,
               outw_ref, outb_ref, cls_ref, reg_ref):
        x = _nan_to_num_f32(x_ref[...])                        # (R2, E)

        # reg branch on all per-point tokens, sigmoid fused.
        h_reg = _mlp(x, fcw_ref, fcb_ref, num_fcs, num_fcs)
        reg_lin = jnp.dot(h_reg, outw_ref[1],
                          preferred_element_type=jnp.float32) + outb_ref[1]
        reg_ref[...] = jax.nn.sigmoid(reg_lin).astype(reg_ref.dtype)

        # cls branch on the per-line mean over num_points. The mean is an MXU
        # matmul with a constant (L2, R2) averaging matrix precomputed in the
        # wrapper and resident in VMEM across all grid steps.
        xm = jnp.dot(avg_ref[...], x, preferred_element_type=jnp.float32)

        h_cls = _mlp(xm, fcw_ref, fcb_ref, 0, num_fcs, lng_ref, lnb_ref, 0)
        cls_out = jnp.dot(h_cls, outw_ref[0],
                          preferred_element_type=jnp.float32) + outb_ref[0]
        cls_ref[...] = cls_out.astype(cls_ref.dtype)

    return kernel


# ----------------------------------------------------------------------------
# Parameter init (deterministic, synthetic — mirrors _init_layers shapes)
# ----------------------------------------------------------------------------
def _bias_init_with_prob(prior_prob):
    return float(-math.log((1.0 - prior_prob) / prior_prob))


def init_branch_params(key, embed_dims, out_dim, num_fcs, use_ln,
                       final_bias=0.0):
    p = {"fc_w": [], "fc_b": [], "ln_g": [], "ln_b": []}
    for _ in range(num_fcs):
        key, k1 = jax.random.split(key)
        p["fc_w"].append(jax.random.normal(k1, (embed_dims, embed_dims),
                                           jnp.float32) * 0.02)
        p["fc_b"].append(jnp.zeros((1, embed_dims), jnp.float32))
        if use_ln:
            p["ln_g"].append(jnp.ones((1, embed_dims), jnp.float32))
            p["ln_b"].append(jnp.zeros((1, embed_dims), jnp.float32))
    key, k1 = jax.random.split(key)
    p["out_w"] = jax.random.normal(k1, (embed_dims, out_dim),
                                   jnp.float32) * 0.02
    p["out_b"] = jnp.full((1, out_dim), final_bias, jnp.float32)
    return p


def init_pmn_head_params(key, *, embed_dims, num_classes, num_reg_fcs,
                         num_enc_layer, num_dec_layer, num_raw_point,
                         coord_dim):
    bias_init = _bias_init_with_prob(0.01)
    params = {"point_cls": [], "point_mask": [], "point_reg": []}
    for _ in range(num_enc_layer):
        key, k1, k2, k3 = jax.random.split(key, 4)
        params["point_cls"].append(
            init_branch_params(k1, embed_dims, num_classes, num_reg_fcs,
                               use_ln=True, final_bias=bias_init))
        params["point_mask"].append(
            init_branch_params(k2, embed_dims, 9, num_reg_fcs, use_ln=True))
        params["point_reg"].append(
            init_branch_params(k3, embed_dims, coord_dim, num_reg_fcs,
                               use_ln=False))
    # cls_branch / reg_branch are SHARED across decoder layers in the reference
    # (nn.ModuleList([branch for _ in range(num_dec_layer)])).
    key, k1, k2 = jax.random.split(key, 3)
    params["cls"] = init_branch_params(k1, embed_dims, num_classes,
                                       num_reg_fcs, use_ln=True,
                                       final_bias=bias_init)
    params["reg"] = init_branch_params(k2, embed_dims, coord_dim, num_reg_fcs,
                                       use_ln=False)
    # point_embedding (num_raw_point, 2*embed_dims) is only consumed by the
    # external transformer; kept for shape fidelity.
    key, k1 = jax.random.split(key)
    params["point_embedding"] = jax.random.normal(
        k1, (num_raw_point, 2 * embed_dims), jnp.float32) * 0.02
    return params


# ----------------------------------------------------------------------------
# Weight packing (stacked + lane-dense padded layouts for the kernels)
# ----------------------------------------------------------------------------
def _pad_cols(w, off, slab):
    out = w.shape[-1]
    pad = [(0, 0)] * (w.ndim - 1) + [(off, slab - off - out)]
    return jnp.pad(w, pad)


def _pack_encoder_params(params, num_classes, slab):
    cls_l, msk_l, reg_l = (params["point_cls"], params["point_mask"],
                           params["point_reg"])
    num_enc = len(cls_l)
    cls_off, msk_off, reg_off = 0, num_classes, num_classes + 9
    fcw, fcb, lng, lnb, outw, outb = [], [], [], [], [], []
    for l in range(num_enc):
        fcw.append(jnp.stack(cls_l[l]["fc_w"] + msk_l[l]["fc_w"] +
                             reg_l[l]["fc_w"]))
        fcb.append(jnp.stack(cls_l[l]["fc_b"] + msk_l[l]["fc_b"] +
                             reg_l[l]["fc_b"]))
        lng.append(jnp.stack(cls_l[l]["ln_g"] + msk_l[l]["ln_g"]))
        lnb.append(jnp.stack(cls_l[l]["ln_b"] + msk_l[l]["ln_b"]))
        outw.append(jnp.stack([_pad_cols(cls_l[l]["out_w"], cls_off, slab),
                               _pad_cols(msk_l[l]["out_w"], msk_off, slab),
                               _pad_cols(reg_l[l]["out_w"], reg_off, slab)]))
        outb.append(jnp.stack([_pad_cols(cls_l[l]["out_b"], cls_off, slab),
                               _pad_cols(msk_l[l]["out_b"], msk_off, slab),
                               _pad_cols(reg_l[l]["out_b"], reg_off, slab)]))
    return (jnp.stack(fcw), jnp.stack(fcb), jnp.stack(lng), jnp.stack(lnb),
            jnp.stack(outw), jnp.stack(outb))


def _pack_decoder_params(params, slab):
    cls_p, reg_p = params["cls"], params["reg"]
    fcw = jnp.stack(cls_p["fc_w"] + reg_p["fc_w"])
    fcb = jnp.stack(cls_p["fc_b"] + reg_p["fc_b"])
    lng = jnp.stack(cls_p["ln_g"])
    lnb = jnp.stack(cls_p["ln_b"])
    outw = jnp.stack([_pad_cols(cls_p["out_w"], 0, slab),
                      _pad_cols(reg_p["out_w"], 0, slab)])
    outb = jnp.stack([_pad_cols(cls_p["out_b"], 0, slab),
                      _pad_cols(reg_p["out_b"], 0, slab)])
    return fcw, fcb, lng, lnb, outw, outb


# ----------------------------------------------------------------------------
# PMNHead.forward (post-transformer part)
# ----------------------------------------------------------------------------
def pmn_head_forward(memory, outs_dec, point_init_ref_points,
                     point_inter_ref_points, params, *, num_classes,
                     num_line, num_points, num_reg_fcs, coord_dim):
    """memory:  (num_enc, bs, num_raw_point, E)
       outs_dec:(num_dec, bs, num_line*num_points, E)
       point_init_ref_points:  (bs, num_raw_point, coord_dim)
       point_inter_ref_points: (num_enc-1, bs, num_raw_point, coord_dim)
    """
    num_enc, bs, n_pt, E = memory.shape
    num_dec = outs_dec.shape[0]

    def _lvl_spec(a):          # level-indexed arrays (leading dim = grid axis)
        nd = a.ndim
        return pl.BlockSpec((None,) + a.shape[1:],
                            lambda l, nd=nd: (l,) + (0,) * (nd - 1))

    def _full_spec(a):         # shared arrays (same block every grid step)
        nd = a.ndim
        return pl.BlockSpec(a.shape, lambda l, nd=nd: (0,) * nd)

    # ---------------- encoder path: fused cls+mask+reg, grid over levels -----
    R = bs * n_pt
    enc_total = num_classes + 9 + coord_dim
    enc_slab = max(_LANE, _round_up(enc_total, _LANE))
    reg_off = num_classes + 9

    mem2 = memory.reshape(num_enc, R, E)
    ref_stack = jnp.concatenate(
        [point_init_ref_points[None], point_inter_ref_points],
        axis=0).reshape(num_enc, R, coord_dim)
    # Reference placed at the reg columns of a lane-dense slab (zeros elsewhere
    # — those columns are masked inside the kernel, so their value is ignored).
    ref_slab = jnp.pad(ref_stack,
                       ((0, 0), (0, 0),
                        (reg_off, enc_slab - reg_off - coord_dim)))

    e_fcw, e_fcb, e_lng, e_lnb, e_outw, e_outb = _pack_encoder_params(
        params, num_classes, enc_slab)

    enc_out = pl.pallas_call(
        _make_encoder_kernel(num_reg_fcs, reg_off),
        out_shape=jax.ShapeDtypeStruct((num_enc, R, enc_slab), jnp.float32),
        grid=(num_enc,),
        in_specs=[_lvl_spec(mem2), _lvl_spec(ref_slab), _lvl_spec(e_fcw),
                  _lvl_spec(e_fcb), _lvl_spec(e_lng), _lvl_spec(e_lnb),
                  _lvl_spec(e_outw), _lvl_spec(e_outb)],
        out_specs=pl.BlockSpec((None, R, enc_slab), lambda l: (l, 0, 0)),
        compiler_params=pltpu.CompilerParams(
            dimension_semantics=("parallel",)),
    )(mem2, ref_slab, e_fcw, e_fcb, e_lng, e_lnb, e_outw, e_outb)

    all_raw_points_score = enc_out[..., :num_classes].reshape(
        num_enc, bs, n_pt, num_classes)
    all_point_masks = enc_out[..., num_classes:num_classes + 9].reshape(
        num_enc, bs, n_pt, 9)
    all_raw_points = enc_out[..., reg_off:reg_off + coord_dim].reshape(
        num_enc, bs, n_pt, coord_dim)

    # ---------------- decoder path: fused cls+reg, grid over layers ----------
    R2 = bs * num_line * num_points
    L2 = bs * num_line
    dec_slab = max(_LANE, _round_up(max(num_classes, coord_dim), _LANE))
    dec2 = outs_dec.reshape(num_dec, R2, E)

    # Constant block-diagonal averaging matrix (L2, R2): row g averages the
    # num_points tokens of line g. Built once here; shared (VMEM-resident)
    # across grid steps inside the kernel — no per-step iota/select on VPU.
    row = jnp.arange(L2, dtype=jnp.int32)[:, None]
    col = jnp.arange(R2, dtype=jnp.int32)[None, :]
    avg_mat = jnp.where(
        (col >= row * num_points) & (col < (row + 1) * num_points),
        jnp.float32(1.0 / num_points), jnp.float32(0.0))

    d_fcw, d_fcb, d_lng, d_lnb, d_outw, d_outb = _pack_decoder_params(
        params, dec_slab)

    cls_slab, reg_slab = pl.pallas_call(
        _make_decoder_kernel(num_reg_fcs),
        out_shape=(jax.ShapeDtypeStruct((num_dec, L2, dec_slab), jnp.float32),
                   jax.ShapeDtypeStruct((num_dec, R2, dec_slab), jnp.float32)),
        grid=(num_dec,),
        in_specs=[_lvl_spec(dec2), _full_spec(avg_mat), _full_spec(d_fcw),
                  _full_spec(d_fcb), _full_spec(d_lng), _full_spec(d_lnb),
                  _full_spec(d_outw), _full_spec(d_outb)],
        out_specs=(pl.BlockSpec((None, L2, dec_slab), lambda l: (l, 0, 0)),
                   pl.BlockSpec((None, R2, dec_slab), lambda l: (l, 0, 0))),
        compiler_params=pltpu.CompilerParams(
            dimension_semantics=("parallel",)),
    )(dec2, avg_mat, d_fcw, d_fcb, d_lng, d_lnb, d_outw, d_outb)

    all_cls_scores = cls_slab[..., :num_classes].reshape(
        num_dec, bs, num_line, num_classes)
    all_line_preds = reg_slab[..., :coord_dim].reshape(
        num_dec, bs, num_line, num_points, coord_dim)

    return {
        "all_raw_points": all_raw_points,
        "all_raw_points_score": all_raw_points_score,
        "all_point_masks": all_point_masks,
        "all_cls_scores": all_cls_scores,
        "all_line_preds": all_line_preds,
    }


# ----------------------------------------------------------------------------
# Pure-JAX reference (mirrors the PyTorch forward) for a correctness check
# ----------------------------------------------------------------------------
def pmn_head_forward_ref(memory, outs_dec, point_init_ref_points,
                         point_inter_ref_points, params, *, num_classes,
                         num_line, num_points, num_reg_fcs, coord_dim):
    hp = jax.lax.Precision.HIGHEST

    def branch(x, p, use_ln):
        h = x
        for f in range(num_reg_fcs):
            h = jnp.dot(h, p["fc_w"][f], precision=hp) + p["fc_b"][f]
            if use_ln:
                mu = h.mean(-1, keepdims=True)
                var = ((h - mu) ** 2).mean(-1, keepdims=True)
                h = (h - mu) / jnp.sqrt(var + _LN_EPS) * p["ln_g"][f] + p["ln_b"][f]
            h = jnp.maximum(h, 0.0)
        return jnp.dot(h, p["out_w"], precision=hp) + p["out_b"]

    def inv_sig(x):
        x = jnp.clip(x, 0.0, 1.0)
        return jnp.log(jnp.maximum(x, _INV_SIG_EPS) /
                       jnp.maximum(1.0 - x, _INV_SIG_EPS))

    memory = jnp.nan_to_num(memory)
    outs_dec = jnp.nan_to_num(outs_dec)
    num_enc, bs, n_pt, E = memory.shape
    num_dec = outs_dec.shape[0]

    raw_pts, masks, scores = [], [], []
    for lvl in range(num_enc):
        reference = (point_init_ref_points if lvl == 0
                     else point_inter_ref_points[lvl - 1])
        m = memory[lvl]
        scores.append(branch(m, params["point_cls"][lvl], True))
        masks.append(branch(m, params["point_mask"][lvl], True))
        raw_pts.append(jax.nn.sigmoid(
            inv_sig(reference) + branch(m, params["point_reg"][lvl], False)))

    cls_s, line_p = [], []
    for lvl in range(num_dec):
        dec = outs_dec[lvl]
        dec_mean = dec.reshape(bs, num_line, num_points, E).mean(2)
        cls_s.append(branch(dec_mean, params["cls"], True))
        reg = jax.nn.sigmoid(branch(dec, params["reg"], False))
        line_p.append(reg.reshape(bs, num_line, num_points, coord_dim))

    return {
        "all_raw_points": jnp.stack(raw_pts),
        "all_raw_points_score": jnp.stack(scores),
        "all_point_masks": jnp.stack(masks),
        "all_cls_scores": jnp.stack(cls_s),
        "all_line_preds": jnp.stack(line_p),
    }


# ----------------------------------------------------------------------------
# Demo
# ----------------------------------------------------------------------------
NUM_CLASSES = 3
NUM_LINE = 8
NUM_POINTS = 4
NUM_RAW_POINT = 64
NUM_REG_FCS = 2
EMBED_DIMS = 32
COORD_DIM = 2
NUM_ENC_LAYER = 2
NUM_DEC_LAYER = 2
BS = 2

if __name__ == "__main__":
    key = jax.random.PRNGKey(0)
    kp, km, kd, kr0, kr1 = jax.random.split(key, 5)

    params = init_pmn_head_params(
        kp, embed_dims=EMBED_DIMS, num_classes=NUM_CLASSES,
        num_reg_fcs=NUM_REG_FCS, num_enc_layer=NUM_ENC_LAYER,
        num_dec_layer=NUM_DEC_LAYER, num_raw_point=NUM_RAW_POINT,
        coord_dim=COORD_DIM)

    # Synthetic transformer outputs (external module, see TODO above).
    memory = jax.random.normal(
        km, (NUM_ENC_LAYER, BS, NUM_RAW_POINT, EMBED_DIMS), jnp.float32)
    outs_dec = jax.random.normal(
        kd, (NUM_DEC_LAYER, BS, NUM_LINE * NUM_POINTS, EMBED_DIMS), jnp.float32)
    point_init_ref_points = jax.random.uniform(
        kr0, (BS, NUM_RAW_POINT, COORD_DIM), jnp.float32, 0.05, 0.95)
    point_inter_ref_points = jax.random.uniform(
        kr1, (NUM_ENC_LAYER - 1, BS, NUM_RAW_POINT, COORD_DIM),
        jnp.float32, 0.05, 0.95)

    kwargs = dict(num_classes=NUM_CLASSES, num_line=NUM_LINE,
                  num_points=NUM_POINTS, num_reg_fcs=NUM_REG_FCS,
                  coord_dim=COORD_DIM)
    fwd = jax.jit(functools.partial(pmn_head_forward, **kwargs))

    outputs = fwd(memory, outs_dec, point_init_ref_points,
                  point_inter_ref_points, params)
    jax.block_until_ready(outputs)

    assert outputs["all_raw_points"].shape == (
        NUM_ENC_LAYER, BS, NUM_RAW_POINT, COORD_DIM)
    assert outputs["all_raw_points_score"].shape == (
        NUM_ENC_LAYER, BS, NUM_RAW_POINT, NUM_CLASSES)
    assert outputs["all_point_masks"].shape == (
        NUM_ENC_LAYER, BS, NUM_RAW_POINT, 9)
    assert outputs["all_cls_scores"].shape == (
        NUM_DEC_LAYER, BS, NUM_LINE, NUM_CLASSES)
    assert outputs["all_line_preds"].shape == (
        NUM_DEC_LAYER, BS, NUM_LINE, NUM_POINTS, COORD_DIM)

    # Numerical check against a pure-JAX reference of the PyTorch forward.
    ref_out = pmn_head_forward_ref(memory, outs_dec, point_init_ref_points,
                                   point_inter_ref_points, params, **kwargs)
    for name in outputs:
        err = float(jnp.max(jnp.abs(outputs[name] - ref_out[name])))
        assert err < 2e-3, f"mismatch in {name}: max abs err {err}"

    print("KERNEL_OK")
</pallas_src>

<mosaic_0001>
module attributes {stable_mosaic.version = 11 : i64} {
  func.func @kernel(%arg0: i32, %arg1: memref<1x128x32xf32, #tpu.memory_space<vmem>>, %arg2: memref<1x128x128xf32, #tpu.memory_space<vmem>>, %arg3: memref<1x6x32x32xf32, #tpu.memory_space<vmem>>, %arg4: memref<1x6x1x32xf32, #tpu.memory_space<vmem>>, %arg5: memref<1x4x1x32xf32, #tpu.memory_space<vmem>>, %arg6: memref<1x4x1x32xf32, #tpu.memory_space<vmem>>, %arg7: memref<1x3x32x128xf32, #tpu.memory_space<vmem>>, %arg8: memref<1x3x1x128xf32, #tpu.memory_space<vmem>>, %arg9: memref<1x128x128xf32, #tpu.memory_space<vmem>>) attributes {dimension_semantics = [#tpu.dimension_semantics<parallel>], iteration_bounds = array<i64: 2>, scalar_prefetch = 0 : i64, scratch_operands = 0 : i64, tpu.core_type = #tpu.core_type<tc>, window_params = [{transform_indices = @transform_0, window_bounds = array<i64: 1, 128, 32>}, {transform_indices = @transform_1, window_bounds = array<i64: 1, 128, 128>}, {transform_indices = @transform_2, window_bounds = array<i64: 1, 6, 32, 32>}, {transform_indices = @transform_3, window_bounds = array<i64: 1, 6, 1, 32>}, {transform_indices = @transform_4, window_bounds = array<i64: 1, 4, 1, 32>}, {transform_indices = @transform_5, window_bounds = array<i64: 1, 4, 1, 32>}, {transform_indices = @transform_6, window_bounds = array<i64: 1, 3, 32, 128>}, {transform_indices = @transform_7, window_bounds = array<i64: 1, 3, 1, 128>}, {transform_indices = @transform_8, window_bounds = array<i64: 1, 128, 128>}]} {
    %c0 = arith.constant 0 : index
    %c0_0 = arith.constant 0 : index
    %c0_1 = arith.constant 0 : index
    %0 = vector.load %arg1[%c0, %c0_0, %c0_1] : memref<1x128x32xf32, #tpu.memory_space<vmem>>, vector<1x128x32xf32>
    %1 = vector.shape_cast %0 : vector<1x128x32xf32> to vector<128x32xf32>
    %2 = arith.cmpf one, %1, %1 : vector<128x32xf32>
    %cst = arith.constant 0.000000e+00 : f32
    %3 = vector.broadcast %cst : f32 to vector<128x32xf32>
    %4 = arith.select %2, %3, %1 : vector<128x32xi1>, vector<128x32xf32>
    %cst_2 = arith.constant 0.000000e+00 : f32
    %cst_3 = arith.constant 3.40282347E+38 : f32
    %5 = arith.subf %cst_2, %cst_3 : f32
    %cst_4 = arith.constant 3.40282347E+38 : f32
    %6 = vector.broadcast %5 : f32 to vector<128x32xf32>
    %7 = arith.maximumf %6, %4 : vector<128x32xf32>
    %8 = vector.broadcast %cst_4 : f32 to vector<128x32xf32>
    %9 = arith.minimumf %8, %7 : vector<128x32xf32>
    %c0_5 = arith.constant 0 : index
    %c0_6 = arith.constant 0 : index
    %c0_7 = arith.constant 0 : index
    %c0_8 = arith.constant 0 : index
    %10 = vector.load %arg3[%c0_5, %c0_6, %c0_7, %c0_8] : memref<1x6x32x32xf32, #tpu.memory_space<vmem>>, vector<1x1x32x32xf32>
    %11 = vector.shape_cast %10 : vector<1x1x32x32xf32> to vector<32x32xf32>
    %c0_9 = arith.constant 0 : index
    %c0_10 = arith.constant 0 : index
    %c0_11 = arith.constant 0 : index
    %c0_12 = arith.constant 0 : index
    %12 = vector.load %arg4[%c0_9, %c0_10, %c0_11, %c0_12] : memref<1x6x1x32xf32, #tpu.memory_space<vmem>>, vector<1x1x1x32xf32>
    %13 = vector.shape_cast %12 : vector<1x1x1x32xf32> to vector<1x32xf32>
    %cst_13 = arith.constant dense<0.000000e+00> : vector<128x32xf32>
    %14 = tpu.matmul %9, %11, %cst_13 {dimension_numbers = #tpu.dot_dimension_numbers<[1], [0], [0], [1], [0, 0, 1, 1], [], []>} : vector<128x32xf32>, vector<32x32xf32>, vector<128x32xf32> -> vector<128x32xf32>
    %15 = vector.broadcast %13 : vector<1x32xf32> to vector<128x32xf32>
    %16 = arith.addf %14, %15 : vector<128x32xf32>
    %c0_14 = arith.constant 0 : index
    %c0_15 = arith.constant 0 : index
    %c0_16 = arith.constant 0 : index
    %c0_17 = arith.constant 0 : index
    %17 = vector.load %arg5[%c0_14, %c0_15, %c0_16, %c0_17] : memref<1x4x1x32xf32, #tpu.memory_space<vmem>>, vector<1x1x1x32xf32>
    %18 = vector.shape_cast %17 : vector<1x1x1x32xf32> to vector<1x32xf32>
    %c0_18 = arith.constant 0 : index
    %c0_19 = arith.constant 0 : index
    %c0_20 = arith.constant 0 : index
    %c0_21 = arith.constant 0 : index
    %19 = vector.load %arg6[%c0_18, %c0_19, %c0_20, %c0_21] : memref<1x4x1x32xf32, #tpu.memory_space<vmem>>, vector<1x1x1x32xf32>
    %20 = vector.shape_cast %19 : vector<1x1x1x32xf32> to vector<1x32xf32>
    %cst_22 = arith.constant dense<0.000000e+00> : vector<128xf32>
    %21 = vector.multi_reduction <add>, %16, %cst_22 [1] : vector<128x32xf32> to vector<128xf32>
    %22 = vector.shape_cast %21 : vector<128xf32> to vector<128x1xf32>
    %cst_23 = arith.constant 3.200000e+01 : f32
    %23 = vector.broadcast %cst_23 : f32 to vector<128x1xf32>
    %24 = arith.divf %22, %23 : vector<128x1xf32>
    %25 = vector.broadcast %24 : vector<128x1xf32> to vector<128x32xf32>
    %26 = arith.subf %16, %25 : vector<128x32xf32>
    %27 = arith.mulf %26, %26 : vector<128x32xf32>
    %cst_24 = arith.constant dense<0.000000e+00> : vector<128xf32>
    %28 = vector.multi_reduction <add>, %27, %cst_24 [1] : vector<128x32xf32> to vector<128xf32>
    %29 = vector.shape_cast %28 : vector<128xf32> to vector<128x1xf32>
    %cst_25 = arith.constant 3.200000e+01 : f32
    %30 = vector.broadcast %cst_25 : f32 to vector<128x1xf32>
    %31 = arith.divf %29, %30 : vector<128x1xf32>
    %32 = vector.broadcast %24 : vector<128x1xf32> to vector<128x32xf32>
    %33 = arith.subf %16, %32 : vector<128x32xf32>
    %cst_26 = arith.constant 9.99999974E-6 : f32
    %34 = vector.broadcast %cst_26 : f32 to vector<128x1xf32>
    %35 = arith.addf %31, %34 : vector<128x1xf32>
    %36 = math.rsqrt %35 : vector<128x1xf32>
    %37 = vector.broadcast %36 : vector<128x1xf32> to vector<128x32xf32>
    %38 = arith.mulf %33, %37 : vector<128x32xf32>
    %39 = vector.broadcast %18 : vector<1x32xf32> to vector<128x32xf32>
    %40 = arith.mulf %38, %39 : vector<128x32xf32>
    %41 = vector.broadcast %20 : vector<1x32xf32> to vector<128x32xf32>
    %42 = arith.addf %40, %41 : vector<128x32xf32>
    %cst_27 = arith.constant 0.000000e+00 : f32
    %43 = vector.broadcast %cst_27 : f32 to vector<128x32xf32>
    %44 = arith.maximumf %42, %43 : vector<128x32xf32>
    %c0_28 = arith.constant 0 : index
    %c1 = arith.constant 1 : index
    %c0_29 = arith.constant 0 : index
    %c0_30 = arith.constant 0 : index
    %45 = vector.load %arg3[%c0_28, %c1, %c0_29, %c0_30] : memref<1x6x32x32xf32, #tpu.memory_space<vmem>>, vector<1x1x32x32xf32>
    %46 = vector.shape_cast %45 : vector<1x1x32x32xf32> to vector<32x32xf32>
    %c0_31 = arith.constant 0 : index
    %c1_32 = arith.constant 1 : index
    %c0_33 = arith.constant 0 : index
    %c0_34 = arith.constant 0 : index
    %47 = vector.load %arg4[%c0_31, %c1_32, %c0_33, %c0_34] : memref<1x6x1x32xf32, #tpu.memory_space<vmem>>, vector<1x1x1x32xf32>
    %48 = vector.shape_cast %47 : vector<1x1x1x32xf32> to vector<1x32xf32>
    %cst_35 = arith.constant dense<0.000000e+00> : vector<128x32xf32>
    %49 = tpu.matmul %44, %46, %cst_35 {dimension_numbers = #tpu.dot_dimension_numbers<[1], [0], [0], [1], [0, 0, 1, 1], [], []>} : vector<128x32xf32>, vector<32x32xf32>, vector<128x32xf32> -> vector<128x32xf32>
    %50 = vector.broadcast %48 : vector<1x32xf32> to vector<128x32xf32>
    %51 = arith.addf %49, %50 : vector<128x32xf32>
    %c0_36 = arith.constant 0 : index
    %c1_37 = arith.constant 1 : index
    %c0_38 = arith.constant 0 : index
    %c0_39 = arith.constant 0 : index
    %52 = vector.load %arg5[%c0_36, %c1_37, %c0_38, %c0_39] : memref<1x4x1x32xf32, #tpu.memory_space<vmem>>, vector<1x1x1x32xf32>
    %53 = vector.shape_cast %52 : vector<1x1x1x32xf32> to vector<1x32xf32>
    %c0_40 = arith.constant 0 : index
    %c1_41 = arith.constant 1 : index
    %c0_42 = arith.constant 0 : index
    %c0_43 = arith.constant 0 : index
    %54 = vector.load %arg6[%c0_40, %c1_41, %c0_42, %c0_43] : memref<1x4x1x32xf32, #tpu.memory_space<vmem>>, vector<1x1x1x32xf32>
    %55 = vector.shape_cast %54 : vector<1x1x1x32xf32> to vector<1x32xf32>
    %cst_44 = arith.constant dense<0.000000e+00> : vector<128xf32>
    %56 = vector.multi_reduction <add>, %51, %cst_44 [1] : vector<128x32xf32> to vector<128xf32>
    %57 = vector.shape_cast %56 : vector<128xf32> to vector<128x1xf32>
    %cst_45 = arith.constant 3.200000e+01 : f32
    %58 = vector.broadcast %cst_45 : f32 to vector<128x1xf32>
    %59 = arith.divf %57, %58 : vector<128x1xf32>
    %60 = vector.broadcast %59 : vector<128x1xf32> to vector<128x32xf32>
    %61 = arith.subf %51, %60 : vector<128x32xf32>
    %62 = arith.mulf %61, %61 : vector<128x32xf32>
    %cst_46 = arith.constant dense<0.000000e+00> : vector<128xf32>
    %63 = vector.multi_reduction <add>, %62, %cst_46 [1] : vector<128x32xf32> to vector<128xf32>
    %64 = vector.shape_cast %63 : vector<128xf32> to vector<128x1xf32>
    %cst_47 = arith.constant 3.200000e+01 : f32
    %65 = vector.broadcast %cst_47 : f32 to vector<128x1xf32>
    %66 = arith.divf %64, %65 : vector<128x1xf32>
    %67 = vector.broadcast %59 : vector<128x1xf32> to vector<128x32xf32>
    %68 = arith.subf %51, %67 : vector<128x32xf32>
    %cst_48 = arith.constant 9.99999974E-6 : f32
    %69 = vector.broadcast %cst_48 : f32 to vector<128x1xf32>
    %70 = arith.addf %66, %69 : vector<128x1xf32>
    %71 = math.rsqrt %70 : vector<128x1xf32>
    %72 = vector.broadcast %71 : vector<128x1xf32> to vector<128x32xf32>
    %73 = arith.mulf %68, %72 : vector<128x32xf32>
    %74 = vector.broadcast %53 : vector<1x32xf32> to vector<128x32xf32>
    %75 = arith.mulf %73, %74 : vector<128x32xf32>
    %76 = vector.broadcast %55 : vector<1x32xf32> to vector<128x32xf32>
    %77 = arith.addf %75, %76 : vector<128x32xf32>
    %cst_49 = arith.constant 0.000000e+00 : f32
    %78 = vector.broadcast %cst_49 : f32 to vector<128x32xf32>
    %79 = arith.maximumf %77, %78 : vector<128x32xf32>
    %c0_50 = arith.constant 0 : index
    %c2 = arith.constant 2 : index
    %c0_51 = arith.constant 0 : index
    %c0_52 = arith.constant 0 : index
    %80 = vector.load %arg3[%c0_50, %c2, %c0_51, %c0_52] : memref<1x6x32x32xf32, #tpu.memory_space<vmem>>, vector<1x1x32x32xf32>
    %81 = vector.shape_cast %80 : vector<1x1x32x32xf32> to vector<32x32xf32>
    %c0_53 = arith.constant 0 : index
    %c2_54 = arith.constant 2 : index
    %c0_55 = arith.constant 0 : index
    %c0_56 = arith.constant 0 : index
    %82 = vector.load %arg4[%c0_53, %c2_54, %c0_55, %c0_56] : memref<1x6x1x32xf32, #tpu.memory_space<vmem>>, vector<1x1x1x32xf32>
    %83 = vector.shape_cast %82 : vector<1x1x1x32xf32> to vector<1x32xf32>
    %cst_57 = arith.constant dense<0.000000e+00> : vector<128x32xf32>
    %84 = tpu.matmul %9, %81, %cst_57 {dimension_numbers = #tpu.dot_dimension_numbers<[1], [0], [0], [1], [0, 0, 1, 1], [], []>} : vector<128x32xf32>, vector<32x32xf32>, vector<128x32xf32> -> vector<128x32xf32>
    %85 = vector.broadcast %83 : vector<1x32xf32> to vector<128x32xf32>
    %86 = arith.addf %84, %85 : vector<128x32xf32>
    %c0_58 = arith.constant 0 : index
    %c2_59 = arith.constant 2 : index
    %c0_60 = arith.constant 0 : index
    %c0_61 = arith.constant 0 : index
    %87 = vector.load %arg5[%c0_58, %c2_59, %c0_60, %c0_61] : memref<1x4x1x32xf32, #tpu.memory_space<vmem>>, vector<1x1x1x32xf32>
    %88 = vector.shape_cast %87 : vector<1x1x1x32xf32> to vector<1x32xf32>
    %c0_62 = arith.constant 0 : index
    %c2_63 = arith.constant 2 : index
    %c0_64 = arith.constant 0 : index
    %c0_65 = arith.constant 0 : index
    %89 = vector.load %arg6[%c0_62, %c2_63, %c0_64, %c0_65] : memref<1x4x1x32xf32, #tpu.memory_space<vmem>>, vector<1x1x1x32xf32>
    %90 = vector.shape_cast %89 : vector<1x1x1x32xf32> to vector<1x32xf32>
    %cst_66 = arith.constant dense<0.000000e+00> : vector<128xf32>
    %91 = vector.multi_reduction <add>, %86, %cst_66 [1] : vector<128x32xf32> to vector<128xf32>
    %92 = vector.shape_cast %91 : vector<128xf32> to vector<128x1xf32>
    %cst_67 = arith.constant 3.200000e+01 : f32
    %93 = vector.broadcast %cst_67 : f32 to vector<128x1xf32>
    %94 = arith.divf %92, %93 : vector<128x1xf32>
    %95 = vector.broadcast %94 : vector<128x1xf32> to vector<128x32xf32>
    %96 = arith.subf %86, %95 : vector<128x32xf32>
    %97 = arith.mulf %96, %96 : vector<128x32xf32>
    %cst_68 = arith.constant dense<0.000000e+00> : vector<128xf32>
    %98 = vector.multi_reduction <add>, %97, %cst_68 [1] : vector<128x32xf32> to vector<128xf32>
    %99 = vector.shape_cast %98 : vector<128xf32> to vector<128x1xf32>
    %cst_69 = arith.constant 3.200000e+01 : f32
    %100 = vector.broadcast %cst_69 : f32 to vector<128x1xf32>
    %101 = arith.divf %99, %100 : vector<128x1xf32>
    %102 = vector.broadcast %94 : vector<128x1xf32> to vector<128x32xf32>
    %103 = arith.subf %86, %102 : vector<128x32xf32>
    %cst_70 = arith.constant 9.99999974E-6 : f32
    %104 = vector.broadcast %cst_70 : f32 to vector<128x1xf32>
    %105 = arith.addf %101, %104 : vector<128x1xf32>
    %106 = math.rsqrt %105 : vector<128x1xf32>
    %107 = vector.broadcast %106 : vector<128x1xf32> to vector<128x32xf32>
    %108 = arith.mulf %103, %107 : vector<128x32xf32>
    %109 = vector.broadcast %88 : vector<1x32xf32> to vector<128x32xf32>
    %110 = arith.mulf %108, %109 : vector<128x32xf32>
    %111 = vector.broadcast %90 : vector<1x32xf32> to vector<128x32xf32>
    %112 = arith.addf %110, %111 : vector<128x32xf32>
    %cst_71 = arith.constant 0.000000e+00 : f32
    %113 = vector.broadcast %cst_71 : f32 to vector<128x32xf32>
    %114 = arith.maximumf %112, %113 : vector<128x32xf32>
    %c0_72 = arith.constant 0 : index
    %c3 = arith.constant 3 : index
    %c0_73 = arith.constant 0 : index
    %c0_74 = arith.constant 0 : index
    %115 = vector.load %arg3[%c0_72, %c3, %c0_73, %c0_74] : memref<1x6x32x32xf32, #tpu.memory_space<vmem>>, vector<1x1x32x32xf32>
    %116 = vector.shape_cast %115 : vector<1x1x32x32xf32> to vector<32x32xf32>
    %c0_75 = arith.constant 0 : index
    %c3_76 = arith.constant 3 : index
    %c0_77 = arith.constant 0 : index
    %c0_78 = arith.constant 0 : index
    %117 = vector.load %arg4[%c0_75, %c3_76, %c0_77, %c0_78] : memref<1x6x1x32xf32, #tpu.memory_space<vmem>>, vector<1x1x1x32xf32>
    %118 = vector.shape_cast %117 : vector<1x1x1x32xf32> to vector<1x32xf32>
    %cst_79 = arith.constant dense<0.000000e+00> : vector<128x32xf32>
    %119 = tpu.matmul %114, %116, %cst_79 {dimension_numbers = #tpu.dot_dimension_numbers<[1], [0], [0], [1], [0, 0, 1, 1], [], []>} : vector<128x32xf32>, vector<32x32xf32>, vector<128x32xf32> -> vector<128x32xf32>
    %120 = vector.broadcast %118 : vector<1x32xf32> to vector<128x32xf32>
    %121 = arith.addf %119, %120 : vector<128x32xf32>
    %c0_80 = arith.constant 0 : index
    %c3_81 = arith.constant 3 : index
    %c0_82 = arith.constant 0 : index
    %c0_83 = arith.constant 0 : index
    %122 = vector.load %arg5[%c0_80, %c3_81, %c0_82, %c0_83] : memref<1x4x1x32xf32, #tpu.memory_space<vmem>>, vector<1x1x1x32xf32>
    %123 = vector.shape_cast %122 : vector<1x1x1x32xf32> to vector<1x32xf32>
    %c0_84 = arith.constant 0 : index
    %c3_85 = arith.constant 3 : index
    %c0_86 = arith.constant 0 : index
    %c0_87 = arith.constant 0 : index
    %124 = vector.load %arg6[%c0_84, %c3_85, %c0_86, %c0_87] : memref<1x4x1x32xf32, #tpu.memory_space<vmem>>, vector<1x1x1x32xf32>
    %125 = vector.shape_cast %124 : vector<1x1x1x32xf32> to vector<1x32xf32>
    %cst_88 = arith.constant dense<0.000000e+00> : vector<128xf32>
    %126 = vector.multi_reduction <add>, %121, %cst_88 [1] : vector<128x32xf32> to vector<128xf32>
    %127 = vector.shape_cast %126 : vector<128xf32> to vector<128x1xf32>
    %cst_89 = arith.constant 3.200000e+01 : f32
    %128 = vector.broadcast %cst_89 : f32 to vector<128x1xf32>
    %129 = arith.divf %127, %128 : vector<128x1xf32>
    %130 = vector.broadcast %129 : vector<128x1xf32> to vector<128x32xf32>
    %131 = arith.subf %121, %130 : vector<128x32xf32>
    %132 = arith.mulf %131, %131 : vector<128x32xf32>
    %cst_90 = arith.constant dense<0.000000e+00> : vector<128xf32>
    %133 = vector.multi_reduction <add>, %132, %cst_90 [1] : vector<128x32xf32> to vector<128xf32>
    %134 = vector.shape_cast %133 : vector<128xf32> to vector<128x1xf32>
    %cst_91 = arith.constant 3.200000e+01 : f32
    %135 = vector.broadcast %cst_91 : f32 to vector<128x1xf32>
    %136 = arith.divf %134, %135 : vector<128x1xf32>
    %137 = vector.broadcast %129 : vector<128x1xf32> to vector<128x32xf32>
    %138 = arith.subf %121, %137 : vector<128x32xf32>
    %cst_92 = arith.constant 9.99999974E-6 : f32
    %139 = vector.broadcast %cst_92 : f32 to vector<128x1xf32>
    %140 = arith.addf %136, %139 : vector<128x1xf32>
    %141 = math.rsqrt %140 : vector<128x1xf32>
    %142 = vector.broadcast %141 : vector<128x1xf32> to vector<128x32xf32>
    %143 = arith.mulf %138, %142 : vector<128x32xf32>
    %144 = vector.broadcast %123 : vector<1x32xf32> to vector<128x32xf32>
    %145 = arith.mulf %143, %144 : vector<128x32xf32>
    %146 = vector.broadcast %125 : vector<1x32xf32> to vector<128x32xf32>
    %147 = arith.addf %145, %146 : vector<128x32xf32>
    %cst_93 = arith.constant 0.000000e+00 : f32
    %148 = vector.broadcast %cst_93 : f32 to vector<128x32xf32>
    %149 = arith.maximumf %147, %148 : vector<128x32xf32>
    %c0_94 = arith.constant 0 : index
    %c4 = arith.constant 4 : index
    %c0_95 = arith.constant 0 : index
    %c0_96 = arith.constant 0 : index
    %150 = vector.load %arg3[%c0_94, %c4, %c0_95, %c0_96] : memref<1x6x32x32xf32, #tpu.memory_space<vmem>>, vector<1x1x32x32xf32>
    %151 = vector.shape_cast %150 : vector<1x1x32x32xf32> to vector<32x32xf32>
    %c0_97 = arith.constant 0 : index
    %c4_98 = arith.constant 4 : index
    %c0_99 = arith.constant 0 : index
    %c0_100 = arith.constant 0 : index
    %152 = vector.load %arg4[%c0_97, %c4_98, %c0_99, %c0_100] : memref<1x6x1x32xf32, #tpu.memory_space<vmem>>, vector<1x1x1x32xf32>
    %153 = vector.shape_cast %152 : vector<1x1x1x32xf32> to vector<1x32xf32>
    %cst_101 = arith.constant dense<0.000000e+00> : vector<128x32xf32>
    %154 = tpu.matmul %9, %151, %cst_101 {dimension_numbers = #tpu.dot_dimension_numbers<[1], [0], [0], [1], [0, 0, 1, 1], [], []>} : vector<128x32xf32>, vector<32x32xf32>, vector<128x32xf32> -> vector<128x32xf32>
    %155 = vector.broadcast %153 : vector<1x32xf32> to vector<128x32xf32>
    %156 = arith.addf %154, %155 : vector<128x32xf32>
    %cst_102 = arith.constant 0.000000e+00 : f32
    %157 = vector.broadcast %cst_102 : f32 to vector<128x32xf32>
    %158 = arith.maximumf %156, %157 : vector<128x32xf32>
    %c0_103 = arith.constant 0 : index
    %c5 = arith.constant 5 : index
    %c0_104 = arith.constant 0 : index
    %c0_105 = arith.constant 0 : index
    %159 = vector.load %arg3[%c0_103, %c5, %c0_104, %c0_105] : memref<1x6x32x32xf32, #tpu.memory_space<vmem>>, vector<1x1x32x32xf32>
    %160 = vector.shape_cast %159 : vector<1x1x32x32xf32> to vector<32x32xf32>
    %c0_106 = arith.constant 0 : index
    %c5_107 = arith.constant 5 : index
    %c0_108 = arith.constant 0 : index
    %c0_109 = arith.constant 0 : index
    %161 = vector.load %arg4[%c0_106, %c5_107, %c0_108, %c0_109] : memref<1x6x1x32xf32, #tpu.memory_space<vmem>>, vector<1x1x1x32xf32>
    %162 = vector.shape_cast %161 : vector<1x1x1x32xf32> to vector<1x32xf32>
    %cst_110 = arith.constant dense<0.000000e+00> : vector<128x32xf32>
    %163 = tpu.matmul %158, %160, %cst_110 {dimension_numbers = #tpu.dot_dimension_numbers<[1], [0], [0], [1], [0, 0, 1, 1], [], []>} : vector<128x32xf32>, vector<32x32xf32>, vector<128x32xf32> -> vector<128x32xf32>
    %164 = vector.broadcast %162 : vector<1x32xf32> to vector<128x32xf32>
    %165 = arith.addf %163, %164 : vector<128x32xf32>
    %cst_111 = arith.constant 0.000000e+00 : f32
    %166 = vector.broadcast %cst_111 : f32 to vector<128x32xf32>
    %167 = arith.maximumf %165, %166 : vector<128x32xf32>
    %c0_112 = arith.constant 0 : index
    %c0_113 = arith.constant 0 : index
    %c0_114 = arith.constant 0 : index
    %c0_115 = arith.constant 0 : index
    %168 = vector.load %arg7[%c0_112, %c0_113, %c0_114, %c0_115] : memref<1x3x32x128xf32, #tpu.memory_space<vmem>>, vector<1x1x32x128xf32>
    %169 = vector.shape_cast %168 : vector<1x1x32x128xf32> to vector<32x128xf32>
    %cst_116 = arith.constant dense<0.000000e+00> : vector<128x128xf32>
    %170 = tpu.matmul %79, %169, %cst_116 {dimension_numbers = #tpu.dot_dimension_numbers<[1], [0], [0], [1], [0, 0, 1, 1], [], []>} : vector<128x32xf32>, vector<32x128xf32>, vector<128x128xf32> -> vector<128x128xf32>
    %c0_117 = arith.constant 0 : index
    %c0_118 = arith.constant 0 : index
    %c0_119 = arith.constant 0 : index
    %c0_120 = arith.constant 0 : index
    %171 = vector.load %arg8[%c0_117, %c0_118, %c0_119, %c0_120] : memref<1x3x1x128xf32, #tpu.memory_space<vmem>>, vector<1x1x1x128xf32>
    %172 = vector.shape_cast %171 : vector<1x1x1x128xf32> to vector<1x128xf32>
    %173 = vector.broadcast %172 : vector<1x128xf32> to vector<128x128xf32>
    %174 = arith.addf %170, %173 : vector<128x128xf32>
    %c0_121 = arith.constant 0 : index
    %c1_122 = arith.constant 1 : index
    %c0_123 = arith.constant 0 : index
    %c0_124 = arith.constant 0 : index
    %175 = vector.load %arg7[%c0_121, %c1_122, %c0_123, %c0_124] : memref<1x3x32x128xf32, #tpu.memory_space<vmem>>, vector<1x1x32x128xf32>
    %176 = vector.shape_cast %175 : vector<1x1x32x128xf32> to vector<32x128xf32>
    %cst_125 = arith.constant dense<0.000000e+00> : vector<128x128xf32>
    %177 = tpu.matmul %149, %176, %cst_125 {dimension_numbers = #tpu.dot_dimension_numbers<[1], [0], [0], [1], [0, 0, 1, 1], [], []>} : vector<128x32xf32>, vector<32x128xf32>, vector<128x128xf32> -> vector<128x128xf32>
    %c0_126 = arith.constant 0 : index
    %c1_127 = arith.constant 1 : index
    %c0_128 = arith.constant 0 : index
    %c0_129 = arith.constant 0 : index
    %178 = vector.load %arg8[%c0_126, %c1_127, %c0_128, %c0_129] : memref<1x3x1x128xf32, #tpu.memory_space<vmem>>, vector<1x1x1x128xf32>
    %179 = vector.shape_cast %178 : vector<1x1x1x128xf32> to vector<1x128xf32>
    %180 = vector.broadcast %179 : vector<1x128xf32> to vector<128x128xf32>
    %181 = arith.addf %177, %180 : vector<128x128xf32>
    %c0_130 = arith.constant 0 : index
    %c2_131 = arith.constant 2 : index
    %c0_132 = arith.constant 0 : index
    %c0_133 = arith.constant 0 : index
    %182 = vector.load %arg7[%c0_130, %c2_131, %c0_132, %c0_133] : memref<1x3x32x128xf32, #tpu.memory_space<vmem>>, vector<1x1x32x128xf32>
    %183 = vector.shape_cast %182 : vector<1x1x32x128xf32> to vector<32x128xf32>
    %cst_134 = arith.constant dense<0.000000e+00> : vector<128x128xf32>
    %184 = tpu.matmul %167, %183, %cst_134 {dimension_numbers = #tpu.dot_dimension_numbers<[1], [0], [0], [1], [0, 0, 1, 1], [], []>} : vector<128x32xf32>, vector<32x128xf32>, vector<128x128xf32> -> vector<128x128xf32>
    %c0_135 = arith.constant 0 : index
    %c2_136 = arith.constant 2 : index
    %c0_137 = arith.constant 0 : index
    %c0_138 = arith.constant 0 : index
    %185 = vector.load %arg8[%c0_135, %c2_136, %c0_137, %c0_138] : memref<1x3x1x128xf32, #tpu.memory_space<vmem>>, vector<1x1x1x128xf32>
    %186 = vector.shape_cast %185 : vector<1x1x1x128xf32> to vector<1x128xf32>
    %187 = vector.broadcast %186 : vector<1x128xf32> to vector<128x128xf32>
    %188 = arith.addf %184, %187 : vector<128x128xf32>
    %c0_139 = arith.constant 0 : index
    %c0_140 = arith.constant 0 : index
    %c0_141 = arith.constant 0 : index
    %189 = vector.load %arg2[%c0_139, %c0_140, %c0_141] : memref<1x128x128xf32, #tpu.memory_space<vmem>>, vector<1x128x128xf32>
    %190 = vector.shape_cast %189 : vector<1x128x128xf32> to vector<128x128xf32>
    %cst_142 = arith.constant 0.000000e+00 : f32
    %cst_143 = arith.constant 1.000000e+00 : f32
    %191 = vector.broadcast %cst_142 : f32 to vector<128x128xf32>
    %192 = arith.maximumf %191, %190 : vector<128x128xf32>
    %193 = vector.broadcast %cst_143 : f32 to vector<128x128xf32>
    %194 = arith.minimumf %193, %192 : vector<128x128xf32>
    %cst_144 = arith.constant 9.99999974E-6 : f32
    %195 = vector.broadcast %cst_144 : f32 to vector<128x128xf32>
    %196 = arith.maximumf %194, %195 : vector<128x128xf32>
    %cst_145 = arith.constant 1.000000e+00 : f32
    %197 = vector.broadcast %cst_145 : f32 to vector<128x128xf32>
    %198 = arith.subf %197, %194 : vector<128x128xf32>
    %cst_146 = arith.constant 9.99999974E-6 : f32
    %199 = vector.broadcast %cst_146 : f32 to vector<128x128xf32>
    %200 = arith.maximumf %198, %199 : vector<128x128xf32>
    %201 = arith.divf %196, %200 : vector<128x128xf32>
    %202 = math.log %201 : vector<128x128xf32>
    %203 = arith.addf %202, %188 : vector<128x128xf32>
    %204 = arith.negf %203 : vector<128x128xf32>
    %205 = math.exp %204 : vector<128x128xf32>
    %cst_147 = arith.constant 1.000000e+00 : f32
    %206 = vector.broadcast %cst_147 : f32 to vector<128x128xf32>
    %207 = arith.addf %206, %205 : vector<128x128xf32>
    %208 = arith.divf %206, %207 : vector<128x128xf32>
    %209 = tpu.iota {dimensions = array<i32: 1>} : vector<128x128xi32>
    %c12_i32 = arith.constant 12 : i32
    %210 = vector.broadcast %c12_i32 : i32 to vector<128x128xi32>
    %211 = arith.cmpi sge, %209, %210 : vector<128x128xi32>
    %212 = arith.addf %174, %181 : vector<128x128xf32>
    %213 = arith.select %211, %208, %212 : vector<128x128xi1>, vector<128x128xf32>
    %c0_148 = arith.constant 0 : index
    %c0_149 = arith.constant 0 : index
    %c0_150 = arith.constant 0 : index
    %214 = vector.load %arg9[%c0_148, %c0_149, %c0_150] : memref<1x128x128xf32, #tpu.memory_space<vmem>>, vector<1x128x128xf32>
    %215 = vector.shape_cast %214 : vector<1x128x128xf32> to vector<128x128xf32>
    %216 = vector.shape_cast %213 : vector<128x128xf32> to vector<1x128x128xf32>
    tpu.vector_store %arg9[%c0_148, %c0_149, %c0_150], %216 {strides = array<i32>} : memref<1x128x128xf32, #tpu.memory_space<vmem>>, vector<1x128x128xf32>,
    return
  }
  func.func @transform_0(%arg0: i32) -> (i32, i32, i32) {
    %c0_i32 = arith.constant 0 : i32
    %c0_i32_0 = arith.constant 0 : i32
    %c0_i32_1 = arith.constant 0 : i32
    return %arg0, %c0_i32, %c0_i32_0 : i32, i32, i32
  }
  func.func @transform_1(%arg0: i32) -> (i32, i32, i32) {
    %c0_i32 = arith.constant 0 : i32
    %c0_i32_0 = arith.constant 0 : i32
    %c0_i32_1 = arith.constant 0 : i32
    return %arg0, %c0_i32, %c0_i32_0 : i32, i32, i32
  }
  func.func @transform_2(%arg0: i32) -> (i32, i32, i32, i32) {
    %c0_i32 = arith.constant 0 : i32
    %c0_i32_0 = arith.constant 0 : i32
    %c0_i32_1 = arith.constant 0 : i32
    %c0_i32_2 = arith.constant 0 : i32
    return %arg0, %c0_i32, %c0_i32_0, %c0_i32_1 : i32, i32, i32, i32
  }
  func.func @transform_3(%arg0: i32) -> (i32, i32, i32, i32) {
    %c0_i32 = arith.constant 0 : i32
    %c0_i32_0 = arith.constant 0 : i32
    %c0_i32_1 = arith.constant 0 : i32
    %c0_i32_2 = arith.constant 0 : i32
    return %arg0, %c0_i32, %c0_i32_0, %c0_i32_1 : i32, i32, i32, i32
  }
  func.func @transform_4(%arg0: i32) -> (i32, i32, i32, i32) {
    %c0_i32 = arith.constant 0 : i32
    %c0_i32_0 = arith.constant 0 : i32
    %c0_i32_1 = arith.constant 0 : i32
    %c0_i32_2 = arith.constant 0 : i32
    return %arg0, %c0_i32, %c0_i32_0, %c0_i32_1 : i32, i32, i32, i32
  }
  func.func @transform_5(%arg0: i32) -> (i32, i32, i32, i32) {
    %c0_i32 = arith.constant 0 : i32
    %c0_i32_0 = arith.constant 0 : i32
    %c0_i32_1 = arith.constant 0 : i32
    %c0_i32_2 = arith.constant 0 : i32
    return %arg0, %c0_i32, %c0_i32_0, %c0_i32_1 : i32, i32, i32, i32
  }
  func.func @transform_6(%arg0: i32) -> (i32, i32, i32, i32) {
    %c0_i32 = arith.constant 0 : i32
    %c0_i32_0 = arith.constant 0 : i32
    %c0_i32_1 = arith.constant 0 : i32
    %c0_i32_2 = arith.constant 0 : i32
    return %arg0, %c0_i32, %c0_i32_0, %c0_i32_1 : i32, i32, i32, i32
  }
  func.func @transform_7(%arg0: i32) -> (i32, i32, i32, i32) {
    %c0_i32 = arith.constant 0 : i32
    %c0_i32_0 = arith.constant 0 : i32
    %c0_i32_1 = arith.constant 0 : i32
    %c0_i32_2 = arith.constant 0 : i32
    return %arg0, %c0_i32, %c0_i32_0, %c0_i32_1 : i32, i32, i32, i32
  }
  func.func @transform_8(%arg0: i32) -> (i32, i32, i32) {
    %c0_i32 = arith.constant 0 : i32
    %c0_i32_0 = arith.constant 0 : i32
    %c0_i32_1 = arith.constant 0 : i32
    return %arg0, %c0_i32, %c0_i32_0 : i32, i32, i32
  }
}

module attributes {stable_mosaic.version = 11 : i64} {
  func.func @kernel(%arg0: i32, %arg1: memref<1x64x32xf32, #tpu.memory_space<vmem>>, %arg2: memref<16x64xf32, #tpu.memory_space<vmem>>, %arg3: memref<4x32x32xf32, #tpu.memory_space<vmem>>, %arg4: memref<4x1x32xf32, #tpu.memory_space<vmem>>, %arg5: memref<2x1x32xf32, #tpu.memory_space<vmem>>, %arg6: memref<2x1x32xf32, #tpu.memory_space<vmem>>, %arg7: memref<2x32x128xf32, #tpu.memory_space<vmem>>, %arg8: memref<2x1x128xf32, #tpu.memory_space<vmem>>, %arg9: memref<1x16x128xf32, #tpu.memory_space<vmem>>, %arg10: memref<1x64x128xf32, #tpu.memory_space<vmem>>) attributes {dimension_semantics = [#tpu.dimension_semantics<parallel>], iteration_bounds = array<i64: 2>, scalar_prefetch = 0 : i64, scratch_operands = 0 : i64, tpu.core_type = #tpu.core_type<tc>, window_params = [{transform_indices = @transform_0, window_bounds = array<i64: 1, 64, 32>}, {pipeline_mode = #tpu.pipeline_mode<synchronous>, transform_indices = @transform_1, window_bounds = array<i64: 16, 64>}, {pipeline_mode = #tpu.pipeline_mode<synchronous>, transform_indices = @transform_2, window_bounds = array<i64: 4, 32, 32>}, {pipeline_mode = #tpu.pipeline_mode<synchronous>, transform_indices = @transform_3, window_bounds = array<i64: 4, 1, 32>}, {pipeline_mode = #tpu.pipeline_mode<synchronous>, transform_indices = @transform_4, window_bounds = array<i64: 2, 1, 32>}, {pipeline_mode = #tpu.pipeline_mode<synchronous>, transform_indices = @transform_5, window_bounds = array<i64: 2, 1, 32>}, {pipeline_mode = #tpu.pipeline_mode<synchronous>, transform_indices = @transform_6, window_bounds = array<i64: 2, 32, 128>}, {pipeline_mode = #tpu.pipeline_mode<synchronous>, transform_indices = @transform_7, window_bounds = array<i64: 2, 1, 128>}, {transform_indices = @transform_8, window_bounds = array<i64: 1, 16, 128>}, {transform_indices = @transform_9, window_bounds = array<i64: 1, 64, 128>}]} {
    %c0 = arith.constant 0 : index
    %c0_0 = arith.constant 0 : index
    %c0_1 = arith.constant 0 : index
    %0 = vector.load %arg1[%c0, %c0_0, %c0_1] : memref<1x64x32xf32, #tpu.memory_space<vmem>>, vector<1x64x32xf32>
    %1 = vector.shape_cast %0 : vector<1x64x32xf32> to vector<64x32xf32>
    %2 = arith.cmpf one, %1, %1 : vector<64x32xf32>
    %cst = arith.constant 0.000000e+00 : f32
    %3 = vector.broadcast %cst : f32 to vector<64x32xf32>
    %4 = arith.select %2, %3, %1 : vector<64x32xi1>, vector<64x32xf32>
    %cst_2 = arith.constant 0.000000e+00 : f32
    %cst_3 = arith.constant 3.40282347E+38 : f32
    %5 = arith.subf %cst_2, %cst_3 : f32
    %cst_4 = arith.constant 3.40282347E+38 : f32
    %6 = vector.broadcast %5 : f32 to vector<64x32xf32>
    %7 = arith.maximumf %6, %4 : vector<64x32xf32>
    %8 = vector.broadcast %cst_4 : f32 to vector<64x32xf32>
    %9 = arith.minimumf %8, %7 : vector<64x32xf32>
    %c2 = arith.constant 2 : index
    %c0_5 = arith.constant 0 : index
    %c0_6 = arith.constant 0 : index
    %10 = vector.load %arg3[%c2, %c0_5, %c0_6] : memref<4x32x32xf32, #tpu.memory_space<vmem>>, vector<1x32x32xf32>
    %11 = vector.shape_cast %10 : vector<1x32x32xf32> to vector<32x32xf32>
    %c2_7 = arith.constant 2 : index
    %c0_8 = arith.constant 0 : index
    %c0_9 = arith.constant 0 : index
    %12 = vector.load %arg4[%c2_7, %c0_8, %c0_9] : memref<4x1x32xf32, #tpu.memory_space<vmem>>, vector<1x1x32xf32>
    %13 = vector.shape_cast %12 : vector<1x1x32xf32> to vector<1x32xf32>
    %cst_10 = arith.constant dense<0.000000e+00> : vector<64x32xf32>
    %14 = tpu.matmul %9, %11, %cst_10 {dimension_numbers = #tpu.dot_dimension_numbers<[1], [0], [0], [1], [0, 0, 1, 1], [], []>} : vector<64x32xf32>, vector<32x32xf32>, vector<64x32xf32> -> vector<64x32xf32>
    %15 = vector.broadcast %13 : vector<1x32xf32> to vector<64x32xf32>
    %16 = arith.addf %14, %15 : vector<64x32xf32>
    %cst_11 = arith.constant 0.000000e+00 : f32
    %17 = vector.broadcast %cst_11 : f32 to vector<64x32xf32>
    %18 = arith.maximumf %16, %17 : vector<64x32xf32>
    %c3 = arith.constant 3 : index
    %c0_12 = arith.constant 0 : index
    %c0_13 = arith.constant 0 : index
    %19 = vector.load %arg3[%c3, %c0_12, %c0_13] : memref<4x32x32xf32, #tpu.memory_space<vmem>>, vector<1x32x32xf32>
    %20 = vector.shape_cast %19 : vector<1x32x32xf32> to vector<32x32xf32>
    %c3_14 = arith.constant 3 : index
    %c0_15 = arith.constant 0 : index
    %c0_16 = arith.constant 0 : index
    %21 = vector.load %arg4[%c3_14, %c0_15, %c0_16] : memref<4x1x32xf32, #tpu.memory_space<vmem>>, vector<1x1x32xf32>
    %22 = vector.shape_cast %21 : vector<1x1x32xf32> to vector<1x32xf32>
    %cst_17 = arith.constant dense<0.000000e+00> : vector<64x32xf32>
    %23 = tpu.matmul %18, %20, %cst_17 {dimension_numbers = #tpu.dot_dimension_numbers<[1], [0], [0], [1], [0, 0, 1, 1], [], []>} : vector<64x32xf32>, vector<32x32xf32>, vector<64x32xf32> -> vector<64x32xf32>
    %24 = vector.broadcast %22 : vector<1x32xf32> to vector<64x32xf32>
    %25 = arith.addf %23, %24 : vector<64x32xf32>
    %cst_18 = arith.constant 0.000000e+00 : f32
    %26 = vector.broadcast %cst_18 : f32 to vector<64x32xf32>
    %27 = arith.maximumf %25, %26 : vector<64x32xf32>
    %c1 = arith.constant 1 : index
    %c0_19 = arith.constant 0 : index
    %c0_20 = arith.constant 0 : index
    %28 = vector.load %arg7[%c1, %c0_19, %c0_20] : memref<2x32x128xf32, #tpu.memory_space<vmem>>, vector<1x32x128xf32>
    %29 = vector.shape_cast %28 : vector<1x32x128xf32> to vector<32x128xf32>
    %cst_21 = arith.constant dense<0.000000e+00> : vector<64x128xf32>
    %30 = tpu.matmul %27, %29, %cst_21 {dimension_numbers = #tpu.dot_dimension_numbers<[1], [0], [0], [1], [0, 0, 1, 1], [], []>} : vector<64x32xf32>, vector<32x128xf32>, vector<64x128xf32> -> vector<64x128xf32>
    %c1_22 = arith.constant 1 : index
    %c0_23 = arith.constant 0 : index
    %c0_24 = arith.constant 0 : index
    %31 = vector.load %arg8[%c1_22, %c0_23, %c0_24] : memref<2x1x128xf32, #tpu.memory_space<vmem>>, vector<1x1x128xf32>
    %32 = vector.shape_cast %31 : vector<1x1x128xf32> to vector<1x128xf32>
    %33 = vector.broadcast %32 : vector<1x128xf32> to vector<64x128xf32>
    %34 = arith.addf %30, %33 : vector<64x128xf32>
    %35 = arith.negf %34 : vector<64x128xf32>
    %36 = math.exp %35 : vector<64x128xf32>
    %cst_25 = arith.constant 1.000000e+00 : f32
    %37 = vector.broadcast %cst_25 : f32 to vector<64x128xf32>
    %38 = arith.addf %37, %36 : vector<64x128xf32>
    %39 = arith.divf %37, %38 : vector<64x128xf32>
    %c0_26 = arith.constant 0 : index
    %c0_27 = arith.constant 0 : index
    %c0_28 = arith.constant 0 : index
    %40 = vector.load %arg10[%c0_26, %c0_27, %c0_28] : memref<1x64x128xf32, #tpu.memory_space<vmem>>, vector<1x64x128xf32>
    %41 = vector.shape_cast %40 : vector<1x64x128xf32> to vector<64x128xf32>
    %42 = vector.shape_cast %39 : vector<64x128xf32> to vector<1x64x128xf32>
    tpu.vector_store %arg10[%c0_26, %c0_27, %c0_28], %42 {strides = array<i32>} : memref<1x64x128xf32, #tpu.memory_space<vmem>>, vector<1x64x128xf32>,
    %c0_29 = arith.constant 0 : index
    %c0_30 = arith.constant 0 : index
    %43 = vector.load %arg2[%c0_29, %c0_30] : memref<16x64xf32, #tpu.memory_space<vmem>>, vector<16x64xf32>
    %cst_31 = arith.constant dense<0.000000e+00> : vector<16x32xf32>
    %44 = tpu.matmul %43, %9, %cst_31 {dimension_numbers = #tpu.dot_dimension_numbers<[1], [0], [0], [1], [0, 0, 1, 1], [], []>} : vector<16x64xf32>, vector<64x32xf32>, vector<16x32xf32> -> vector<16x32xf32>
    %c0_32 = arith.constant 0 : index
    %c0_33 = arith.constant 0 : index
    %c0_34 = arith.constant 0 : index
    %45 = vector.load %arg3[%c0_32, %c0_33, %c0_34] : memref<4x32x32xf32, #tpu.memory_space<vmem>>, vector<1x32x32xf32>
    %46 = vector.shape_cast %45 : vector<1x32x32xf32> to vector<32x32xf32>
    %c0_35 = arith.constant 0 : index
    %c0_36 = arith.constant 0 : index
    %c0_37 = arith.constant 0 : index
    %47 = vector.load %arg4[%c0_35, %c0_36, %c0_37] : memref<4x1x32xf32, #tpu.memory_space<vmem>>, vector<1x1x32xf32>
    %48 = vector.shape_cast %47 : vector<1x1x32xf32> to vector<1x32xf32>
    %cst_38 = arith.constant dense<0.000000e+00> : vector<16x32xf32>
    %49 = tpu.matmul %44, %46, %cst_38 {dimension_numbers = #tpu.dot_dimension_numbers<[1], [0], [0], [1], [0, 0, 1, 1], [], []>} : vector<16x32xf32>, vector<32x32xf32>, vector<16x32xf32> -> vector<16x32xf32>
    %50 = vector.broadcast %48 : vector<1x32xf32> to vector<16x32xf32>
    %51 = arith.addf %49, %50 : vector<16x32xf32>
    %c0_39 = arith.constant 0 : index
    %c0_40 = arith.constant 0 : index
    %c0_41 = arith.constant 0 : index
    %52 = vector.load %arg5[%c0_39, %c0_40, %c0_41] : memref<2x1x32xf32, #tpu.memory_space<vmem>>, vector<1x1x32xf32>
    %53 = vector.shape_cast %52 : vector<1x1x32xf32> to vector<1x32xf32>
    %c0_42 = arith.constant 0 : index
    %c0_43 = arith.constant 0 : index
    %c0_44 = arith.constant 0 : index
    %54 = vector.load %arg6[%c0_42, %c0_43, %c0_44] : memref<2x1x32xf32, #tpu.memory_space<vmem>>, vector<1x1x32xf32>
    %55 = vector.shape_cast %54 : vector<1x1x32xf32> to vector<1x32xf32>
    %cst_45 = arith.constant dense<0.000000e+00> : vector<16xf32>
    %56 = vector.multi_reduction <add>, %51, %cst_45 [1] : vector<16x32xf32> to vector<16xf32>
    %57 = vector.shape_cast %56 : vector<16xf32> to vector<16x1xf32>
    %cst_46 = arith.constant 3.200000e+01 : f32
    %58 = vector.broadcast %cst_46 : f32 to vector<16x1xf32>
    %59 = arith.divf %57, %58 : vector<16x1xf32>
    %60 = vector.broadcast %59 : vector<16x1xf32> to vector<16x32xf32>
    %61 = arith.subf %51, %60 : vector<16x32xf32>
    %62 = arith.mulf %61, %61 : vector<16x32xf32>
    %cst_47 = arith.constant dense<0.000000e+00> : vector<16xf32>
    %63 = vector.multi_reduction <add>, %62, %cst_47 [1] : vector<16x32xf32> to vector<16xf32>
    %64 = vector.shape_cast %63 : vector<16xf32> to vector<16x1xf32>
    %cst_48 = arith.constant 3.200000e+01 : f32
    %65 = vector.broadcast %cst_48 : f32 to vector<16x1xf32>
    %66 = arith.divf %64, %65 : vector<16x1xf32>
    %67 = vector.broadcast %59 : vector<16x1xf32> to vector<16x32xf32>
    %68 = arith.subf %51, %67 : vector<16x32xf32>
    %cst_49 = arith.constant 9.99999974E-6 : f32
    %69 = vector.broadcast %cst_49 : f32 to vector<16x1xf32>
    %70 = arith.addf %66, %69 : vector<16x1xf32>
    %71 = math.rsqrt %70 : vector<16x1xf32>
    %72 = vector.broadcast %71 : vector<16x1xf32> to vector<16x32xf32>
    %73 = arith.mulf %68, %72 : vector<16x32xf32>
    %74 = vector.broadcast %53 : vector<1x32xf32> to vector<16x32xf32>
    %75 = arith.mulf %73, %74 : vector<16x32xf32>
    %76 = vector.broadcast %55 : vector<1x32xf32> to vector<16x32xf32>
    %77 = arith.addf %75, %76 : vector<16x32xf32>
    %cst_50 = arith.constant 0.000000e+00 : f32
    %78 = vector.broadcast %cst_50 : f32 to vector<16x32xf32>
    %79 = arith.maximumf %77, %78 : vector<16x32xf32>
    %c1_51 = arith.constant 1 : index
    %c0_52 = arith.constant 0 : index
    %c0_53 = arith.constant 0 : index
    %80 = vector.load %arg3[%c1_51, %c0_52, %c0_53] : memref<4x32x32xf32, #tpu.memory_space<vmem>>, vector<1x32x32xf32>
    %81 = vector.shape_cast %80 : vector<1x32x32xf32> to vector<32x32xf32>
    %c1_54 = arith.constant 1 : index
    %c0_55 = arith.constant 0 : index
    %c0_56 = arith.constant 0 : index
    %82 = vector.load %arg4[%c1_54, %c0_55, %c0_56] : memref<4x1x32xf32, #tpu.memory_space<vmem>>, vector<1x1x32xf32>
    %83 = vector.shape_cast %82 : vector<1x1x32xf32> to vector<1x32xf32>
    %cst_57 = arith.constant dense<0.000000e+00> : vector<16x32xf32>
    %84 = tpu.matmul %79, %81, %cst_57 {dimension_numbers = #tpu.dot_dimension_numbers<[1], [0], [0], [1], [0, 0, 1, 1], [], []>} : vector<16x32xf32>, vector<32x32xf32>, vector<16x32xf32> -> vector<16x32xf32>
    %85 = vector.broadcast %83 : vector<1x32xf32> to vector<16x32xf32>
    %86 = arith.addf %84, %85 : vector<16x32xf32>
    %c1_58 = arith.constant 1 : index
    %c0_59 = arith.constant 0 : index
    %c0_60 = arith.constant 0 : index
    %87 = vector.load %arg5[%c1_58, %c0_59, %c0_60] : memref<2x1x32xf32, #tpu.memory_space<vmem>>, vector<1x1x32xf32>
    %88 = vector.shape_cast %87 : vector<1x1x32xf32> to vector<1x32xf32>
    %c1_61 = arith.constant 1 : index
    %c0_62 = arith.constant 0 : index
    %c0_63 = arith.constant 0 : index
    %89 = vector.load %arg6[%c1_61, %c0_62, %c0_63] : memref<2x1x32xf32, #tpu.memory_space<vmem>>, vector<1x1x32xf32>
    %90 = vector.shape_cast %89 : vector<1x1x32xf32> to vector<1x32xf32>
    %cst_64 = arith.constant dense<0.000000e+00> : vector<16xf32>
    %91 = vector.multi_reduction <add>, %86, %cst_64 [1] : vector<16x32xf32> to vector<16xf32>
    %92 = vector.shape_cast %91 : vector<16xf32> to vector<16x1xf32>
    %cst_65 = arith.constant 3.200000e+01 : f32
    %93 = vector.broadcast %cst_65 : f32 to vector<16x1xf32>
    %94 = arith.divf %92, %93 : vector<16x1xf32>
    %95 = vector.broadcast %94 : vector<16x1xf32> to vector<16x32xf32>
    %96 = arith.subf %86, %95 : vector<16x32xf32>
    %97 = arith.mulf %96, %96 : vector<16x32xf32>
    %cst_66 = arith.constant dense<0.000000e+00> : vector<16xf32>
    %98 = vector.multi_reduction <add>, %97, %cst_66 [1] : vector<16x32xf32> to vector<16xf32>
    %99 = vector.shape_cast %98 : vector<16xf32> to vector<16x1xf32>
    %cst_67 = arith.constant 3.200000e+01 : f32
    %100 = vector.broadcast %cst_67 : f32 to vector<16x1xf32>
    %101 = arith.divf %99, %100 : vector<16x1xf32>
    %102 = vector.broadcast %94 : vector<16x1xf32> to vector<16x32xf32>
    %103 = arith.subf %86, %102 : vector<16x32xf32>
    %cst_68 = arith.constant 9.99999974E-6 : f32
    %104 = vector.broadcast %cst_68 : f32 to vector<16x1xf32>
    %105 = arith.addf %101, %104 : vector<16x1xf32>
    %106 = math.rsqrt %105 : vector<16x1xf32>
    %107 = vector.broadcast %106 : vector<16x1xf32> to vector<16x32xf32>
    %108 = arith.mulf %103, %107 : vector<16x32xf32>
    %109 = vector.broadcast %88 : vector<1x32xf32> to vector<16x32xf32>
    %110 = arith.mulf %108, %109 : vector<16x32xf32>
    %111 = vector.broadcast %90 : vector<1x32xf32> to vector<16x32xf32>
    %112 = arith.addf %110, %111 : vector<16x32xf32>
    %cst_69 = arith.constant 0.000000e+00 : f32
    %113 = vector.broadcast %cst_69 : f32 to vector<16x32xf32>
    %114 = arith.maximumf %112, %113 : vector<16x32xf32>
    %c0_70 = arith.constant 0 : index
    %c0_71 = arith.constant 0 : index
    %c0_72 = arith.constant 0 : index
    %115 = vector.load %arg7[%c0_70, %c0_71, %c0_72] : memref<2x32x128xf32, #tpu.memory_space<vmem>>, vector<1x32x128xf32>
    %116 = vector.shape_cast %115 : vector<1x32x128xf32> to vector<32x128xf32>
    %cst_73 = arith.constant dense<0.000000e+00> : vector<16x128xf32>
    %117 = tpu.matmul %114, %116, %cst_73 {dimension_numbers = #tpu.dot_dimension_numbers<[1], [0], [0], [1], [0, 0, 1, 1], [], []>} : vector<16x32xf32>, vector<32x128xf32>, vector<16x128xf32> -> vector<16x128xf32>
    %c0_74 = arith.constant 0 : index
    %c0_75 = arith.constant 0 : index
    %c0_76 = arith.constant 0 : index
    %118 = vector.load %arg8[%c0_74, %c0_75, %c0_76] : memref<2x1x128xf32, #tpu.memory_space<vmem>>, vector<1x1x128xf32>
    %119 = vector.shape_cast %118 : vector<1x1x128xf32> to vector<1x128xf32>
    %120 = vector.broadcast %119 : vector<1x128xf32> to vector<16x128xf32>
    %121 = arith.addf %117, %120 : vector<16x128xf32>
    %c0_77 = arith.constant 0 : index
    %c0_78 = arith.constant 0 : index
    %c0_79 = arith.constant 0 : index
    %122 = vector.load %arg9[%c0_77, %c0_78, %c0_79] : memref<1x16x128xf32, #tpu.memory_space<vmem>>, vector<1x16x128xf32>
    %123 = vector.shape_cast %122 : vector<1x16x128xf32> to vector<16x128xf32>
    %124 = vector.shape_cast %121 : vector<16x128xf32> to vector<1x16x128xf32>
    tpu.vector_store %arg9[%c0_77, %c0_78, %c0_79], %124 {strides = array<i32>} : memref<1x16x128xf32, #tpu.memory_space<vmem>>, vector<1x16x128xf32>,
    return
  }
  func.func @transform_0(%arg0: i32) -> (i32, i32, i32) {
    %c0_i32 = arith.constant 0 : i32
    %c0_i32_0 = arith.constant 0 : i32
    %c0_i32_1 = arith.constant 0 : i32
    return %arg0, %c0_i32, %c0_i32_0 : i32, i32, i32
  }
  func.func @transform_1(%arg0: i32) -> (i32, i32) {
    %c0_i32 = arith.constant 0 : i32
    %c0_i32_0 = arith.constant 0 : i32
    %c0_i32_1 = arith.constant 0 : i32
    return %c0_i32, %c0_i32_0 : i32, i32
  }
  func.func @transform_2(%arg0: i32) -> (i32, i32, i32) {
    %c0_i32 = arith.constant 0 : i32
    %c0_i32_0 = arith.constant 0 : i32
    %c0_i32_1 = arith.constant 0 : i32
    %c0_i32_2 = arith.constant 0 : i32
    return %c0_i32, %c0_i32_0, %c0_i32_1 : i32, i32, i32
  }
  func.func @transform_3(%arg0: i32) -> (i32, i32, i32) {
    %c0_i32 = arith.constant 0 : i32
    %c0_i32_0 = arith.constant 0 : i32
    %c0_i32_1 = arith.constant 0 : i32
    %c0_i32_2 = arith.constant 0 : i32
    return %c0_i32, %c0_i32_0, %c0_i32_1 : i32, i32, i32
  }
  func.func @transform_4(%arg0: i32) -> (i32, i32, i32) {
    %c0_i32 = arith.constant 0 : i32
    %c0_i32_0 = arith.constant 0 : i32
    %c0_i32_1 = arith.constant 0 : i32
    %c0_i32_2 = arith.constant 0 : i32
    return %c0_i32, %c0_i32_0, %c0_i32_1 : i32, i32, i32
  }
  func.func @transform_5(%arg0: i32) -> (i32, i32, i32) {
    %c0_i32 = arith.constant 0 : i32
    %c0_i32_0 = arith.constant 0 : i32
    %c0_i32_1 = arith.constant 0 : i32
    %c0_i32_2 = arith.constant 0 : i32
    return %c0_i32, %c0_i32_0, %c0_i32_1 : i32, i32, i32
  }
  func.func @transform_6(%arg0: i32) -> (i32, i32, i32) {
    %c0_i32 = arith.constant 0 : i32
    %c0_i32_0 = arith.constant 0 : i32
    %c0_i32_1 = arith.constant 0 : i32
    %c0_i32_2 = arith.constant 0 : i32
    return %c0_i32, %c0_i32_0, %c0_i32_1 : i32, i32, i32
  }
  func.func @transform_7(%arg0: i32) -> (i32, i32, i32) {
    %c0_i32 = arith.constant 0 : i32
    %c0_i32_0 = arith.constant 0 : i32
    %c0_i32_1 = arith.constant 0 : i32
    %c0_i32_2 = arith.constant 0 : i32
    return %c0_i32, %c0_i32_0, %c0_i32_1 : i32, i32, i32
  }
  func.func @transform_8(%arg0: i32) -> (i32, i32, i32) {
    %c0_i32 = arith.constant 0 : i32
    %c0_i32_0 = arith.constant 0 : i32
    %c0_i32_1 = arith.constant 0 : i32
    return %arg0, %c0_i32, %c0_i32_0 : i32, i32, i32
  }
  func.func @transform_9(%arg0: i32) -> (i32, i32, i32) {
    %c0_i32 = arith.constant 0 : i32
    %c0_i32_0 = arith.constant 0 : i32
    %c0_i32_1 = arith.constant 0 : i32
    return %arg0, %c0_i32, %c0_i32_0 : i32, i32, i32
  }
}

</mosaic_0001>

<bundles_post_ra>
// kernel: pmn_head_forward.3
= control target key start
LH: loop header
LB: loop body
LE: loop exit
PB: predicated region body
PF: predicated region fallthrough
CT: control target
= control target key end

     0   :  { %s1874_s30 = smov 0   ;;  %s2048_s0 = inlined_call_operand.vmem [shape: f32[2,64,32], index: 0, kind: input, shape index: {}]   ;;  %s2049_s1 = inlined_call_operand.vmem [shape: f32[16,64], index: 1, kind: input, shape index: {}]   ;;  %s2050_s2 = inlined_call_operand.vmem [shape: f32[4,32,32], index: 2, kind: input, shape index: {}]   ;;  %s2051_s3 = inlined_call_operand.vmem [shape: f32[4,1,32], index: 3, kind: input, shape index: {}]   ;;  %s2052_s4 = inlined_call_operand.vmem [shape: f32[2,1,32], index: 4, kind: input, shape index: {}]   ;;  %s2053_s5 = inlined_call_operand.vmem [shape: f32[2,1,32], index: 5, kind: input, shape index: {}]   ;;  %s2054_s6 = inlined_call_operand.vmem [shape: f32[2,32,128], index: 6, kind: input, shape index: {}]   ;;  %s2055_s7 = inlined_call_operand.vmem [shape: f32[2,1,128], index: 7, kind: input, shape index: {}]   ;;  %s2056_s8 = inlined_call_operand.vmem [shape: f32[2,16,128], index: 8, kind: output, shape index: {0}]   ;;  %s2057_s9 = inlined_call_operand.vmem [shape: f32[2,64,128], index: 9, kind: output, shape index: {1}]  }
   0x1 LB: > { %s1432_s10 = sadd.s32 4294967295, %s1822_s30   ;;  %p1436_p0 = scmp.ge.s32.totalorder %s1822_s30, 1  ;;  %s1822_s30 = sphi %s1874_s30, %s20_s30  }
   0x2   : > { %p290_p1 = scmp.lt.s32.totalorder %s1822_s30, 3 }
   0x4   : > { %p291_p2 = pnand %p1436_p0, %p290_p1 }
   0x5   : > { %v1451_v0 = vld [vmem:[%s2050_s2 + $0x40] sm:$0xff] (!%p291_p2)  ;;  %v1452_v1 = vld [vmem:[%s2050_s2 + $0x48] sm:$0xff] (!%p291_p2)  ;;  %v1453_v2 = vld [vmem:[%s2050_s2 + $0x50] sm:$0xff] (!%p291_p2)  ;;  %p331_p3 = scmp.lt.s32.totalorder (!%p291_p2), %s1432_s10, 1  ;;  %vm399_vm2 = vcmask (!%p291_p2), 261120   ;;  %vm887_vm9 = vcmask (!%p291_p2), 523264  }
   0x6   : > { %294 = sbr.rel (%p291_p2) target bundleno = 1751 (0x6d7), region = 52  ;;  %v1704_v3 = vpack.c.bf16 (!%p291_p2), %v1452_v1, %v1451_v0  ;;  %v1454_v4 = vld [vmem:[%s2050_s2 + $0x58] sm:$0xff] (!%p291_p2)  ;;  %v1465_v5 = vld [vmem:[%s2050_s2 + $0x60] sm:$0xff] (!%p291_p2)  ;;  %v1466_v6 = vld [vmem:[%s2050_s2 + $0x68] sm:$0xff] (!%p291_p2) }
   0x7   : > { %v1708_v7 = vpack.c.bf16 (!%p291_p2), %v1454_v4, %v1453_v2  ;;  %v1712_v8 = vpack.c.bf16 (!%p291_p2), %v1466_v6, %v1465_v5  ;;  %v1467_v34 = vld [vmem:[%s2050_s2 + $0x70] sm:$0xff] (!%p291_p2)  ;;  %v1468_v35 = vld [vmem:[%s2050_s2 + $0x78] sm:$0xff] (!%p291_p2)  ;;  %v1479_v37 = vld [vmem:[%s2054_s6 + $0x20] sm:$0xff] (!%p291_p2) }
   0x8   : > { %1705 = vmatprep.subr.bf16.mxu0 (!%p291_p2), %v1704_v3  ;;  %v1716_v36 = vpack.c.bf16 (!%p291_p2), %v1468_v35, %v1467_v34  ;;  %v1480_v38 = vld [vmem:[%s2054_s6 + $0x28] sm:$0xff] (!%p291_p2)  ;;  %v1456_v40 = vld [vmem:[%s2051_s3 + $0x2] ss:$0 sm:$0xff] (!%p291_p2)  ;;  %v1481_v6 = vld [vmem:[%s2054_s6 + $0x30] sm:$0xff] (!%p291_p2) }
   0x9   : > { %1707 = vmatpush3.bf16.msra.mxu0 (!%p291_p2), %v1704_v3  ;;  %1713 = vmatprep.subr.bf16.mxu1 (!%p291_p2), %v1712_v8  ;;  %v1720_v39 = vpack.c.bf16 (!%p291_p2), %v1480_v38, %v1479_v37  ;;  %v885_v4 = vld [vmem:[%s2049_s1] sm:$0xff] (!%p291_p2)  ;;  %v886_v5 = vld [vmem:[%s2049_s1 + $0x8] sm:$0xff] (!%p291_p2) }
   0xa   : > { %1709 = vmatprep.subr.bf16.mxu0 (!%p291_p2), %v1708_v7  ;;  %1715 = vmatpush3.bf16.msra.mxu1 (!%p291_p2), %v1712_v8 }
   0xb   : > { %1717 = vmatprep.subr.bf16.mxu1 (!%p291_p2), %v1716_v36 }
   0xd   : > { %s2059_s10 = smov (!%p331_p3, %s1432_s10), 1  ;;  %1711 = vmatpush3.bf16.msra.mxu0 %v1708_v7  ;;  %v1482_v7 = vld [vmem:[%s2054_s6 + $0x38] sm:$0xff] }
   0xe   : > { %s1525_s23 = sshll.u32 %s2059_s10, 6  ;;  %1719 = vmatpush3.bf16.msra.mxu1 %v1716_v36  ;;  %1721 = vmatprep.subr.bf16.mxu0 %v1720_v39  ;;  %v1724_v8 = vpack.c.bf16 %v1482_v7, %v1481_v6  ;;  %s1526_s13 = sshll.u32 %s2059_s10, 4 }
   0xf   : > { %s335_s26 = scalar_lea.vmem %s2048_s0, %s1525_s23  ;;  %s345_s25 = scalar_lea.vmem %s2057_s9, %s1525_s23 }
  0x10   : > { %v346_v9 = vld [vmem:[%s335_s26] sm:$0xff]  ;;  %v347_v10 = vld [vmem:[%s335_s26 + $0x8] sm:$0xff]  ;;  %v348_v11 = vld [vmem:[%s335_s26 + $0x10] sm:$0xff]  ;;  %s340_s18 = scalar_lea.vmem %s2056_s8, %s1526_s13 }
  0x11   : > { %vm354_vm0 = vcmp.ne.f32.partialorder %v346_v9, %v346_v9  ;;  %vm355_vm1 = vcmp.ne.f32.partialorder %v347_v10, %v347_v10  ;;  %vm356_vm3 = vcmp.ne.f32.partialorder %v348_v11, %v348_v11  ;;  %v349_v12 = vld [vmem:[%s335_s26 + $0x18] sm:$0xff]  ;;  %v350_v13 = vld [vmem:[%s335_s26 + $0x20] sm:$0xff]  ;;  %v351_v14 = vld [vmem:[%s335_s26 + $0x28] sm:$0xff] }
  0x12   : > { %v362_v15 = vsel %vm354_vm0, 0.0, %v346_v9  ;;  %v363_v16 = vsel %vm355_vm1, 0.0, %v347_v10  ;;  %v364_v17 = vsel %vm356_vm3, 0.0, %v348_v11  ;;  %vm357_vm4 = vcmp.ne.f32.partialorder %v349_v12, %v349_v12  ;;  %v352_v18 = vld [vmem:[%s335_s26 + $0x30] sm:$0xff]  ;;  %v353_v25 = vld [vmem:[%s335_s26 + $0x38] sm:$0xff]  ;;  %v969_v9 = vld [vmem:[%s2050_s2] sm:$0xff] }
  0x13   : > { %v1443_v19 = vclamps-f32 %v362_v15, 3.4028235e+38  ;;  %v1444_v20 = vclamps-f32 %v363_v16, 3.4028235e+38  ;;  %v1445_v21 = vclamps-f32 %v364_v17, 3.4028235e+38  ;;  %vm358_vm5 = vcmp.ne.f32.partialorder %v350_v13, %v350_v13 }
  0x14   : > { %v365_v22 = vsel %vm357_vm4, 0.0, %v349_v12  ;;  %v366_v23 = vsel %vm358_vm5, 0.0, %v350_v13  ;;  %vm359_vm6 = vcmp.ne.f32.partialorder %v351_v14, %v351_v14  ;;  %vm360_vm7 = vcmp.ne.f32.partialorder %v352_v18, %v352_v18  ;;  %v970_v10 = vld [vmem:[%s2050_s2 + $0x8] sm:$0xff]  ;;  %v971_v12 = vld [vmem:[%s2050_s2 + $0x10] sm:$0xff]  ;;  %v972_v13 = vld [vmem:[%s2050_s2 + $0x18] sm:$0xff] }
  0x15   : > { %1600 = vmatprep.mubr.msk.f32.mxu0 %vm399_vm2, %v1443_v19  ;;  %v1728_v24 = vpack.c.bf16 %v1444_v20, %v1443_v19  ;;  %v1446_v26 = vclamps-f32 %v365_v22, 3.4028235e+38  ;;  %v1447_v27 = vclamps-f32 %v366_v23, 3.4028235e+38  ;;  %v367_v28 = vsel %vm359_vm6, 0.0, %v351_v14 }
  0x16   : > { %1601 = vmatmul.mubr.msk.f32.vlgmr.msra.gmra.mrb[0].mxu0 %vm399_vm2, %v1444_v20  ;;  %v368_v29 = vsel %vm360_vm7, 0.0, %v352_v18  ;;  %vm361_vm8 = vcmp.ne.f32.partialorder %v353_v25, %v353_v25  ;;  %v1448_v30 = vclamps-f32 %v367_v28, 3.4028235e+38  ;;  %v1744_v11 = vpack.c.bf16 %v970_v10, %v969_v9  ;;  %v1470_v15 = vld [vmem:[%s2051_s3 + $0x3] ss:$0 sm:$0xff] }
  0x17   : > { %1603 = vmatprep.mubr.msk.f32.mxu0 %vm399_vm2, %v1445_v21  ;;  %v1449_v31 = vclamps-f32 %v368_v29, 3.4028235e+38  ;;  %v369_v32 = vsel %vm361_vm8, 0.0, %v353_v25  ;;  %1729 = vmatprep.subr.bf16.mxu1 %v1728_v24  ;;  %v1732_v50 = vpack.c.bf16 %v1446_v26, %v1445_v21  ;;  %v1748_v14 = vpack.c.bf16 %v972_v13, %v971_v12 }
  0x18   : > { %v1450_v33 = vclamps-f32 %v369_v32, 3.4028235e+38  ;;  %1723 = vmatpush3.bf16.msra.mxu0 %v1720_v39  ;;  %v1736_v57 = vpack.c.bf16 %v1448_v30, %v1447_v27 }
  0x19   : > { %1725 = vmatprep.subr.bf16.mxu0 %v1724_v8 }
  0x1a   : > { %1604 = vmatmul.mubr.msk.f32.gmra.mrb[2].mxu0 %vm399_vm2, %v1446_v26  ;;  %v1740_v0 = vpack.c.bf16 %v1450_v33, %v1449_v31 }
  0x1b   : > { %1606 = vmatprep.mubr.msk.f32.mxu0 %vm399_vm2, %v1447_v27 }
  0x1c   : > { %1727 = vmatpush3.bf16.msra.mxu0 %v1724_v8 }
  0x1e   : > { %1607 = vmatmul.mubr.msk.f32.gmra.mrb[4].mxu0 %vm399_vm2, %v1448_v30 }
  0x1f   : > { %1609 = vmatprep.mubr.msk.f32.mxu0 %vm399_vm2, %v1449_v31 }
  0x22   : > { %1610 = vmatmul.mubr.msk.f32.gmra.mrb[6].mxu0 %vm399_vm2, %v1450_v33 }
  0xe9   : > { %v1602_v41 = vpop.f32.mrb[0].mxu0 }
  0xea   : > { %v496_v42 = vadd.f32 %v1602_v41, %v1456_v40  ;;  %v490_v43 = vpop.f32.mrb[1].mxu0 }
  0xeb   : > { %v491_v44 = vadd.f32 %v1456_v40, %v490_v43 }
  0xec   : > { %v530_v47 = vmax.f32 %v496_v42, 0.0  ;;  %v1484_v42 = vld [vmem:[%s2055_s7 + $0x1] ss:$0 sm:$0xff] }
  0xed   : > { %v529_v45 = vmax.f32 %v491_v44, 0.0  ;;  %v1605_v46 = vpop.f32.mrb[2].mxu0 }
  0xee   : > { %v506_v48 = vadd.f32 %v1605_v46, %v1456_v40  ;;  %v500_v49 = vpop.f32.mrb[3].mxu0 }
  0xef   : > { %v501_v51 = vadd.f32 %v1456_v40, %v500_v49  ;;  %1620 = vmatprep.mubr.msk.f32.mxu1 %vm399_vm2, %v529_v45 }
  0xf0   : > { %1621 = vmatmul.mubr.msk.f32.vlgmr.msra.gmra.mrb[0].mxu1 %vm399_vm2, %v530_v47  ;;  %v532_v54 = vmax.f32 %v506_v48, 0.0 }
  0xf1   : > { %v531_v52 = vmax.f32 %v501_v51, 0.0  ;;  %1731 = vmatpush3.bf16.msra.mxu1 %v1728_v24  ;;  %v1608_v53 = vpop.f32.mrb[4].mxu0 }
  0xf2   : > { %v516_v55 = vadd.f32 %v1608_v53, %v1456_v40  ;;  %v510_v56 = vpop.f32.mrb[5].mxu0  ;;  %1733 = vmatprep.subr.bf16.mxu1 %v1732_v50 }
  0xf3   : > { %v511_v58 = vadd.f32 %v1456_v40, %v510_v56  ;;  %1623 = vmatprep.mubr.msk.f32.mxu1 %vm399_vm2, %v531_v52 }
  0xf4   : > { %1624 = vmatmul.mubr.msk.f32.gmra.mrb[2].mxu1 %vm399_vm2, %v532_v54  ;;  %v534_v61 = vmax.f32 %v516_v55, 0.0 }
  0xf5   : > { %v533_v59 = vmax.f32 %v511_v58, 0.0  ;;  %1735 = vmatpush3.bf16.msra.mxu1 %v1732_v50  ;;  %v1611_v60 = vpop.f32.mrb[6].mxu0 }
  0xf6   : > { %v526_v62 = vadd.f32 %v1611_v60, %v1456_v40  ;;  %v520_v63 = vpop.f32.mrb[7].mxu0  ;;  %1737 = vmatprep.subr.bf16.mxu1 %v1736_v57  ;;  %v1503_v60 = vld [vmem:[%s2051_s3] ss:$0 sm:$0xff] }
  0xf7   : > { %v521_v1 = vadd.f32 %v1456_v40, %v520_v63  ;;  %1626 = vmatprep.mubr.msk.f32.mxu1 %vm399_vm2, %v533_v59 }
  0xf8   : > { %1627 = vmatmul.mubr.msk.f32.gmra.mrb[4].mxu1 %vm399_vm2, %v534_v61  ;;  %v536_v3 = vmax.f32 %v526_v62, 0.0 }
  0xf9   : > { %v535_v2 = vmax.f32 %v521_v1, 0.0  ;;  %1739 = vmatpush3.bf16.msra.mxu1 %v1736_v57 }
  0xfa   : > { %1741 = vmatprep.subr.bf16.mxu1 %v1740_v0 }
  0xfb   : > { %1629 = vmatprep.mubr.msk.f32.mxu1 %vm399_vm2, %v535_v2 }
  0xfc   : > { %1630 = vmatmul.mubr.msk.f32.gmra.mrb[6].mxu1 %vm399_vm2, %v536_v3 }
  0xfd   : > { %1743 = vmatpush3.bf16.msra.mxu1 %v1740_v0  ;;  %1668 = vmatprep.mubr.msk.f32.mxu1 %vm887_vm9, %v885_v4 }
  0xfe   : > { %1745 = vmatprep.subr.bf16.mxu1 %v1744_v11 }
 0x100   : > { %1669 = vmatmul.mubr.msk.f32.vlgmr.msra.gmra.mrb[8].mxu1 %vm887_vm9, %v886_v5 }
 0x101   : > { %1747 = vmatpush3.bf16.msra.mxu1 %v1744_v11 }
 0x102   : > { %1749 = vmatprep.subr.bf16.mxu1 %v1748_v14 }
 0x105   : > { %1751 = vmatpush3.bf16.msra.mxu1 %v1748_v14 }
 0x1c3   : > { %v1622_v16 = vpop.f32.mrb[0].mxu1 }
 0x1c4   : > { %v646_v17 = vadd.f32 %v1622_v16, %v1470_v15  ;;  %v640_v18 = vpop.f32.mrb[1].mxu1 }
 0x1c5   : > { %v641_v19 = vadd.f32 %v1470_v15, %v640_v18 }
 0x1c6   : > { %v680_v22 = vmax.f32 %v646_v17, 0.0 }
 0x1c7   : > { %v679_v20 = vmax.f32 %v641_v19, 0.0  ;;  %v1625_v21 = vpop.f32.mrb[2].mxu1 }
 0x1c8   : > { %v656_v23 = vadd.f32 %v1625_v21, %v1470_v15  ;;  %v650_v24 = vpop.f32.mrb[3].mxu1 }
 0x1c9   : > { %v651_v25 = vadd.f32 %v1470_v15, %v650_v24  ;;  %1640 = vmatprep.mubr.msk.f32.mxu0 %vm399_vm2, %v679_v20 }
 0x1ca   : > { %1641 = vmatmul.mubr.msk.f32.vlgmr.msra.gmra.mrb[8].mxu0 %vm399_vm2, %v680_v22  ;;  %v682_v28 = vmax.f32 %v656_v23, 0.0 }
 0x1cb   : > { %v681_v26 = vmax.f32 %v651_v25, 0.0  ;;  %v1628_v27 = vpop.f32.mrb[4].mxu1 }
 0x1cc   : > { %v666_v29 = vadd.f32 %v1628_v27, %v1470_v15  ;;  %v660_v30 = vpop.f32.mrb[5].mxu1 }
 0x1cd   : > { %v661_v31 = vadd.f32 %v1470_v15, %v660_v30  ;;  %1643 = vmatprep.mubr.msk.f32.mxu0 %vm399_vm2, %v681_v26 }
 0x1ce   : > { %1644 = vmatmul.mubr.msk.f32.gmra.mrb[10].mxu0 %vm399_vm2, %v682_v28  ;;  %v684_v34 = vmax.f32 %v666_v29, 0.0 }
 0x1cf   : > { %v683_v32 = vmax.f32 %v661_v31, 0.0  ;;  %v1631_v33 = vpop.f32.mrb[6].mxu1 }
 0x1d0   : > { %v676_v35 = vadd.f32 %v1631_v33, %v1470_v15  ;;  %v670_v36 = vpop.f32.mrb[7].mxu1 }
 0x1d1   : > { %v671_v37 = vadd.f32 %v1470_v15, %v670_v36  ;;  %1646 = vmatprep.mubr.msk.f32.mxu0 %vm399_vm2, %v683_v32 }
 0x1d2   : > { %1647 = vmatmul.mubr.msk.f32.gmra.mrb[12].mxu0 %vm399_vm2, %v684_v34  ;;  %v686_v40 = vmax.f32 %v676_v35, 0.0 }
 0x1d3   : > { %v685_v38 = vmax.f32 %v671_v37, 0.0  ;;  %v1670_v39 = vpop.f32.mrb[8].mxu1 }
 0x1d4   : > { %v960_v41 = vpop.f32.mrb[9].mxu1 }
 0x1d5   : > { %1649 = vmatprep.mubr.msk.f32.mxu0 %vm399_vm2, %v685_v38  ;;  %1679 = vmatprep.mubr.msk.f32.mxu1 %vm399_vm2, %v960_v41 }
 0x1d6   : > { %1650 = vmatmul.mubr.msk.f32.gmra.mrb[14].mxu0 %vm399_vm2, %v686_v40  ;;  %1680 = vmatmul.mubr.msk.f32.vlgmr.msra.gmra.mrb[10].mxu1 %vm399_vm2, %v1670_v39 }
 0x29d   : > { %v1642_v43 = vpop.f32.mrb[8].mxu0 }
 0x29e   : > { %v796_v44 = vadd.f32 %v1642_v43, %v1484_v42  ;;  %v790_v45 = vpop.f32.mrb[9].mxu0 }
 0x29f   : > { %v791_v46 = vadd.f32 %v1484_v42, %v790_v45  ;;  %v1509_v45 = vld [vmem:[%s2050_s2 + $0x28] sm:$0xff] }
 0x2a0   : > { %v1494_v47 = vmul.f32 -1.442695, %v796_v44  ;;  %v1508_v44 = vld [vmem:[%s2050_s2 + $0x20] sm:$0xff] }
 0x2a1   : > { %v1493_v48 = vmul.f32 -1.442695, %v791_v46  ;;  %v1645_v49 = vpop.f32.mrb[10].mxu0  ;;  %v1752_v46 = vpack.c.bf16 %v1509_v45, %v1508_v44  ;;  %v1520_v45 = vld [vmem:[%s2055_s7] ss:$0 sm:$0xff] }
 0x2a2   : > { %1776 = vpow2.f32 %v1494_v47  ;;  %v806_v50 = vadd.f32 %v1645_v49, %v1484_v42  ;;  %v800_v51 = vpop.f32.mrb[11].mxu0  ;;  %v1510_v47 = vld [vmem:[%s2050_s2 + $0x30] sm:$0xff] }
 0x2a3   : > { %1778 = vpow2.f32 %v1493_v48  ;;  %v801_v52 = vadd.f32 %v1484_v42, %v800_v51  ;;  %v1511_v48 = vld [vmem:[%s2050_s2 + $0x38] sm:$0xff]  ;;  %1753 = vmatprep.subr.bf16.mxu0 %v1752_v46 }
 0x2a4   : > { %v1496_v53 = vmul.f32 -1.442695, %v806_v50  ;;  %v1756_v49 = vpack.c.bf16 %v1511_v48, %v1510_v47  ;;  %1755 = vmatpush3.bf16.msra.mxu0 %v1752_v46 }
 0x2a5   : > { %v1495_v54 = vmul.f32 -1.442695, %v801_v52  ;;  %v1648_v55 = vpop.f32.mrb[12].mxu0 }
 0x2a6   : > { %1780 = vpow2.f32 %v1496_v53  ;;  %v816_v56 = vadd.f32 %v1648_v55, %v1484_v42  ;;  %v810_v57 = vpop.f32.mrb[13].mxu0  ;;  %1757 = vmatprep.subr.bf16.mxu0 %v1756_v49 }
 0x2a7   : > { %1782 = vpow2.f32 %v1495_v54  ;;  %v811_v58 = vadd.f32 %v1484_v42, %v810_v57  ;;  %v1506_v57 = vld [vmem:[%s2052_s4] ss:$0 sm:$0xff] }
 0x2a8   : > { %v1498_v59 = vmul.f32 -1.442695, %v816_v56  ;;  %1759 = vmatpush3.bf16.msra.mxu0 %v1756_v49 }
 0x2a9   : > { %v1497_v61 = vmul.f32 -1.442695, %v811_v58  ;;  %v1651_v62 = vpop.f32.mrb[14].mxu0  ;;  %v1681_v63 = vpop.f32.mrb[10].mxu1 }
 0x2aa   : > { %1784 = vpow2.f32 %v1498_v59  ;;  %v826_v0 = vadd.f32 %v1651_v62, %v1484_v42  ;;  %v820_v1 = vpop.f32.mrb[15].mxu0  ;;  %v1052_v2 = vpop.f32.mrb[11].mxu1  ;;  %v1058_v9 = vadd.f32 %v1681_v63, %v1503_v60  ;;  %v1507_v59 = vld [vmem:[%s2053_s5] ss:$0 sm:$0xff] }
 0x2ab   : > { %1786 = vpow2.f32 %v1497_v61  ;;  %v821_v3 = vadd.f32 %v1484_v42, %v820_v1  ;;  %v1053_v4 = vadd.f32 %v1503_v60, %v1052_v2 }
 0x2ac   : > { %v1777_v5 = vpop.eup %1776  ;;  %v1500_v6 = vmul.f32 -1.442695, %v826_v0  ;;  %v1066_v16 = vsel %vm399_vm2, %v1058_v9, 0.0 }
 0x2ad   : > { %v1779_v7 = vpop.eup %1778  ;;  %v854_v8 = vadd.f32 1.0, %v1777_v5  ;;  %v1499_v10 = vmul.f32 -1.442695, %v821_v3  ;;  %v1063_v11 = vsel %vm399_vm2, %v1053_v4, 0.0 }
 0x2ae   : > { %v853_v12 = vadd.f32 1.0, %v1779_v7  ;;  %1788 = vpow2.f32 %v1500_v6  ;;  %1064 = vadd.xlane.f32.xlu0 %v1063_v11 }
 0x2af   : > { %1790 = vrcp.f32 %v854_v8 }
 0x2b0   : > { %v1781_v13 = vpop.eup %1780  ;;  %1792 = vrcp.f32 %v853_v12 }
 0x2b1   : > { %v1783_v14 = vpop.eup %1782  ;;  %v856_v15 = vadd.f32 1.0, %v1781_v13  ;;  %1794 = vpow2.f32 %v1499_v10 }
 0x2b2   : > { %v855_v17 = vadd.f32 1.0, %v1783_v14  ;;  %1067 = vadd.xlane.f32.xlu0 %v1066_v16 }
 0x2b3   : > { %1796 = vrcp.f32 %v856_v15 }
 0x2b4   : > { %v1785_v18 = vpop.eup %1784  ;;  %1798 = vrcp.f32 %v855_v17 }
 0x2b5   : > { %v1787_v19 = vpop.eup %1786  ;;  %v858_v20 = vadd.f32 1.0, %v1785_v18 }
 0x2b6   : > { %v857_v21 = vadd.f32 1.0, %v1787_v19 }
 0x2b7   : > { %1800 = vrcp.f32 %v858_v20 }
 0x2b8   : > { %v1789_v22 = vpop.eup %1788  ;;  %1802 = vrcp.f32 %v857_v21  ;;  %v1250_v21 = vld [vmem:[%s2054_s6] sm:$0xff] }
 0x2b9   : > { %v1791_v23 = vpop.eup %1790  ;;  %v860_v24 = vadd.f32 1.0, %v1789_v22  ;;  %v1251_v22 = vld [vmem:[%s2054_s6 + $0x8] sm:$0xff] }
 0x2ba   : > { %v1793_v25 = vpop.eup %1792  ;;  %878 = vst [vmem:[%s345_s25 + $0x8] sm:$0xff] %v1791_v23  ;;  %v1252_v23 = vld [vmem:[%s2054_s6 + $0x10] sm:$0xff] }
 0x2bb   : > { %v1795_v26 = vpop.eup %1794  ;;  %877 = vst [vmem:[%s345_s25] sm:$0xff] %v1793_v25  ;;  %1804 = vrcp.f32 %v860_v24  ;;  %v1760_v24 = vpack.c.bf16 %v1251_v22, %v1250_v21  ;;  %v1253_v25 = vld [vmem:[%s2054_s6 + $0x18] sm:$0xff] }
 0x2bc   : > { %v859_v27 = vadd.f32 1.0, %v1795_v26  ;;  %v1764_v26 = vpack.c.bf16 %v1253_v25, %v1252_v23 }
 0x2bd   : > { %v1797_v28 = vpop.eup %1796  ;;  %1761 = vmatprep.subr.bf16.mxu1 %v1760_v24 }
 0x2be   : > { %v1799_v29 = vpop.eup %1798  ;;  %880 = vst [vmem:[%s345_s25 + $0x18] sm:$0xff] %v1797_v28  ;;  %1806 = vrcp.f32 %v859_v27  ;;  %1763 = vmatpush3.bf16.msra.mxu1 %v1760_v24 }
 0x2bf   : > { %879 = vst [vmem:[%s345_s25 + $0x10] sm:$0xff] %v1799_v29  ;;  %1765 = vmatprep.subr.bf16.mxu1 %v1764_v26 }
 0x2c1   : > { %v1801_v30 = vpop.eup %1800 }
 0x2c2   : > { %v1803_v31 = vpop.eup %1802  ;;  %882 = vst [vmem:[%s345_s25 + $0x28] sm:$0xff] %v1801_v30  ;;  %1767 = vmatpush3.bf16.msra.mxu1 %v1764_v26 }
 0x2c3   : > { %881 = vst [vmem:[%s345_s25 + $0x20] sm:$0xff] %v1803_v31 }
 0x2c5   : > { %v1805_v32 = vpop.eup %1804 }
 0x2c6   : > { %884 = vst [vmem:[%s345_s25 + $0x38] sm:$0xff] %v1805_v32 }
 0x2c8   : > { %v1807_v33 = vpop.eup %1806 }
 0x2c9   : > { %883 = vst [vmem:[%s345_s25 + $0x30] sm:$0xff] %v1807_v33 }
 0x33b   : > { %v1065_v34 = vpop.xlane.xlu0 %1064 }
 0x33c   : > { %v1070_v35 = vmul.f32 0.03125, %v1065_v34  ;;  %v1518_v34 = vld [vmem:[%s2052_s4 + $0x1] ss:$0 sm:$0xff] }
 0x33e   : > { %v1072_v36 = vsub.f32 %v1053_v4, %v1070_v35  ;;  %v1513_v4 = vld [vmem:[%s2051_s3 + $0x1] ss:$0 sm:$0xff] }
 0x33f   : > { %v1068_v37 = vpop.xlane.xlu0 %1067 }
 0x340   : > { %v1071_v38 = vmul.f32 0.03125, %v1068_v37  ;;  %v1074_v39 = vmul.f32 %v1072_v36, %v1072_v36 }
 0x342   : > { %v1073_v40 = vsub.f32 %v1058_v9, %v1071_v38  ;;  %v1076_v41 = vsel %vm399_vm2, %v1074_v39, 0.0  ;;  %v1519_v38 = vld [vmem:[%s2053_s5 + $0x1] ss:$0 sm:$0xff] }
 0x343   : > { %1077 = vadd.xlane.f32.xlu1 %v1076_v41 }
 0x344   : > { %v1075_v42 = vmul.f32 %v1073_v40, %v1073_v40 }
 0x346   : > { %v1079_v43 = vsel %vm399_vm2, %v1075_v42, 0.0 }
 0x347   : > { %1080 = vadd.xlane.f32.xlu1 %v1079_v43 }
 0x3d0   : > { %v1078_v50 = vpop.xlane.xlu1 %1077 }
 0x3d1   : > { %v1082_v51 = vmul.f32 0.03125, %v1078_v50 }
 0x3d3   : > { %v1084_v52 = vadd.f32 1e-05, %v1082_v51 }
 0x3d4   : > { %v1081_v53 = vpop.xlane.xlu1 %1080 }
 0x3d5   : > { %1808 = vrsqrt.f32 %v1084_v52  ;;  %v1083_v54 = vmul.f32 0.03125, %v1081_v53 }
 0x3d7   : > { %v1085_v55 = vadd.f32 1e-05, %v1083_v54 }
 0x3d9   : > { %1810 = vrsqrt.f32 %v1085_v55 }
 0x3df   : > { %v1809_v56 = vpop.eup %1808 }
 0x3e0   : > { %v1088_v58 = vmul.f32 %v1809_v56, %v1072_v36 }
 0x3e2   : > { %v1096_v60 = vmul.f32 %v1506_v57, %v1088_v58 }
 0x3e3   : > { %v1811_v61 = vpop.eup %1810 }
 0x3e4   : > { %v1089_v62 = vmul.f32 %v1811_v61, %v1073_v40  ;;  %v1104_v63 = vadd.f32 %v1507_v59, %v1096_v60 }
 0x3e6   : > { %v1097_v0 = vmul.f32 %v1506_v57, %v1089_v62  ;;  %v1106_v1 = vmax.f32 %v1104_v63, 0.0 }
 0x3e8   : > { %v1105_v2 = vadd.f32 %v1507_v59, %v1097_v0  ;;  %1690 = vmatprep.mubr.msk.f32.mxu0 %vm399_vm2, %v1106_v1 }
 0x3ea   : > { %v1107_v3 = vmax.f32 %v1105_v2, 0.0 }
 0x3ec   : > { %1691 = vmatmul.mubr.msk.f32.vlgmr.msra.gmra.mrb[16].mxu0 %vm399_vm2, %v1107_v3 }
 0x4bf   : > { %v1692_v5 = vpop.f32.mrb[16].mxu0 }
 0x4c0   : > { %v1199_v6 = vadd.f32 %v1692_v5, %v1513_v4  ;;  %v1193_v7 = vpop.f32.mrb[17].mxu0 }
 0x4c1   : > { %v1194_v8 = vadd.f32 %v1513_v4, %v1193_v7 }
 0x4c2   : > { %v1209_v9 = vsel %vm399_vm2, %v1199_v6, 0.0 }
 0x4c3   : > { %1210 = vadd.xlane.f32.xlu1 %v1209_v9  ;;  %v1206_v10 = vsel %vm399_vm2, %v1194_v8, 0.0 }
 0x4c4   : > { %1207 = vadd.xlane.f32.xlu0 %v1206_v10 }
 0x550   : > { %v1211_v11 = vpop.xlane.xlu1 %1210 }
 0x551   : > { %v1213_v12 = vmul.f32 0.03125, %v1211_v11  ;;  %v1208_v13 = vpop.xlane.xlu0 %1207 }
 0x552   : > { %v1212_v14 = vmul.f32 0.03125, %v1208_v13 }
 0x553   : > { %v1215_v15 = vsub.f32 %v1199_v6, %v1213_v12 }
 0x554   : > { %v1214_v16 = vsub.f32 %v1194_v8, %v1212_v14 }
 0x555   : > { %v1217_v17 = vmul.f32 %v1215_v15, %v1215_v15 }
 0x556   : > { %v1216_v18 = vmul.f32 %v1214_v16, %v1214_v16 }
 0x557   : > { %v1221_v19 = vsel %vm399_vm2, %v1217_v17, 0.0 }
 0x558   : > { %1222 = vadd.xlane.f32.xlu1 %v1221_v19  ;;  %v1218_v20 = vsel %vm399_vm2, %v1216_v18, 0.0 }
 0x559   : > { %1219 = vadd.xlane.f32.xlu0 %v1218_v20 }
 0x5e5   : > { %v1223_v27 = vpop.xlane.xlu1 %1222 }
 0x5e6   : > { %v1225_v28 = vmul.f32 0.03125, %v1223_v27  ;;  %v1220_v29 = vpop.xlane.xlu0 %1219 }
 0x5e7   : > { %v1224_v30 = vmul.f32 0.03125, %v1220_v29 }
 0x5e8   : > { %v1227_v31 = vadd.f32 1e-05, %v1225_v28 }
 0x5e9   : > { %v1226_v32 = vadd.f32 1e-05, %v1224_v30 }
 0x5ea   : > { %1812 = vrsqrt.f32 %v1227_v31 }
 0x5eb   : > { %1814 = vrsqrt.f32 %v1226_v32 }
 0x5f4   : > { %v1813_v33 = vpop.eup %1812 }
 0x5f5   : > { %v1815_v35 = vpop.eup %1814  ;;  %v1231_v36 = vmul.f32 %v1813_v33, %v1215_v15 }
 0x5f6   : > { %v1230_v37 = vmul.f32 %v1815_v35, %v1214_v16 }
 0x5f7   : > { %v1239_v39 = vmul.f32 %v1518_v34, %v1231_v36 }
 0x5f8   : > { %v1238_v40 = vmul.f32 %v1518_v34, %v1230_v37 }
 0x5f9   : > { %v1247_v41 = vadd.f32 %v1519_v38, %v1239_v39 }
 0x5fa   : > { %v1246_v42 = vadd.f32 %v1519_v38, %v1238_v40 }
 0x5fb   : > { %v1249_v44 = vmax.f32 %v1247_v41, 0.0 }
 0x5fc   : > { %v1248_v43 = vmax.f32 %v1246_v42, 0.0 }
 0x5fe   : > { %1701 = vmatprep.mubr.msk.f32.mxu1 %vm399_vm2, %v1248_v43 }
 0x5ff   : > { %1702 = vmatmul.mubr.msk.f32.vlgmr.msra.gmra.mrb[12].mxu1 %vm399_vm2, %v1249_v44 }
 0x6d2   : > { %v1703_v46 = vpop.f32.mrb[12].mxu1 }
 0x6d3   : > { %v1339_v47 = vadd.f32 %v1703_v46, %v1520_v45  ;;  %v1333_v48 = vpop.f32.mrb[13].mxu1 }
 0x6d4   : > { %v1334_v49 = vadd.f32 %v1520_v45, %v1333_v48 }
 0x6d5   : > { %1343 = vst [vmem:[%s340_s18 + $0x8] sm:$0xff] %v1339_v47 }
 0x6d6   : > { %1342 = vst [vmem:[%s340_s18] sm:$0xff] %v1334_v49 }
 0x6d7 PF: > { %s20_s30 = sadd.s32 1, %s1822_s30  }
 0x6d8   : > { %p17_p4 = scmp.ge.s32.totalorder %s20_s30, 4  }
 0x6da   :  { %19 = sbr.rel (!%p17_p4) target bundleno = 1 (0x1), region = 104 }

// kernel: pmn_head_forward.2
= control target key start
LH: loop header
LB: loop body
LE: loop exit
PB: predicated region body
PF: predicated region fallthrough
CT: control target
= control target key end

     0   :  { %s5017_s27 = smov 0   ;;  %s6515_s0 = inlined_call_operand.vmem [shape: f32[2,128,32], index: 0, kind: input, shape index: {}]   ;;  %s6516_s1 = inlined_call_operand.vmem [shape: f32[2,128,128], index: 1, kind: input, shape index: {}]   ;;  %s6517_s2 = inlined_call_operand.vmem [shape: f32[2,6,32,32], index: 2, kind: input, shape index: {}]   ;;  %s6518_s3 = inlined_call_operand.vmem [shape: f32[2,6,1,32], index: 3, kind: input, shape index: {}]   ;;  %s6519_s4 = inlined_call_operand.vmem [shape: f32[2,4,1,32], index: 4, kind: input, shape index: {}]   ;;  %s6520_s5 = inlined_call_operand.vmem [shape: f32[2,4,1,32], index: 5, kind: input, shape index: {}]   ;;  %s6521_s6 = inlined_call_operand.vmem [shape: f32[2,3,32,128], index: 6, kind: input, shape index: {}]   ;;  %s6522_s7 = inlined_call_operand.vmem [shape: f32[2,3,1,128], index: 7, kind: input, shape index: {}]   ;;  %s6523_s8 = inlined_call_operand.vmem [shape: f32[2,128,128], index: 8, kind: output, shape index: {}]  }
   0x1 LB: > { %s3850_s28 = sadd.s32 4294967295, %s4970_s27   ;;  %p3854_p0 = scmp.ge.s32.totalorder %s4970_s27, 1  ;;  %s4970_s27 = sphi %s5017_s27, %s18_s27  }
   0x2   : > { %p328_p1 = scmp.lt.s32.totalorder %s4970_s27, 3 }
   0x4   : > { %p329_p2 = pnand %p3854_p0, %p328_p1 }
   0x5   : > { %p393_p3 = scmp.lt.s32.totalorder (!%p329_p2), %s3850_s28, 1  ;;  %vm525_vm3 = vcmask (!%p329_p2), 261120  }
   0x6   : > { %332 = sbr.rel (%p329_p2) target bundleno = 1370 (0x55a), region = 52 }
   0xd   : > { %s6525_s28 = smov (!%p393_p3, %s3850_s28), 1 }
   0xe   : > { %s4696_s29 = smul.u32 192, %s6525_s28  ;;  %s5029_s30 = sshll.u32 %s6525_s28, 7 }
   0xf   : > { %s5035_s11 = scalar_lea.vmem %s6515_s0, %s5029_s30  ;;  %s4697_s15 = smul.u32 6, %s6525_s28 }
  0x10   : > { %s5040_s14 = scalar_lea.vmem %s6517_s2, %s4696_s29  ;;  %v434_v0 = vld [vmem:[%s5035_s11] sm:$0xff]  ;;  %v435_v1 = vld [vmem:[%s5035_s11 + $0x8] sm:$0xff]  ;;  %v436_v2 = vld [vmem:[%s5035_s11 + $0x10] sm:$0xff]  ;;  %s3860_s19 = sshll.u32 %s6525_s28, 2 }
  0x11   : > { %v514_v3 = vld [vmem:[%s5040_s14] sm:$0xff]  ;;  %v515_v4 = vld [vmem:[%s5040_s14 + $0x8] sm:$0xff]  ;;  %v516_v5 = vld [vmem:[%s5040_s14 + $0x10] sm:$0xff]  ;;  %vm450_vm0 = vcmp.ne.f32.partialorder %v434_v0, %v434_v0  ;;  %vm451_vm1 = vcmp.ne.f32.partialorder %v435_v1, %v435_v1  ;;  %vm452_vm2 = vcmp.ne.f32.partialorder %v436_v2, %v436_v2  ;;  %s5171_s18 = scalar_lea.vmem %s6518_s3, %s4697_s15  ;;  %s5578_s22 = scalar_lea.vmem %s6519_s4, %s3860_s19 }
  0x12   : > { %v4572_v6 = vpack.c.bf16 %v515_v4, %v514_v3  ;;  %v517_v7 = vld [vmem:[%s5040_s14 + $0x18] sm:$0xff]  ;;  %v466_v8 = vsel %vm450_vm0, 0.0, %v434_v0  ;;  %v438_v10 = vld [vmem:[%s5035_s11 + $0x20] sm:$0xff]  ;;  %v467_v13 = vsel %vm451_vm1, 0.0, %v435_v1  ;;  %v468_v14 = vsel %vm452_vm2, 0.0, %v436_v2  ;;  %v439_v15 = vld [vmem:[%s5035_s11 + $0x28] sm:$0xff]  ;;  %s5583_s25 = scalar_lea.vmem %s6520_s5, %s3860_s19  ;;  %s6322_s13 = scalar_lea.vmem %s6516_s1, %s5029_s30 }
  0x13   : > { %v437_v9 = vld [vmem:[%s5035_s11 + $0x18] sm:$0xff]  ;;  %v4576_v11 = vpack.c.bf16 %v517_v7, %v516_v5  ;;  %v5051_v12 = vclamps-f32 %v466_v8, 3.4028235e+38  ;;  %vm454_vm5 = vcmp.ne.f32.partialorder %v438_v10, %v438_v10  ;;  %v442_v16 = vld [vmem:[%s5035_s11 + $0x40] sm:$0xff]  ;;  %v443_v17 = vld [vmem:[%s5035_s11 + $0x48] sm:$0xff]  ;;  %vm455_vm7 = vcmp.ne.f32.partialorder %v439_v15, %v439_v15  ;;  %s4698_s26 = smul.u32 96, %s6525_s28  ;;  %s6448_s19 = scalar_lea.vmem %s6523_s8, %s5029_s30 }
  0x14   : > { %4573 = vmatprep.subr.bf16.mxu0 %v4572_v6  ;;  %vm453_vm4 = vcmp.ne.f32.partialorder %v437_v9, %v437_v9  ;;  %4644 = vmatprep.subr.bf16.mxu1 %v4572_v6  ;;  %v3926_v18 = vld [vmem:[%s5040_s14 + $0x40] sm:$0xff]  ;;  %v5059_v19 = vclamps-f32 %v467_v13, 3.4028235e+38  ;;  %v440_v20 = vld [vmem:[%s5035_s11 + $0x30] sm:$0xff]  ;;  %v5062_v21 = vclamps-f32 %v468_v14, 3.4028235e+38  ;;  %vm458_vm6 = vcmp.ne.f32.partialorder %v442_v16, %v442_v16 }
  0x15   : > { %4575 = vmatpush3.bf16.msra.mxu0 %v4572_v6  ;;  %4292 = vmatprep.mubr.msk.f32.mxu0 %vm525_vm3, %v5051_v12  ;;  %v469_v22 = vsel %vm453_vm4, 0.0, %v437_v9  ;;  %v470_v23 = vsel %vm454_vm5, 0.0, %v438_v10  ;;  %v3927_v24 = vld [vmem:[%s5040_s14 + $0x48] sm:$0xff]  ;;  %v444_v25 = vld [vmem:[%s5035_s11 + $0x50] sm:$0xff]  ;;  %v474_v26 = vsel %vm458_vm6, 0.0, %v442_v16  ;;  %vm459_vm8 = vcmp.ne.f32.partialorder %v443_v17, %v443_v17  ;;  %v445_v28 = vld [vmem:[%s5035_s11 + $0x58] sm:$0xff]  ;;  %s5901_s10 = scalar_lea.vmem %s6521_s6, %s4698_s26 }
  0x16   : > { %4577 = vmatprep.subr.bf16.mxu0 %v4576_v11  ;;  %4646 = vmatpush3.bf16.msra.mxu1 %v4572_v6  ;;  %v4588_v27 = vpack.c.bf16 %v3927_v24, %v3926_v18  ;;  %v446_v29 = vld [vmem:[%s5035_s11 + $0x60] sm:$0xff]  ;;  %v447_v30 = vld [vmem:[%s5035_s11 + $0x68] sm:$0xff]  ;;  %vm456_vm9 = vcmp.ne.f32.partialorder %v440_v20, %v440_v20  ;;  %v5069_v31 = vclamps-f32 %v474_v26, 3.4028235e+38  ;;  %v475_v32 = vsel %vm459_vm8, 0.0, %v443_v17  ;;  %v3928_v33 = vld [vmem:[%s5040_s14 + $0x50] sm:$0xff] }
  0x17   : > { %4645 = vmatprep.subr.bf16.mxu1 %v4576_v11  ;;  %vm460_vm10 = vcmp.ne.f32.partialorder %v444_v25, %v444_v25  ;;  %v5072_v34 = vclamps-f32 %v475_v32, 3.4028235e+38  ;;  %vm461_vm11 = vcmp.ne.f32.partialorder %v445_v28, %v445_v28  ;;  %vm462_vm12 = vcmp.ne.f32.partialorder %v446_v29, %v446_v29  ;;  %v3929_v36 = vld [vmem:[%s5040_s14 + $0x58] sm:$0xff]  ;;  %v448_v37 = vld [vmem:[%s5035_s11 + $0x70] sm:$0xff]  ;;  %v5174_v60 = vld [vmem:[%s5171_s18] ss:$0 sm:$0xff] }
  0x18   : > { %v476_v35 = vsel %vm460_vm10, 0.0, %v444_v25  ;;  %v441_v38 = vld [vmem:[%s5035_s11 + $0x38] sm:$0xff]  ;;  %4304 = vmatprep.mubr.msk.f32.mxu1 %vm525_vm3, %v5069_v31  ;;  %v477_v40 = vsel %vm461_vm11, 0.0, %v445_v28  ;;  %v478_v41 = vsel %vm462_vm12, 0.0, %v446_v29  ;;  %vm463_vm13 = vcmp.ne.f32.partialorder %v447_v30, %v447_v30 }
  0x19   : > { %4579 = vmatpush3.bf16.msra.mxu0 %v4576_v11  ;;  %v5079_v39 = vclamps-f32 %v476_v35, 3.4028235e+38  ;;  %v5083_v42 = vclamps-f32 %v469_v22, 3.4028235e+38  ;;  %v4592_v43 = vpack.c.bf16 %v3929_v36, %v3928_v33  ;;  %v449_v44 = vld [vmem:[%s5035_s11 + $0x78] sm:$0xff]  ;;  %v471_v46 = vsel %vm455_vm7, 0.0, %v439_v15 }
  0x1a   : > { %4647 = vmatpush3.bf16.msra.mxu1 %v4576_v11  ;;  %4589 = vmatprep.subr.bf16.mxu0 %v4588_v27  ;;  %v5088_v45 = vclamps-f32 %v470_v23, 3.4028235e+38  ;;  %v5093_v47 = vclamps-f32 %v477_v40, 3.4028235e+38  ;;  %vm464_vm14 = vcmp.ne.f32.partialorder %v448_v37, %v448_v37  ;;  %v472_v48 = vsel %vm456_vm9, 0.0, %v440_v20 }
  0x1b   : > { %vm457_vm15 = vcmp.ne.f32.partialorder %v441_v38, %v441_v38  ;;  %v5098_v49 = vclamps-f32 %v478_v41, 3.4028235e+38  ;;  %v479_v50 = vsel %vm463_vm13, 0.0, %v447_v30  ;;  %v480_v51 = vsel %vm464_vm14, 0.0, %v448_v37 }
  0x1c   : > { %4293 = vmatmul.mubr.msk.f32.vlgmr.msra.gmra.mrb[0].mxu0 %vm525_vm3, %v5059_v19  ;;  %vm465_vm0 = vcmp.ne.f32.partialorder %v449_v44, %v449_v44  ;;  %v5103_v52 = vclamps-f32 %v471_v46, 3.4028235e+38  ;;  %v5107_v53 = vclamps-f32 %v472_v48, 3.4028235e+38  ;;  %v473_v54 = vsel %vm457_vm15, 0.0, %v441_v38 }
  0x1d   : > { %4295 = vmatprep.mubr.msk.f32.mxu0 %vm525_vm3, %v5062_v21  ;;  %4305 = vmatmul.mubr.msk.f32.vlgmr.msra.gmra.mrb[0].mxu1 %vm525_vm3, %v5072_v34  ;;  %v5111_v55 = vclamps-f32 %v479_v50, 3.4028235e+38  ;;  %v5115_v56 = vclamps-f32 %v480_v51, 3.4028235e+38  ;;  %v481_v57 = vsel %vm465_vm0, 0.0, %v449_v44 }
  0x1e   : > { %4307 = vmatprep.mubr.msk.f32.mxu1 %vm525_vm3, %v5079_v39  ;;  %4591 = vmatpush3.bf16.msra.mxu0 %v4588_v27  ;;  %v5119_v58 = vclamps-f32 %v473_v54, 3.4028235e+38  ;;  %v5125_v59 = vclamps-f32 %v481_v57, 3.4028235e+38 }
  0x1f   : > { %4593 = vmatprep.subr.bf16.mxu0 %v4592_v43 }
  0x20   : > { %4296 = vmatmul.mubr.msk.f32.gmra.mrb[2].mxu0 %vm525_vm3, %v5083_v42 }
  0x21   : > { %4298 = vmatprep.mubr.msk.f32.mxu0 %vm525_vm3, %v5088_v45  ;;  %4308 = vmatmul.mubr.msk.f32.gmra.mrb[2].mxu1 %vm525_vm3, %v5093_v47 }
  0x22   : > { %4310 = vmatprep.mubr.msk.f32.mxu1 %vm525_vm3, %v5098_v49  ;;  %4595 = vmatpush3.bf16.msra.mxu0 %v4592_v43 }
  0x24   : > { %4299 = vmatmul.mubr.msk.f32.gmra.mrb[4].mxu0 %vm525_vm3, %v5103_v52 }
  0x25   : > { %4301 = vmatprep.mubr.msk.f32.mxu0 %vm525_vm3, %v5107_v53  ;;  %4311 = vmatmul.mubr.msk.f32.gmra.mrb[4].mxu1 %vm525_vm3, %v5111_v55 }
  0x26   : > { %4313 = vmatprep.mubr.msk.f32.mxu1 %vm525_vm3, %v5115_v56 }
  0x28   : > { %4302 = vmatmul.mubr.msk.f32.gmra.mrb[6].mxu0 %vm525_vm3, %v5119_v58 }
  0x29   : > { %4314 = vmatmul.mubr.msk.f32.gmra.mrb[6].mxu1 %vm525_vm3, %v5125_v59  ;;  %4356 = vmatprep.mubr.msk.f32.mxu0 %vm525_vm3, %v5051_v12 }
  0x2c   : > { %4357 = vmatmul.mubr.msk.f32.vlgmr.msra.gmra.mrb[8].mxu0 %vm525_vm3, %v5059_v19 }
  0x2d   : > { %4359 = vmatprep.mubr.msk.f32.mxu0 %vm525_vm3, %v5062_v21 }
  0x30   : > { %4360 = vmatmul.mubr.msk.f32.gmra.mrb[10].mxu0 %vm525_vm3, %v5083_v42 }
  0x31   : > { %4362 = vmatprep.mubr.msk.f32.mxu0 %vm525_vm3, %v5088_v45 }
  0x34   : > { %4363 = vmatmul.mubr.msk.f32.gmra.mrb[12].mxu0 %vm525_vm3, %v5103_v52 }
  0x35   : > { %4365 = vmatprep.mubr.msk.f32.mxu0 %vm525_vm3, %v5107_v53 }
  0x38   : > { %4366 = vmatmul.mubr.msk.f32.gmra.mrb[14].mxu0 %vm525_vm3, %v5119_v58 }
  0x39   : > { %4368 = vmatprep.mubr.msk.f32.mxu0 %vm525_vm3, %v5069_v31 }
  0x3c   : > { %4369 = vmatmul.mubr.msk.f32.gmra.mrb[16].mxu0 %vm525_vm3, %v5072_v34 }
  0x3d   : > { %4371 = vmatprep.mubr.msk.f32.mxu0 %vm525_vm3, %v5079_v39 }
  0x40   : > { %4372 = vmatmul.mubr.msk.f32.gmra.mrb[18].mxu0 %vm525_vm3, %v5093_v47 }
  0x41   : > { %4374 = vmatprep.mubr.msk.f32.mxu0 %vm525_vm3, %v5098_v49 }
  0x44   : > { %4375 = vmatmul.mubr.msk.f32.gmra.mrb[20].mxu0 %vm525_vm3, %v5111_v55 }
  0x45   : > { %4377 = vmatprep.mubr.msk.f32.mxu0 %vm525_vm3, %v5115_v56 }
  0x48   : > { %4378 = vmatmul.mubr.msk.f32.gmra.mrb[22].mxu0 %vm525_vm3, %v5125_v59 }
  0x49   : > { %4420 = vmatprep.mubr.msk.f32.mxu0 %vm525_vm3, %v5051_v12 }
  0xef   : > { %v4294_v61 = vpop.f32.mrb[0].mxu0 }
  0xf0   : > { %v640_v62 = vpop.f32.mrb[1].mxu0  ;;  %v4306_v63 = vpop.f32.mrb[0].mxu1  ;;  %v5180_v2 = vadd.f32 %v4294_v61, %v5174_v60  ;;  %v5243_v61 = vld [vmem:[%s5171_s18 + $0x2] ss:$0 sm:$0xff] }
  0xf1   : > { %v5177_v0 = vadd.f32 %v5174_v60, %v640_v62  ;;  %v680_v1 = vpop.f32.mrb[1].mxu1  ;;  %v5223_v37 = vadd.f32 %v4306_v63, %v5174_v60 }
  0xf2   : > { %v724_v12 = vsel %vm525_vm3, %v5180_v2, 0.0  ;;  %v5208_v26 = vadd.f32 %v5174_v60, %v680_v1 }
  0xf3   : > { %v4297_v3 = vpop.f32.mrb[2].mxu0  ;;  %v721_v4 = vsel %vm525_vm3, %v5177_v0, 0.0  ;;  %v748_v48 = vsel %vm525_vm3, %v5223_v37, 0.0 }
  0xf4   : > { %v650_v5 = vpop.f32.mrb[3].mxu0  ;;  %722 = vadd.xlane.f32.xlu0 %v721_v4  ;;  %v4309_v6 = vpop.f32.mrb[2].mxu1  ;;  %v5188_v9 = vadd.f32 %v4297_v3, %v5174_v60  ;;  %v745_v36 = vsel %vm525_vm3, %v5208_v26, 0.0 }
  0xf5   : > { %v5185_v7 = vadd.f32 %v5174_v60, %v650_v5  ;;  %v690_v8 = vpop.f32.mrb[3].mxu1  ;;  %v5233_v46 = vadd.f32 %v4309_v6, %v5174_v60 }
  0xf6   : > { %v730_v20 = vsel %vm525_vm3, %v5188_v9, 0.0  ;;  %v5218_v35 = vadd.f32 %v5174_v60, %v690_v8 }
  0xf7   : > { %v4300_v10 = vpop.f32.mrb[4].mxu0  ;;  %v727_v11 = vsel %vm525_vm3, %v5185_v7, 0.0  ;;  %v754_v63 = vsel %vm525_vm3, %v5233_v46, 0.0 }
  0xf8   : > { %v660_v13 = vpop.f32.mrb[5].mxu0  ;;  %728 = vadd.xlane.f32.xlu1 %v727_v11  ;;  %725 = vadd.xlane.f32.xlu0 %v724_v12  ;;  %v4312_v14 = vpop.f32.mrb[4].mxu1  ;;  %v5198_v17 = vadd.f32 %v4300_v10, %v5174_v60  ;;  %v751_v44 = vsel %vm525_vm3, %v5218_v35, 0.0 }
  0xf9   : > { %v5195_v15 = vadd.f32 %v5174_v60, %v660_v13  ;;  %v700_v16 = vpop.f32.mrb[5].mxu1  ;;  %v5246_v62 = vadd.f32 %v4312_v14, %v5174_v60 }
  0xfa   : > { %v736_v29 = vsel %vm525_vm3, %v5198_v17, 0.0  ;;  %v5228_v43 = vadd.f32 %v5174_v60, %v700_v16 }
  0xfb   : > { %v4303_v18 = vpop.f32.mrb[6].mxu0  ;;  %v733_v22 = vsel %vm525_vm3, %v5195_v15, 0.0  ;;  %v760_v8 = vsel %vm525_vm3, %v5246_v62, 0.0 }
  0xfc   : > { %v670_v23 = vpop.f32.mrb[7].mxu0  ;;  %731 = vadd.xlane.f32.xlu1 %v730_v20  ;;  %734 = vadd.xlane.f32.xlu0 %v733_v22  ;;  %v4315_v24 = vpop.f32.mrb[6].mxu1  ;;  %v5211_v28 = vadd.f32 %v4303_v18, %v5174_v60  ;;  %v757_v57 = vsel %vm525_vm3, %v5228_v43, 0.0 }
  0xfd   : > { %v5205_v25 = vadd.f32 %v5174_v60, %v670_v23  ;;  %v710_v27 = vpop.f32.mrb[7].mxu1  ;;  %v5256_v6 = vadd.f32 %v4315_v24, %v5174_v60 }
  0xfe   : > { %v742_v38 = vsel %vm525_vm3, %v5211_v28, 0.0  ;;  %v5238_v54 = vadd.f32 %v5174_v60, %v710_v27 }
  0xff   : > { %v739_v30 = vsel %vm525_vm3, %v5205_v25, 0.0  ;;  %v4358_v32 = vpop.f32.mrb[8].mxu0  ;;  %v766_v60 = vsel %vm525_vm3, %v5256_v6, 0.0 }
 0x100   : > { %737 = vadd.xlane.f32.xlu1 %v736_v29  ;;  %740 = vadd.xlane.f32.xlu0 %v739_v30  ;;  %v1547_v33 = vpop.f32.mrb[9].mxu0  ;;  %v763_v5 = vsel %vm525_vm3, %v5238_v54, 0.0  ;;  %v5266_v14 = vadd.f32 %v4358_v32, %v5243_v61 }
 0x101   : > { %v5251_v4 = vadd.f32 %v5243_v61, %v1547_v33 }
 0x102   : > { %v1633_v24 = vsel %vm525_vm3, %v5266_v14, 0.0 }
 0x103   : > { %v4361_v40 = vpop.f32.mrb[10].mxu0  ;;  %v1630_v13 = vsel %vm525_vm3, %v5251_v4, 0.0 }
 0x104   : > { %743 = vadd.xlane.f32.xlu1 %v742_v38  ;;  %746 = vadd.xlane.f32.xlu0 %v745_v36  ;;  %v1557_v41 = vpop.f32.mrb[11].mxu0  ;;  %v5276_v23 = vadd.f32 %v4361_v40, %v5243_v61 }
 0x105   : > { %v5261_v12 = vadd.f32 %v5243_v61, %v1557_v41 }
 0x106   : > { %v1639_v36 = vsel %vm525_vm3, %v5276_v23, 0.0 }
 0x107   : > { %v4364_v50 = vpop.f32.mrb[12].mxu0  ;;  %v1636_v22 = vsel %vm525_vm3, %v5261_v12, 0.0 }
 0x108   : > { %749 = vadd.xlane.f32.xlu1 %v748_v48  ;;  %752 = vadd.xlane.f32.xlu0 %v751_v44  ;;  %v1567_v51 = vpop.f32.mrb[13].mxu0  ;;  %v5286_v33 = vadd.f32 %v4364_v50, %v5243_v61 }
 0x109   : > { %v5271_v20 = vadd.f32 %v5243_v61, %v1567_v51 }
 0x10a   : > { %v1645_v50 = vsel %vm525_vm3, %v5286_v33, 0.0 }
 0x10b   : > { %v4367_v1 = vpop.f32.mrb[14].mxu0  ;;  %v1642_v32 = vsel %vm525_vm3, %v5271_v20, 0.0 }
 0x10c   : > { %755 = vadd.xlane.f32.xlu1 %v754_v63  ;;  %758 = vadd.xlane.f32.xlu0 %v757_v57  ;;  %v1577_v3 = vpop.f32.mrb[15].mxu0  ;;  %v5296_v48 = vadd.f32 %v4367_v1, %v5243_v61 }
 0x10d   : > { %v5281_v30 = vadd.f32 %v5243_v61, %v1577_v3 }
 0x10e   : > { %v1651_v3 = vsel %vm525_vm3, %v5296_v48, 0.0 }
 0x10f   : > { %v4370_v10 = vpop.f32.mrb[16].mxu0  ;;  %v1648_v44 = vsel %vm525_vm3, %v5281_v30, 0.0 }
 0x110   : > { %761 = vadd.xlane.f32.xlu1 %v760_v8  ;;  %764 = vadd.xlane.f32.xlu0 %v763_v5  ;;  %v1587_v11 = vpop.f32.mrb[17].mxu0  ;;  %v5306_v63 = vadd.f32 %v4370_v10, %v5243_v61 }
 0x111   : > { %v5291_v41 = vadd.f32 %v5243_v61, %v1587_v11 }
 0x112   : > { %v1657_v11 = vsel %vm525_vm3, %v5306_v63, 0.0 }
 0x113   : > { %v4373_v16 = vpop.f32.mrb[18].mxu0  ;;  %v1654_v57 = vsel %vm525_vm3, %v5291_v41, 0.0 }
 0x114   : > { %767 = vadd.xlane.f32.xlu1 %v766_v60  ;;  %1631 = vadd.xlane.f32.xlu0 %v1630_v13  ;;  %v1597_v18 = vpop.f32.mrb[19].mxu0  ;;  %v5316_v8 = vadd.f32 %v4373_v16, %v5243_v61 }
 0x115   : > { %v5301_v51 = vadd.f32 %v5243_v61, %v1597_v18 }
 0x116   : > { %v1663_v18 = vsel %vm525_vm3, %v5316_v8, 0.0 }
 0x117   : > { %v4376_v27 = vpop.f32.mrb[20].mxu0  ;;  %v1660_v5 = vsel %vm525_vm3, %v5301_v51, 0.0 }
 0x118   : > { %1634 = vadd.xlane.f32.xlu1 %v1633_v24  ;;  %1637 = vadd.xlane.f32.xlu0 %v1636_v22  ;;  %v1607_v29 = vpop.f32.mrb[21].mxu0  ;;  %v5326_v60 = vadd.f32 %v4376_v27, %v5243_v61 }
 0x119   : > { %v5311_v1 = vadd.f32 %v5243_v61, %v1607_v29 }
 0x11a   : > { %v1669_v24 = vsel %vm525_vm3, %v5326_v60, 0.0 }
 0x11b   : > { %v4379_v38 = vpop.f32.mrb[22].mxu0  ;;  %v1666_v13 = vsel %vm525_vm3, %v5311_v1, 0.0 }
 0x11c   : > { %1640 = vadd.xlane.f32.xlu1 %v1639_v36  ;;  %1643 = vadd.xlane.f32.xlu0 %v1642_v32  ;;  %v1617_v40 = vpop.f32.mrb[23].mxu0  ;;  %v5333_v22 = vadd.f32 %v4379_v38, %v5243_v61 }
 0x11d   : > { %v5321_v10 = vadd.f32 %v5243_v61, %v1617_v40 }
 0x11e   : > { %v1675_v27 = vsel %vm525_vm3, %v5333_v22, 0.0 }
 0x11f   : > { %v1672_v16 = vsel %vm525_vm3, %v5321_v10, 0.0 }
 0x120   : > { %1646 = vadd.xlane.f32.xlu1 %v1645_v50  ;;  %1649 = vadd.xlane.f32.xlu0 %v1648_v44 }
 0x124   : > { %1652 = vadd.xlane.f32.xlu1 %v1651_v3  ;;  %1655 = vadd.xlane.f32.xlu0 %v1654_v57 }
 0x128   : > { %1658 = vadd.xlane.f32.xlu1 %v1657_v11  ;;  %1661 = vadd.xlane.f32.xlu0 %v1660_v5 }
 0x12c   : > { %1664 = vadd.xlane.f32.xlu1 %v1663_v18  ;;  %1667 = vadd.xlane.f32.xlu0 %v1666_v13 }
 0x130   : > { %1670 = vadd.xlane.f32.xlu1 %v1669_v24  ;;  %1673 = vadd.xlane.f32.xlu0 %v1672_v16 }
 0x134   : > { %1676 = vadd.xlane.f32.xlu1 %v1675_v27 }
 0x181   : > { %v723_v29 = vpop.xlane.xlu0 %722 }
 0x182   : > { %v770_v32 = vmul.f32 0.03125, %v723_v29 }
 0x184   : > { %v5340_v36 = vsub.f32 %v5177_v0, %v770_v32 }
 0x185   : > { %v729_v40 = vpop.xlane.xlu1 %728  ;;  %v726_v44 = vpop.xlane.xlu0 %725 }
 0x186   : > { %v772_v50 = vmul.f32 0.03125, %v729_v40  ;;  %v771_v57 = vmul.f32 0.03125, %v726_v44  ;;  %v802_v61 = vmul.f32 %v5340_v36, %v5340_v36 }
 0x188   : > { %v5345_v38 = vsub.f32 %v5185_v7, %v772_v50  ;;  %v5348_v3 = vsub.f32 %v5180_v2, %v771_v57  ;;  %v818_v5 = vsel %vm525_vm3, %v802_v61, 0.0 }
 0x189   : > { %v732_v11 = vpop.xlane.xlu1 %731  ;;  %819 = vadd.xlane.f32.xlu0 %v818_v5  ;;  %v735_v13 = vpop.xlane.xlu0 %734 }
 0x18a   : > { %v773_v0 = vmul.f32 0.03125, %v732_v11  ;;  %v774_v18 = vmul.f32 0.03125, %v735_v13  ;;  %v804_v16 = vmul.f32 %v5345_v38, %v5345_v38  ;;  %v803_v24 = vmul.f32 %v5348_v3, %v5348_v3 }
 0x18c   : > { %v5356_v27 = vsub.f32 %v5188_v9, %v773_v0  ;;  %v5359_v7 = vsub.f32 %v5195_v15, %v774_v18  ;;  %v824_v2 = vsel %vm525_vm3, %v804_v16, 0.0  ;;  %v821_v29 = vsel %vm525_vm3, %v803_v24, 0.0 }
 0x18d   : > { %v738_v32 = vpop.xlane.xlu1 %737  ;;  %825 = vadd.xlane.f32.xlu0 %v824_v2  ;;  %822 = vadd.xlane.f32.xlu1 %v821_v29  ;;  %v741_v40 = vpop.xlane.xlu0 %740 }
 0x18e   : > { %v775_v44 = vmul.f32 0.03125, %v738_v32  ;;  %v776_v50 = vmul.f32 0.03125, %v741_v40  ;;  %v805_v57 = vmul.f32 %v5356_v27, %v5356_v27  ;;  %v806_v9 = vmul.f32 %v5359_v7, %v5359_v7 }
 0x190   : > { %v5368_v61 = vsub.f32 %v5198_v17, %v775_v44  ;;  %v5371_v15 = vsub.f32 %v5205_v25, %v776_v50  ;;  %v827_v5 = vsel %vm525_vm3, %v805_v57, 0.0  ;;  %v830_v11 = vsel %vm525_vm3, %v806_v9, 0.0 }
 0x191   : > { %v744_v13 = vpop.xlane.xlu1 %743  ;;  %828 = vadd.xlane.f32.xlu1 %v827_v5  ;;  %831 = vadd.xlane.f32.xlu0 %v830_v11  ;;  %v747_v0 = vpop.xlane.xlu0 %746 }
 0x192   : > { %v777_v18 = vmul.f32 0.03125, %v744_v13  ;;  %v778_v16 = vmul.f32 0.03125, %v747_v0  ;;  %v807_v24 = vmul.f32 %v5368_v61, %v5368_v61  ;;  %v808_v17 = vmul.f32 %v5371_v15, %v5371_v15 }
 0x194   : > { %v5380_v2 = vsub.f32 %v5211_v28, %v777_v18  ;;  %v5383_v25 = vsub.f32 %v5208_v26, %v778_v16  ;;  %v833_v29 = vsel %vm525_vm3, %v807_v24, 0.0  ;;  %v836_v32 = vsel %vm525_vm3, %v808_v17, 0.0 }
 0x195   : > { %v750_v40 = vpop.xlane.xlu1 %749  ;;  %834 = vadd.xlane.f32.xlu1 %v833_v29  ;;  %837 = vadd.xlane.f32.xlu0 %v836_v32  ;;  %v753_v44 = vpop.xlane.xlu0 %752 }
 0x196   : > { %v779_v50 = vmul.f32 0.03125, %v750_v40  ;;  %v780_v57 = vmul.f32 0.03125, %v753_v44  ;;  %v809_v9 = vmul.f32 %v5380_v2, %v5380_v2  ;;  %v810_v28 = vmul.f32 %v5383_v25, %v5383_v25 }
 0x198   : > { %v5392_v5 = vsub.f32 %v5223_v37, %v779_v50  ;;  %v5395_v26 = vsub.f32 %v5218_v35, %v780_v57  ;;  %v839_v11 = vsel %vm525_vm3, %v809_v9, 0.0  ;;  %v842_v13 = vsel %vm525_vm3, %v810_v28, 0.0 }
 0x199   : > { %v756_v0 = vpop.xlane.xlu1 %755  ;;  %840 = vadd.xlane.f32.xlu1 %v839_v11  ;;  %843 = vadd.xlane.f32.xlu0 %v842_v13  ;;  %v759_v18 = vpop.xlane.xlu0 %758 }
 0x19a   : > { %v781_v16 = vmul.f32 0.03125, %v756_v0  ;;  %v782_v24 = vmul.f32 0.03125, %v759_v18  ;;  %v811_v17 = vmul.f32 %v5392_v5, %v5392_v5  ;;  %v812_v37 = vmul.f32 %v5395_v26, %v5395_v26 }
 0x19c   : > { %v5404_v29 = vsub.f32 %v5233_v46, %v781_v16  ;;  %v5407_v35 = vsub.f32 %v5228_v43, %v782_v24  ;;  %v845_v32 = vsel %vm525_vm3, %v811_v17, 0.0  ;;  %v848_v40 = vsel %vm525_vm3, %v812_v37, 0.0 }
 0x19d   : > { %v762_v44 = vpop.xlane.xlu1 %761  ;;  %846 = vadd.xlane.f32.xlu1 %v845_v32  ;;  %849 = vadd.xlane.f32.xlu0 %v848_v40  ;;  %v765_v50 = vpop.xlane.xlu0 %764 }
 0x19e   : > { %v783_v57 = vmul.f32 0.03125, %v762_v44  ;;  %v784_v9 = vmul.f32 0.03125, %v765_v50  ;;  %v813_v28 = vmul.f32 %v5404_v29, %v5404_v29  ;;  %v814_v46 = vmul.f32 %v5407_v35, %v5407_v35 }
 0x1a0   : > { %v5416_v11 = vsub.f32 %v5246_v62, %v783_v57  ;;  %v5419_v43 = vsub.f32 %v5238_v54, %v784_v9  ;;  %v851_v13 = vsel %vm525_vm3, %v813_v28, 0.0  ;;  %v854_v0 = vsel %vm525_vm3, %v814_v46, 0.0 }
 0x1a1   : > { %v768_v18 = vpop.xlane.xlu1 %767  ;;  %852 = vadd.xlane.f32.xlu1 %v851_v13  ;;  %855 = vadd.xlane.f32.xlu0 %v854_v0  ;;  %v1632_v16 = vpop.xlane.xlu0 %1631 }
 0x1a2   : > { %v785_v24 = vmul.f32 0.03125, %v768_v18  ;;  %v1678_v17 = vmul.f32 0.03125, %v1632_v16  ;;  %v815_v37 = vmul.f32 %v5416_v11, %v5416_v11  ;;  %v816_v62 = vmul.f32 %v5419_v43, %v5419_v43  ;;  %v3900_v16 = vld [vmem:[%s5040_s14 + $0x20] sm:$0xff] }
 0x1a4   : > { %v5428_v32 = vsub.f32 %v5256_v6, %v785_v24  ;;  %v5431_v54 = vsub.f32 %v5251_v4, %v1678_v17  ;;  %v857_v40 = vsel %vm525_vm3, %v815_v37, 0.0  ;;  %v860_v44 = vsel %vm525_vm3, %v816_v62, 0.0  ;;  %v3901_v24 = vld [vmem:[%s5040_s14 + $0x28] sm:$0xff] }
 0x1a5   : > { %v1635_v50 = vpop.xlane.xlu1 %1634  ;;  %858 = vadd.xlane.f32.xlu1 %v857_v40  ;;  %861 = vadd.xlane.f32.xlu0 %v860_v44  ;;  %v1638_v57 = vpop.xlane.xlu0 %1637  ;;  %v4580_v62 = vpack.c.bf16 %v3901_v24, %v3900_v16 }
 0x1a6   : > { %v1679_v9 = vmul.f32 0.03125, %v1635_v50  ;;  %v1680_v28 = vmul.f32 0.03125, %v1638_v57  ;;  %v817_v46 = vmul.f32 %v5428_v32, %v5428_v32  ;;  %v1710_v6 = vmul.f32 %v5431_v54, %v5431_v54 }
 0x1a7   : > { %4581 = vmatprep.subr.bf16.mxu1 %v4580_v62 }
 0x1a8   : > { %v5440_v4 = vsub.f32 %v5266_v14, %v1679_v9  ;;  %v5443_v13 = vsub.f32 %v5261_v12, %v1680_v28  ;;  %v863_v0 = vsel %vm525_vm3, %v817_v46, 0.0  ;;  %v1726_v18 = vsel %vm525_vm3, %v1710_v6, 0.0  ;;  %4583 = vmatpush3.bf16.msra.mxu1 %v4580_v62  ;;  %v3902_v46 = vld [vmem:[%s5040_s14 + $0x30] sm:$0xff]  ;;  %v3903_v6 = vld [vmem:[%s5040_s14 + $0x38] sm:$0xff] }
 0x1a9   : > { %v1641_v17 = vpop.xlane.xlu1 %1640  ;;  %864 = vadd.xlane.f32.xlu1 %v863_v0  ;;  %1727 = vadd.xlane.f32.xlu0 %v1726_v18  ;;  %v1644_v37 = vpop.xlane.xlu0 %1643  ;;  %v4584_v16 = vpack.c.bf16 %v3903_v6, %v3902_v46 }
 0x1aa   : > { %v1681_v40 = vmul.f32 0.03125, %v1641_v17  ;;  %v1682_v44 = vmul.f32 0.03125, %v1644_v37  ;;  %v1711_v14 = vmul.f32 %v5440_v4, %v5440_v4  ;;  %v1712_v12 = vmul.f32 %v5443_v13, %v5443_v13 }
 0x1ab   : > { %4585 = vmatprep.subr.bf16.mxu1 %v4584_v16 }
 0x1ac   : > { %v5454_v50 = vsub.f32 %v5276_v23, %v1681_v40  ;;  %v5457_v57 = vsub.f32 %v5271_v20, %v1682_v44  ;;  %v1729_v9 = vsel %vm525_vm3, %v1711_v14, 0.0  ;;  %v1732_v28 = vsel %vm525_vm3, %v1712_v12, 0.0  ;;  %4587 = vmatpush3.bf16.msra.mxu1 %v4584_v16  ;;  %v3952_v16 = vld [vmem:[%s5040_s14 + $0x60] sm:$0xff] }
 0x1ad   : > { %v1647_v0 = vpop.xlane.xlu1 %1646  ;;  %1730 = vadd.xlane.f32.xlu1 %v1729_v9  ;;  %1733 = vadd.xlane.f32.xlu0 %v1732_v28  ;;  %v1650_v18 = vpop.xlane.xlu0 %1649 }
 0x1ae   : > { %v1683_v24 = vmul.f32 0.03125, %v1647_v0  ;;  %v1684_v17 = vmul.f32 0.03125, %v1650_v18  ;;  %v1713_v23 = vmul.f32 %v5454_v50, %v5454_v50  ;;  %v1714_v20 = vmul.f32 %v5457_v57, %v5457_v57 }
 0x1b0   : > { %v5468_v37 = vsub.f32 %v5286_v33, %v1683_v24  ;;  %v5471_v62 = vsub.f32 %v5281_v30, %v1684_v17  ;;  %v1735_v40 = vsel %vm525_vm3, %v1713_v23, 0.0  ;;  %v1738_v44 = vsel %vm525_vm3, %v1714_v20, 0.0  ;;  %v3953_v24 = vld [vmem:[%s5040_s14 + $0x68] sm:$0xff] }
 0x1b1   : > { %v1653_v14 = vpop.xlane.xlu1 %1652  ;;  %1736 = vadd.xlane.f32.xlu1 %v1735_v40  ;;  %1739 = vadd.xlane.f32.xlu0 %v1738_v44  ;;  %v1656_v12 = vpop.xlane.xlu0 %1655  ;;  %v5489_v20 = vpack.c.bf16 %v3953_v24, %v3952_v16 }
 0x1b2   : > { %v1685_v9 = vmul.f32 0.03125, %v1653_v14  ;;  %v1686_v28 = vmul.f32 0.03125, %v1656_v12  ;;  %v1715_v33 = vmul.f32 %v5468_v37, %v5468_v37  ;;  %v1716_v30 = vmul.f32 %v5471_v62, %v5471_v62 }
 0x1b3   : > { %4597 = vmatprep.subr.bf16.mxu1 %v5489_v20 }
 0x1b4   : > { %v5480_v46 = vsub.f32 %v5296_v48, %v1685_v9  ;;  %v5483_v6 = vsub.f32 %v5291_v41, %v1686_v28  ;;  %v1741_v0 = vsel %vm525_vm3, %v1715_v33, 0.0  ;;  %v1744_v18 = vsel %vm525_vm3, %v1716_v30, 0.0 }
 0x1b5   : > { %v1659_v17 = vpop.xlane.xlu1 %1658  ;;  %1742 = vadd.xlane.f32.xlu1 %v1741_v0  ;;  %1745 = vadd.xlane.f32.xlu0 %v1744_v18  ;;  %v1662_v23 = vpop.xlane.xlu0 %1661 }
 0x1b6   : > { %v1687_v40 = vmul.f32 0.03125, %v1659_v17  ;;  %v1688_v44 = vmul.f32 0.03125, %v1662_v23  ;;  %v1717_v48 = vmul.f32 %v5480_v46, %v5480_v46  ;;  %v1718_v41 = vmul.f32 %v5483_v6, %v5483_v6 }
 0x1b8   : > { %v5497_v14 = vsub.f32 %v5306_v63, %v1687_v40  ;;  %v5500_v12 = vsub.f32 %v5301_v51, %v1688_v44  ;;  %v1747_v9 = vsel %vm525_vm3, %v1717_v48, 0.0  ;;  %v1750_v28 = vsel %vm525_vm3, %v1718_v41, 0.0 }
 0x1b9   : > { %v1665_v33 = vpop.xlane.xlu1 %1664  ;;  %1748 = vadd.xlane.f32.xlu1 %v1747_v9  ;;  %1751 = vadd.xlane.f32.xlu0 %v1750_v28  ;;  %v1668_v30 = vpop.xlane.xlu0 %1667 }
 0x1ba   : > { %v1689_v0 = vmul.f32 0.03125, %v1665_v33  ;;  %v1690_v18 = vmul.f32 0.03125, %v1668_v30  ;;  %v1719_v16 = vmul.f32 %v5497_v14, %v5497_v14  ;;  %v1720_v63 = vmul.f32 %v5500_v12, %v5500_v12 }
 0x1bc   : > { %v5509_v24 = vsub.f32 %v5316_v8, %v1689_v0  ;;  %v5512_v51 = vsub.f32 %v5311_v1, %v1690_v18  ;;  %v1753_v17 = vsel %vm525_vm3, %v1719_v16, 0.0  ;;  %v1756_v23 = vsel %vm525_vm3, %v1720_v63, 0.0 }
 0x1bd   : > { %v1671_v40 = vpop.xlane.xlu1 %1670  ;;  %1754 = vadd.xlane.f32.xlu1 %v1753_v17  ;;  %1757 = vadd.xlane.f32.xlu0 %v1756_v23  ;;  %v1674_v44 = vpop.xlane.xlu0 %1673 }
 0x1be   : > { %v1691_v48 = vmul.f32 0.03125, %v1671_v40  ;;  %v1692_v41 = vmul.f32 0.03125, %v1674_v44  ;;  %v1721_v9 = vmul.f32 %v5509_v24, %v5509_v24  ;;  %v1722_v8 = vmul.f32 %v5512_v51, %v5512_v51  ;;  %v3978_v44 = vld [vmem:[%s5040_s14 + $0x80] sm:$0xff] }
 0x1c0   : > { %v5521_v28 = vsub.f32 %v5326_v60, %v1691_v48  ;;  %v5524_v1 = vsub.f32 %v5321_v10, %v1692_v41  ;;  %v1759_v33 = vsel %vm525_vm3, %v1721_v9, 0.0  ;;  %v1762_v30 = vsel %vm525_vm3, %v1722_v8, 0.0  ;;  %v3979_v48 = vld [vmem:[%s5040_s14 + $0x88] sm:$0xff]  ;;  %v3980_v41 = vld [vmem:[%s5040_s14 + $0x90] sm:$0xff]  ;;  %v3981_v8 = vld [vmem:[%s5040_s14 + $0x98] sm:$0xff] }
 0x1c1   : > { %v1677_v0 = vpop.xlane.xlu1 %1676  ;;  %1760 = vadd.xlane.f32.xlu1 %v1759_v33  ;;  %1763 = vadd.xlane.f32.xlu0 %v1762_v30  ;;  %v4604_v9 = vpack.c.bf16 %v3979_v48, %v3978_v44  ;;  %v4608_v33 = vpack.c.bf16 %v3981_v8, %v3980_v41  ;;  %v5590_v48 = vld [vmem:[%s5583_s25] ss:$0 sm:$0xff] }
 0x1c2   : > { %v1693_v18 = vmul.f32 0.03125, %v1677_v0  ;;  %v1723_v16 = vmul.f32 %v5521_v28, %v5521_v28  ;;  %v1724_v60 = vmul.f32 %v5524_v1, %v5524_v1 }
 0x1c3   : > { %4605 = vmatprep.subr.bf16.mxu0 %v4604_v9 }
 0x1c4   : > { %v5533_v10 = vsub.f32 %v5333_v22, %v1693_v18  ;;  %v1765_v63 = vsel %vm525_vm3, %v1723_v16, 0.0  ;;  %v1768_v17 = vsel %vm525_vm3, %v1724_v60, 0.0  ;;  %4607 = vmatpush3.bf16.msra.mxu0 %v4604_v9  ;;  %v5586_v60 = vld [vmem:[%s5578_s22] ss:$0 sm:$0xff] }
 0x1c5   : > { %1766 = vadd.xlane.f32.xlu1 %v1765_v63  ;;  %1769 = vadd.xlane.f32.xlu0 %v1768_v17 }
 0x1c6   : > { %v1725_v23 = vmul.f32 %v5533_v10, %v5533_v10  ;;  %4609 = vmatprep.subr.bf16.mxu0 %v4608_v33 }
 0x1c8   : > { %v1771_v40 = vsel %vm525_vm3, %v1725_v23, 0.0  ;;  %4611 = vmatpush3.bf16.msra.mxu0 %v4608_v33 }
 0x1c9   : > { %1772 = vadd.xlane.f32.xlu1 %v1771_v40 }
 0x1cb   : > { %4421 = vmatmul.mubr.msk.f32.vlgmr.msra.gmra.mrb[24].mxu0 %vm525_vm3, %v5059_v19 }
 0x1cc   : > { %4423 = vmatprep.mubr.msk.f32.mxu0 %vm525_vm3, %v5062_v21 }
 0x1cf   : > { %4424 = vmatmul.mubr.msk.f32.gmra.mrb[26].mxu0 %vm525_vm3, %v5083_v42 }
 0x1d0   : > { %4426 = vmatprep.mubr.msk.f32.mxu0 %vm525_vm3, %v5088_v45 }
 0x1d3   : > { %4427 = vmatmul.mubr.msk.f32.gmra.mrb[28].mxu0 %vm525_vm3, %v5103_v52 }
 0x1d4   : > { %4429 = vmatprep.mubr.msk.f32.mxu0 %vm525_vm3, %v5107_v53 }
 0x1d7   : > { %4430 = vmatmul.mubr.msk.f32.gmra.mrb[30].mxu0 %vm525_vm3, %v5119_v58 }
 0x1d8   : > { %4432 = vmatprep.mubr.msk.f32.mxu0 %vm525_vm3, %v5069_v31 }
 0x1db   : > { %4433 = vmatmul.mubr.msk.f32.gmra.mrb[32].mxu0 %vm525_vm3, %v5072_v34 }
 0x1dc   : > { %4435 = vmatprep.mubr.msk.f32.mxu0 %vm525_vm3, %v5079_v39 }
 0x1df   : > { %4436 = vmatmul.mubr.msk.f32.gmra.mrb[34].mxu0 %vm525_vm3, %v5093_v47 }
 0x1e0   : > { %4438 = vmatprep.mubr.msk.f32.mxu0 %vm525_vm3, %v5098_v49 }
 0x1e3   : > { %4439 = vmatmul.mubr.msk.f32.gmra.mrb[36].mxu0 %vm525_vm3, %v5111_v55 }
 0x1e4   : > { %4441 = vmatprep.mubr.msk.f32.mxu0 %vm525_vm3, %v5115_v56 }
 0x1e7   : > { %4442 = vmatmul.mubr.msk.f32.gmra.mrb[38].mxu0 %vm525_vm3, %v5125_v59 }
 0x216   : > { %v820_v19 = vpop.xlane.xlu0 %819 }
 0x217   : > { %v866_v21 = vmul.f32 0.03125, %v820_v19 }
 0x219   : > { %v882_v31 = vadd.f32 1e-05, %v866_v21 }
 0x21a   : > { %v823_v34 = vpop.xlane.xlu1 %822  ;;  %v826_v39 = vpop.xlane.xlu0 %825 }
 0x21b   : > { %4708 = vrsqrt.f32 %v882_v31  ;;  %v867_v42 = vmul.f32 0.03125, %v823_v34  ;;  %v868_v45 = vmul.f32 0.03125, %v826_v39 }
 0x21d   : > { %v883_v47 = vadd.f32 1e-05, %v867_v42  ;;  %v884_v49 = vadd.f32 1e-05, %v868_v45 }
 0x21e   : > { %v829_v52 = vpop.xlane.xlu1 %828  ;;  %v832_v53 = vpop.xlane.xlu0 %831 }
 0x21f   : > { %4710 = vrsqrt.f32 %v883_v47  ;;  %v869_v55 = vmul.f32 0.03125, %v829_v52  ;;  %v870_v58 = vmul.f32 0.03125, %v832_v53  ;;  %v3954_v52 = vld [vmem:[%s5040_s14 + $0x70] sm:$0xff]  ;;  %v3955_v53 = vld [vmem:[%s5040_s14 + $0x78] sm:$0xff] }
 0x220   : > { %4712 = vrsqrt.f32 %v884_v49 }
 0x221   : > { %v885_v56 = vadd.f32 1e-05, %v869_v55  ;;  %v886_v22 = vadd.f32 1e-05, %v870_v58 }
 0x222   : > { %v835_v59 = vpop.xlane.xlu1 %834  ;;  %v838_v30 = vpop.xlane.xlu0 %837 }
 0x223   : > { %4714 = vrsqrt.f32 %v885_v56  ;;  %v871_v0 = vmul.f32 0.03125, %v835_v59  ;;  %v872_v18 = vmul.f32 0.03125, %v838_v30 }
 0x224   : > { %4716 = vrsqrt.f32 %v886_v22 }
 0x225   : > { %v4709_v16 = vpop.eup %4708  ;;  %v887_v63 = vadd.f32 1e-05, %v871_v0  ;;  %v888_v17 = vadd.f32 1e-05, %v872_v18 }
 0x226   : > { %v841_v23 = vpop.xlane.xlu1 %840  ;;  %v844_v40 = vpop.xlane.xlu0 %843  ;;  %v914_v44 = vmul.f32 %v4709_v16, %v5340_v36 }
 0x227   : > { %4718 = vrsqrt.f32 %v887_v63  ;;  %v873_v41 = vmul.f32 0.03125, %v841_v23  ;;  %v874_v9 = vmul.f32 0.03125, %v844_v40  ;;  %v4600_v63 = vpack.c.bf16 %v3955_v53, %v3954_v52 }
 0x228   : > { %4720 = vrsqrt.f32 %v888_v17  ;;  %v936_v8 = vmul.f32 %v5586_v60, %v914_v44 }
 0x229   : > { %v4711_v33 = vpop.eup %4710  ;;  %v889_v19 = vadd.f32 1e-05, %v873_v41  ;;  %v890_v21 = vadd.f32 1e-05, %v874_v9 }
 0x22a   : > { %v4713_v31 = vpop.eup %4712  ;;  %v915_v34 = vmul.f32 %v4711_v33, %v5348_v3  ;;  %v847_v39 = vpop.xlane.xlu1 %846  ;;  %v958_v36 = vadd.f32 %v5590_v48, %v936_v8 }
 0x22b   : > { %v850_v42 = vpop.xlane.xlu0 %849  ;;  %4722 = vrsqrt.f32 %v889_v19  ;;  %v875_v45 = vmul.f32 0.03125, %v847_v39  ;;  %v916_v49 = vmul.f32 %v4713_v31, %v5345_v38 }
 0x22c   : > { %v876_v47 = vmul.f32 0.03125, %v850_v42  ;;  %v937_v55 = vmul.f32 %v5586_v60, %v915_v34  ;;  %4724 = vrsqrt.f32 %v890_v21  ;;  %v974_v58 = vmax.f32 %v958_v36, 0.0 }
 0x22d   : > { %v4715_v56 = vpop.eup %4714  ;;  %v891_v22 = vadd.f32 1e-05, %v875_v45  ;;  %v938_v3 = vmul.f32 %v5586_v60, %v916_v49 }
 0x22e   : > { %v892_v59 = vadd.f32 1e-05, %v876_v47  ;;  %v4717_v30 = vpop.eup %4716  ;;  %v959_v0 = vadd.f32 %v5590_v48, %v937_v55  ;;  %v853_v18 = vpop.xlane.xlu1 %852  ;;  %4324 = vmatprep.mubr.msk.f32.mxu1 %vm525_vm3, %v974_v58  ;;  %v917_v38 = vmul.f32 %v4715_v56, %v5356_v27 }
 0x22f   : > { %v856_v16 = vpop.xlane.xlu0 %855  ;;  %4726 = vrsqrt.f32 %v891_v22  ;;  %v877_v17 = vmul.f32 0.03125, %v853_v18  ;;  %v960_v40 = vadd.f32 %v5590_v48, %v938_v3  ;;  %v918_v9 = vmul.f32 %v4717_v30, %v5359_v7 }
 0x230   : > { %v878_v23 = vmul.f32 0.03125, %v856_v16  ;;  %v975_v44 = vmax.f32 %v959_v0, 0.0  ;;  %4728 = vrsqrt.f32 %v892_v59  ;;  %v939_v41 = vmul.f32 %v5586_v60, %v917_v38 }
 0x231   : > { %v4719_v8 = vpop.eup %4718  ;;  %v893_v33 = vadd.f32 1e-05, %v877_v17  ;;  %v976_v21 = vmax.f32 %v960_v40, 0.0  ;;  %v940_v42 = vmul.f32 %v5586_v60, %v918_v9 }
 0x232   : > { %v894_v19 = vadd.f32 1e-05, %v878_v23  ;;  %v4721_v31 = vpop.eup %4720  ;;  %v859_v34 = vpop.xlane.xlu1 %858  ;;  %4325 = vmatmul.mubr.msk.f32.vlgmr.msra.gmra.mrb[8].mxu1 %vm525_vm3, %v975_v44  ;;  %v961_v39 = vadd.f32 %v5590_v48, %v939_v41  ;;  %v919_v36 = vmul.f32 %v4719_v8, %v5368_v61 }
 0x233   : > { %v862_v27 = vpop.xlane.xlu0 %861  ;;  %4730 = vrsqrt.f32 %v893_v33  ;;  %v879_v45 = vmul.f32 0.03125, %v859_v34  ;;  %4599 = vmatpush3.bf16.msra.mxu1 %v5489_v20  ;;  %4327 = vmatprep.mubr.msk.f32.mxu1 %vm525_vm3, %v976_v21  ;;  %v920_v47 = vmul.f32 %v4721_v31, %v5371_v15  ;;  %v962_v52 = vadd.f32 %v5590_v48, %v940_v42 }
 0x234   : > { %v880_v7 = vmul.f32 0.03125, %v862_v27  ;;  %4732 = vrsqrt.f32 %v894_v19  ;;  %v977_v49 = vmax.f32 %v961_v39, 0.0  ;;  %v941_v53 = vmul.f32 %v5586_v60, %v919_v36  ;;  %4601 = vmatprep.subr.bf16.mxu1 %v4600_v63 }
 0x235   : > { %v4723_v55 = vpop.eup %4722  ;;  %v895_v58 = vadd.f32 1e-05, %v879_v45  ;;  %v942_v61 = vmul.f32 %v5586_v60, %v920_v47  ;;  %v978_v3 = vmax.f32 %v962_v52, 0.0 }
 0x236   : > { %v896_v56 = vadd.f32 1e-05, %v880_v7  ;;  %v4725_v22 = vpop.eup %4724  ;;  %v865_v59 = vpop.xlane.xlu1 %864  ;;  %4328 = vmatmul.mubr.msk.f32.gmra.mrb[10].mxu1 %vm525_vm3, %v977_v49  ;;  %v963_v15 = vadd.f32 %v5590_v48, %v941_v53  ;;  %v921_v30 = vmul.f32 %v4723_v55, %v5380_v2 }
 0x237   : > { %v1728_v20 = vpop.xlane.xlu0 %1727  ;;  %4734 = vrsqrt.f32 %v895_v58  ;;  %v881_v0 = vmul.f32 0.03125, %v865_v59  ;;  %v964_v16 = vadd.f32 %v5590_v48, %v942_v61  ;;  %4603 = vmatpush3.bf16.msra.mxu1 %v4600_v63  ;;  %4330 = vmatprep.mubr.msk.f32.mxu1 %vm525_vm3, %v978_v3  ;;  %v922_v23 = vmul.f32 %v4725_v22, %v5383_v25 }
 0x238   : > { %v1774_v18 = vmul.f32 0.03125, %v1728_v20  ;;  %4736 = vrsqrt.f32 %v896_v56  ;;  %v979_v38 = vmax.f32 %v963_v15, 0.0  ;;  %v943_v17 = vmul.f32 %v5586_v60, %v921_v30 }
 0x239   : > { %v4727_v40 = vpop.eup %4726  ;;  %v897_v44 = vadd.f32 1e-05, %v881_v0  ;;  %v980_v9 = vmax.f32 %v964_v16, 0.0  ;;  %v944_v63 = vmul.f32 %v5586_v60, %v922_v23 }
 0x23a   : > { %v1790_v41 = vadd.f32 1e-05, %v1774_v18  ;;  %v4729_v8 = vpop.eup %4728  ;;  %v1731_v2 = vpop.xlane.xlu1 %1730  ;;  %4331 = vmatmul.mubr.msk.f32.gmra.mrb[12].mxu1 %vm525_vm3, %v979_v38  ;;  %v965_v19 = vadd.f32 %v5590_v48, %v943_v17  ;;  %v923_v21 = vmul.f32 %v4727_v40, %v5392_v5 }
 0x23b   : > { %v1734_v33 = vpop.xlane.xlu0 %1733  ;;  %4738 = vrsqrt.f32 %v897_v44  ;;  %v1775_v31 = vmul.f32 0.03125, %v1731_v2  ;;  %4333 = vmatprep.mubr.msk.f32.mxu1 %vm525_vm3, %v980_v9  ;;  %v924_v25 = vmul.f32 %v4729_v8, %v5395_v26  ;;  %v966_v39 = vadd.f32 %v5590_v48, %v944_v63 }
 0x23c   : > { %v1776_v34 = vmul.f32 0.03125, %v1734_v33  ;;  %4740 = vrsqrt.f32 %v1790_v41  ;;  %v981_v27 = vmax.f32 %v965_v19, 0.0  ;;  %v945_v42 = vmul.f32 %v5586_v60, %v923_v21 }
 0x23d   : > { %v4731_v36 = vpop.eup %4730  ;;  %v1791_v45 = vadd.f32 1e-05, %v1775_v31  ;;  %v946_v47 = vmul.f32 %v5586_v60, %v924_v25  ;;  %v982_v53 = vmax.f32 %v966_v39, 0.0 }
 0x23e   : > { %v1792_v7 = vadd.f32 1e-05, %v1776_v34  ;;  %v4733_v49 = vpop.eup %4732  ;;  %v1737_v5 = vpop.xlane.xlu1 %1736  ;;  %4334 = vmatmul.mubr.msk.f32.gmra.mrb[14].mxu1 %vm525_vm3, %v981_v27  ;;  %v967_v55 = vadd.f32 %v5590_v48, %v945_v42  ;;  %v925_v26 = vmul.f32 %v4731_v36, %v5404_v29  ;;  %v5652_v27 = vld [vmem:[%s5578_s22 + $0x2] ss:$0 sm:$0xff] }
 0x23f   : > { %v1740_v52 = vpop.xlane.xlu0 %1739  ;;  %4742 = vrsqrt.f32 %v1791_v45  ;;  %v1777_v58 = vmul.f32 0.03125, %v1737_v5  ;;  %v968_v61 = vadd.f32 %v5590_v48, %v946_v47  ;;  %4336 = vmatprep.mubr.msk.f32.mxu1 %vm525_vm3, %v982_v53  ;;  %v926_v20 = vmul.f32 %v4733_v49, %v5407_v35  ;;  %v5656_v45 = vld [vmem:[%s5583_s25 + $0x2] ss:$0 sm:$0xff] }
 0x240   : > { %v1778_v56 = vmul.f32 0.03125, %v1740_v52  ;;  %4744 = vrsqrt.f32 %v1792_v7  ;;  %v983_v22 = vmax.f32 %v967_v55, 0.0  ;;  %v947_v59 = vmul.f32 %v5586_v60, %v925_v26 }
 0x241   : > { %v4735_v3 = vpop.eup %4734  ;;  %v1793_v15 = vadd.f32 1e-05, %v1777_v58  ;;  %v984_v0 = vmax.f32 %v968_v61, 0.0  ;;  %v948_v17 = vmul.f32 %v5586_v60, %v926_v20 }
 0x242   : > { %v1794_v30 = vadd.f32 1e-05, %v1778_v56  ;;  %v4737_v18 = vpop.eup %4736  ;;  %v1743_v16 = vpop.xlane.xlu1 %1742  ;;  %4337 = vmatmul.mubr.msk.f32.gmra.mrb[16].mxu1 %vm525_vm3, %v983_v22  ;;  %v969_v38 = vadd.f32 %v5590_v48, %v947_v59  ;;  %v927_v23 = vmul.f32 %v4735_v3, %v5416_v11 }
 0x243   : > { %v1746_v29 = vpop.xlane.xlu0 %1745  ;;  %4746 = vrsqrt.f32 %v1793_v15  ;;  %v1779_v40 = vmul.f32 0.03125, %v1743_v16  ;;  %4339 = vmatprep.mubr.msk.f32.mxu1 %vm525_vm3, %v984_v0  ;;  %v928_v35 = vmul.f32 %v4737_v18, %v5419_v43  ;;  %v970_v9 = vadd.f32 %v5590_v48, %v948_v17 }
 0x244   : > { %v1780_v44 = vmul.f32 0.03125, %v1746_v29  ;;  %4748 = vrsqrt.f32 %v1794_v30  ;;  %v985_v41 = vmax.f32 %v969_v38, 0.0  ;;  %v949_v8 = vmul.f32 %v5586_v60, %v927_v23 }
 0x245   : > { %v4739_v2 = vpop.eup %4738  ;;  %v1795_v33 = vadd.f32 1e-05, %v1779_v40  ;;  %v950_v11 = vmul.f32 %v5586_v60, %v928_v35  ;;  %v986_v34 = vmax.f32 %v970_v9, 0.0 }
 0x246   : > { %v1796_v19 = vadd.f32 1e-05, %v1780_v44  ;;  %v4741_v63 = vpop.eup %4740  ;;  %v1749_v21 = vpop.xlane.xlu1 %1748  ;;  %4340 = vmatmul.mubr.msk.f32.gmra.mrb[18].mxu1 %vm525_vm3, %v985_v41  ;;  %v971_v43 = vadd.f32 %v5590_v48, %v949_v8  ;;  %v929_v25 = vmul.f32 %v4739_v2, %v5428_v32 }
 0x247   : > { %v1752_v31 = vpop.xlane.xlu0 %1751  ;;  %4750 = vrsqrt.f32 %v1795_v33  ;;  %v1781_v39 = vmul.f32 0.03125, %v1749_v21  ;;  %v972_v36 = vadd.f32 %v5590_v48, %v950_v11  ;;  %4342 = vmatprep.mubr.msk.f32.mxu1 %vm525_vm3, %v986_v34  ;;  %v1822_v49 = vmul.f32 %v4741_v63, %v5431_v54 }
 0x248   : > { %v1782_v42 = vmul.f32 0.03125, %v1752_v31  ;;  %4752 = vrsqrt.f32 %v1796_v19  ;;  %v987_v7 = vmax.f32 %v971_v43, 0.0  ;;  %v951_v47 = vmul.f32 %v5586_v60, %v929_v25 }
 0x249   : > { %v4743_v5 = vpop.eup %4742  ;;  %v1797_v52 = vadd.f32 1e-05, %v1781_v39  ;;  %v988_v53 = vmax.f32 %v972_v36, 0.0  ;;  %v1844_v22 = vmul.f32 %v5652_v27, %v1822_v49 }
 0x24a   : > { %v1798_v32 = vadd.f32 1e-05, %v1782_v42  ;;  %v4745_v55 = vpop.eup %4744  ;;  %v1823_v26 = vmul.f32 %v4743_v5, %v5440_v4  ;;  %v1755_v58 = vpop.xlane.xlu1 %1754  ;;  %4343 = vmatmul.mubr.msk.f32.gmra.mrb[20].mxu1 %vm525_vm3, %v987_v7  ;;  %v973_v61 = vadd.f32 %v5590_v48, %v951_v47 }
 0x24b   : > { %v1758_v56 = vpop.xlane.xlu0 %1757  ;;  %4754 = vrsqrt.f32 %v1797_v52  ;;  %v1783_v59 = vmul.f32 0.03125, %v1755_v58  ;;  %4345 = vmatprep.mubr.msk.f32.mxu1 %vm525_vm3, %v988_v53  ;;  %v1824_v54 = vmul.f32 %v4745_v55, %v5443_v13  ;;  %v1866_v4 = vadd.f32 %v5656_v45, %v1844_v22 }
 0x24c   : > { %v1784_v60 = vmul.f32 0.03125, %v1758_v56  ;;  %v1845_v20 = vmul.f32 %v5652_v27, %v1823_v26  ;;  %4756 = vrsqrt.f32 %v1798_v32  ;;  %v989_v3 = vmax.f32 %v973_v61, 0.0 }
 0x24d   : > { %v4747_v15 = vpop.eup %4746  ;;  %v1799_v30 = vadd.f32 1e-05, %v1783_v59  ;;  %v1846_v48 = vmul.f32 %v5652_v27, %v1824_v54  ;;  %v1882_v17 = vmax.f32 %v1866_v4, 0.0 }
 0x24e   : > { %v1800_v0 = vadd.f32 1e-05, %v1784_v60  ;;  %v4749_v18 = vpop.eup %4748  ;;  %v1867_v16 = vadd.f32 %v5656_v45, %v1845_v20  ;;  %v1761_v29 = vpop.xlane.xlu1 %1760  ;;  %4346 = vmatmul.mubr.msk.f32.gmra.mrb[22].mxu1 %vm525_vm3, %v989_v3  ;;  %v1825_v13 = vmul.f32 %v4747_v15, %v5454_v50 }
 0x24f   : > { %v1764_v38 = vpop.xlane.xlu0 %1763  ;;  %4758 = vrsqrt.f32 %v1799_v30  ;;  %v1785_v23 = vmul.f32 0.03125, %v1761_v29  ;;  %v1868_v44 = vadd.f32 %v5656_v45, %v1846_v48  ;;  %4388 = vmatprep.mubr.msk.f32.mxu1 %vm525_vm3, %v1882_v17  ;;  %v1826_v9 = vmul.f32 %v4749_v18, %v5457_v57 }
 0x250   : > { %v1786_v40 = vmul.f32 0.03125, %v1764_v38  ;;  %v1883_v35 = vmax.f32 %v1867_v16, 0.0  ;;  %4760 = vrsqrt.f32 %v1800_v0  ;;  %v1847_v41 = vmul.f32 %v5652_v27, %v1825_v13 }
 0x251   : > { %v4751_v8 = vpop.eup %4750  ;;  %v1801_v2 = vadd.f32 1e-05, %v1785_v23  ;;  %v1884_v19 = vmax.f32 %v1868_v44, 0.0  ;;  %v1848_v31 = vmul.f32 %v5652_v27, %v1826_v9 }
 0x252   : > { %v1802_v33 = vadd.f32 1e-05, %v1786_v40  ;;  %v4753_v11 = vpop.eup %4752  ;;  %v1767_v63 = vpop.xlane.xlu1 %1766  ;;  %4389 = vmatmul.mubr.msk.f32.vlgmr.msra.gmra.mrb[24].mxu1 %vm525_vm3, %v1883_v35  ;;  %v1869_v21 = vadd.f32 %v5656_v45, %v1847_v41  ;;  %v1827_v34 = vmul.f32 %v4751_v8, %v5468_v37 }
 0x253   : > { %v1770_v50 = vpop.xlane.xlu0 %1769  ;;  %4762 = vrsqrt.f32 %v1801_v2  ;;  %v1787_v43 = vmul.f32 0.03125, %v1767_v63  ;;  %4391 = vmatprep.mubr.msk.f32.mxu1 %vm525_vm3, %v1884_v19  ;;  %v1828_v57 = vmul.f32 %v4753_v11, %v5471_v62  ;;  %v1870_v42 = vadd.f32 %v5656_v45, %v1848_v31 }
 0x254   : > { %v1788_v25 = vmul.f32 0.03125, %v1770_v50  ;;  %4764 = vrsqrt.f32 %v1802_v33  ;;  %v1885_v39 = vmax.f32 %v1869_v21, 0.0  ;;  %v1849_v36 = vmul.f32 %v5652_v27, %v1827_v34 }
 0x255   : > { %v4755_v7 = vpop.eup %4754  ;;  %v1803_v47 = vadd.f32 1e-05, %v1787_v43  ;;  %v1850_v5 = vmul.f32 %v5652_v27, %v1828_v57  ;;  %v1886_v32 = vmax.f32 %v1870_v42, 0.0  ;;  %v4002_v57 = vld [vmem:[%s5040_s14 + $0xb0] sm:$0xff]  ;;  %v4003_v42 = vld [vmem:[%s5040_s14 + $0xb8] sm:$0xff] }
 0x256   : > { %v1804_v49 = vadd.f32 1e-05, %v1788_v25  ;;  %v4757_v52 = vpop.eup %4756  ;;  %v1773_v37 = vpop.xlane.xlu1 %1772  ;;  %4392 = vmatmul.mubr.msk.f32.gmra.mrb[26].mxu1 %vm525_vm3, %v1885_v39  ;;  %v1871_v53 = vadd.f32 %v5656_v45, %v1849_v36  ;;  %v1829_v62 = vmul.f32 %v4755_v7, %v5480_v46  ;;  %v4000_v25 = vld [vmem:[%s5040_s14 + $0xa0] sm:$0xff]  ;;  %v4616_v36 = vpack.c.bf16 %v4003_v42, %v4002_v57 }
 0x257   : > { %4766 = vrsqrt.f32 %v1803_v47  ;;  %v1789_v55 = vmul.f32 0.03125, %v1773_v37  ;;  %v1872_v26 = vadd.f32 %v5656_v45, %v1850_v5  ;;  %v1830_v58 = vmul.f32 %v4757_v52, %v5483_v6  ;;  %4394 = vmatprep.mubr.msk.f32.mxu1 %vm525_vm3, %v1886_v32  ;;  %v3983_v7 = vld [vmem:[%s5171_s18 + $0x4] ss:$0 sm:$0xff] }
 0x258   : > { %4768 = vrsqrt.f32 %v1804_v49  ;;  %v1887_v56 = vmax.f32 %v1871_v53, 0.0  ;;  %v1851_v61 = vmul.f32 %v5652_v27, %v1829_v62 }
 0x259   : > { %v4759_v22 = vpop.eup %4758  ;;  %v1805_v59 = vadd.f32 1e-05, %v1789_v55  ;;  %v1888_v60 = vmax.f32 %v1872_v26, 0.0  ;;  %v1852_v54 = vmul.f32 %v5652_v27, %v1830_v58 }
 0x25a   : > { %v4761_v20 = vpop.eup %4760  ;;  %4395 = vmatmul.mubr.msk.f32.gmra.mrb[28].mxu1 %vm525_vm3, %v1887_v56  ;;  %v1873_v46 = vadd.f32 %v5656_v45, %v1851_v61  ;;  %v1831_v3 = vmul.f32 %v4759_v22, %v5497_v14 }
 0x25b   : > { %4770 = vrsqrt.f32 %v1805_v59  ;;  %4397 = vmatprep.mubr.msk.f32.mxu1 %vm525_vm3, %v1888_v60  ;;  %v1874_v6 = vadd.f32 %v5656_v45, %v1852_v54  ;;  %v1832_v4 = vmul.f32 %v4761_v20, %v5500_v12 }
 0x25c   : > { %v1889_v15 = vmax.f32 %v1873_v46, 0.0  ;;  %v1853_v30 = vmul.f32 %v5652_v27, %v1831_v3 }
 0x25d   : > { %v4763_v0 = vpop.eup %4762  ;;  %v1890_v48 = vmax.f32 %v1874_v6, 0.0  ;;  %v1854_v18 = vmul.f32 %v5652_v27, %v1832_v4 }
 0x25e   : > { %v4765_v16 = vpop.eup %4764  ;;  %4398 = vmatmul.mubr.msk.f32.gmra.mrb[30].mxu1 %vm525_vm3, %v1889_v15  ;;  %v1875_v29 = vadd.f32 %v5656_v45, %v1853_v30  ;;  %v1833_v14 = vmul.f32 %v4763_v0, %v5509_v24 }
 0x25f   : > { %4400 = vmatprep.mubr.msk.f32.mxu1 %vm525_vm3, %v1890_v48  ;;  %v1876_v38 = vadd.f32 %v5656_v45, %v1854_v18  ;;  %v1834_v12 = vmul.f32 %v4765_v16, %v5512_v51 }
 0x260   : > { %v1891_v17 = vmax.f32 %v1875_v29, 0.0  ;;  %v1855_v13 = vmul.f32 %v5652_v27, %v1833_v14 }
 0x261   : > { %v4767_v23 = vpop.eup %4766  ;;  %v1892_v40 = vmax.f32 %v1876_v38, 0.0  ;;  %v1856_v44 = vmul.f32 %v5652_v27, %v1834_v12 }
 0x262   : > { %v4769_v35 = vpop.eup %4768  ;;  %4401 = vmatmul.mubr.msk.f32.gmra.mrb[32].mxu1 %vm525_vm3, %v1891_v17  ;;  %v1877_v41 = vadd.f32 %v5656_v45, %v1855_v13  ;;  %v1835_v24 = vmul.f32 %v4767_v23, %v5521_v28 }
 0x263   : > { %4403 = vmatprep.mubr.msk.f32.mxu1 %vm525_vm3, %v1892_v40  ;;  %v1878_v9 = vadd.f32 %v5656_v45, %v1856_v44  ;;  %v1836_v51 = vmul.f32 %v4769_v35, %v5524_v1 }
 0x264   : > { %v1893_v8 = vmax.f32 %v1877_v41, 0.0  ;;  %v1857_v2 = vmul.f32 %v5652_v27, %v1835_v24 }
 0x265   : > { %v4771_v33 = vpop.eup %4770  ;;  %v1894_v19 = vmax.f32 %v1878_v9, 0.0  ;;  %v1858_v11 = vmul.f32 %v5652_v27, %v1836_v51 }
 0x266   : > { %4404 = vmatmul.mubr.msk.f32.gmra.mrb[34].mxu1 %vm525_vm3, %v1893_v8  ;;  %v1879_v28 = vadd.f32 %v5656_v45, %v1857_v2  ;;  %v1837_v63 = vmul.f32 %v4771_v33, %v5533_v10  ;;  %v4001_v10 = vld [vmem:[%s5040_s14 + $0xa8] sm:$0xff]  ;;  %s4699_s14 = smul.u32 3, %s6525_s28 }
 0x267   : > { %4406 = vmatprep.mubr.msk.f32.mxu1 %vm525_vm3, %v1894_v19  ;;  %v1880_v1 = vadd.f32 %v5656_v45, %v1858_v11  ;;  %v4612_v39 = vpack.c.bf16 %v4001_v10, %v4000_v25  ;;  %v3905_v11 = vld [vmem:[%s5171_s18 + $0x1] ss:$0 sm:$0xff] }
 0x268   : > { %v1895_v50 = vmax.f32 %v1879_v28, 0.0  ;;  %v1859_v21 = vmul.f32 %v5652_v27, %v1837_v63  ;;  %s6392_s17 = scalar_lea.vmem %s6522_s7, %s4699_s14 }
 0x269   : > { %v1896_v31 = vmax.f32 %v1880_v1, 0.0  ;;  %4613 = vmatprep.subr.bf16.mxu1 %v4612_v39 }
 0x26a   : > { %4407 = vmatmul.mubr.msk.f32.gmra.mrb[36].mxu1 %vm525_vm3, %v1895_v50  ;;  %v1881_v34 = vadd.f32 %v5656_v45, %v1859_v21 }
 0x26b   : > { %4409 = vmatprep.mubr.msk.f32.mxu1 %vm525_vm3, %v1896_v31  ;;  %4615 = vmatpush3.bf16.msra.mxu1 %v4612_v39 }
 0x26c   : > { %v1897_v43 = vmax.f32 %v1881_v34, 0.0  ;;  %4617 = vmatprep.subr.bf16.mxu1 %v4616_v36 }
 0x26e   : > { %4410 = vmatmul.mubr.msk.f32.gmra.mrb[38].mxu1 %vm525_vm3, %v1897_v43 }
 0x26f   : > { %4619 = vmatpush3.bf16.msra.mxu1 %v4616_v36 }
 0x29e   : > { %v4422_v27 = vpop.f32.mrb[24].mxu0 }
 0x29f   : > { %v2461_v47 = vadd.f32 %v4422_v27, %v3983_v7  ;;  %v2455_v49 = vpop.f32.mrb[25].mxu0 }
 0x2a0   : > { %v2456_v45 = vadd.f32 %v3983_v7, %v2455_v49 }
 0x2a1   : > { %v2535_v5 = vmax.f32 %v2461_v47, 0.0 }
 0x2a2   : > { %v2534_v52 = vmax.f32 %v2456_v45, 0.0  ;;  %v4425_v37 = vpop.f32.mrb[26].mxu0 }
 0x2a3   : > { %v2471_v32 = vadd.f32 %v4425_v37, %v3983_v7  ;;  %v2465_v53 = vpop.f32.mrb[27].mxu0 }
 0x2a4   : > { %v2466_v62 = vadd.f32 %v3983_v7, %v2465_v53  ;;  %4452 = vmatprep.mubr.msk.f32.mxu1 %vm525_vm3, %v2534_v52 }
 0x2a5   : > { %v2537_v55 = vmax.f32 %v2471_v32, 0.0  ;;  %4453 = vmatmul.mubr.msk.f32.vlgmr.msra.gmra.mrb[40].mxu1 %vm525_vm3, %v2535_v5 }
 0x2a6   : > { %v2536_v26 = vmax.f32 %v2466_v62, 0.0  ;;  %v4428_v58 = vpop.f32.mrb[28].mxu0 }
 0x2a7   : > { %v2481_v56 = vadd.f32 %v4428_v58, %v3983_v7  ;;  %v2475_v61 = vpop.f32.mrb[29].mxu0 }
 0x2a8   : > { %v2476_v22 = vadd.f32 %v3983_v7, %v2475_v61  ;;  %4455 = vmatprep.mubr.msk.f32.mxu1 %vm525_vm3, %v2536_v26 }
 0x2a9   : > { %v2539_v59 = vmax.f32 %v2481_v56, 0.0  ;;  %4456 = vmatmul.mubr.msk.f32.gmra.mrb[42].mxu1 %vm525_vm3, %v2537_v55 }
 0x2aa   : > { %v2538_v60 = vmax.f32 %v2476_v22, 0.0  ;;  %v4431_v54 = vpop.f32.mrb[30].mxu0 }
 0x2ab   : > { %v2491_v20 = vadd.f32 %v4431_v54, %v3983_v7  ;;  %v2485_v46 = vpop.f32.mrb[31].mxu0 }
 0x2ac   : > { %v2486_v3 = vadd.f32 %v3983_v7, %v2485_v46  ;;  %4458 = vmatprep.mubr.msk.f32.mxu1 %vm525_vm3, %v2538_v60 }
 0x2ad   : > { %v2541_v6 = vmax.f32 %v2491_v20, 0.0  ;;  %4459 = vmatmul.mubr.msk.f32.gmra.mrb[44].mxu1 %vm525_vm3, %v2539_v59 }
 0x2ae   : > { %v2540_v4 = vmax.f32 %v2486_v3, 0.0  ;;  %v4434_v15 = vpop.f32.mrb[32].mxu0 }
 0x2af   : > { %v2501_v30 = vadd.f32 %v4434_v15, %v3983_v7  ;;  %v2495_v0 = vpop.f32.mrb[33].mxu0 }
 0x2b0   : > { %v2496_v48 = vadd.f32 %v3983_v7, %v2495_v0  ;;  %4461 = vmatprep.mubr.msk.f32.mxu1 %vm525_vm3, %v2540_v4 }
 0x2b1   : > { %v2543_v18 = vmax.f32 %v2501_v30, 0.0  ;;  %4462 = vmatmul.mubr.msk.f32.gmra.mrb[46].mxu1 %vm525_vm3, %v2541_v6 }
 0x2b2   : > { %v2542_v16 = vmax.f32 %v2496_v48, 0.0  ;;  %v4437_v29 = vpop.f32.mrb[34].mxu0 }
 0x2b3   : > { %v2511_v14 = vadd.f32 %v4437_v29, %v3983_v7  ;;  %v2505_v38 = vpop.f32.mrb[35].mxu0 }
 0x2b4   : > { %v2506_v12 = vadd.f32 %v3983_v7, %v2505_v38  ;;  %4464 = vmatprep.mubr.msk.f32.mxu1 %vm525_vm3, %v2542_v16 }
 0x2b5   : > { %v2545_v17 = vmax.f32 %v2511_v14, 0.0  ;;  %4465 = vmatmul.mubr.msk.f32.gmra.mrb[48].mxu1 %vm525_vm3, %v2543_v18  ;;  %v5811_v14 = vld [vmem:[%s5171_s18 + $0x3] ss:$0 sm:$0xff] }
 0x2b6   : > { %v2544_v13 = vmax.f32 %v2506_v12, 0.0  ;;  %v4440_v23 = vpop.f32.mrb[36].mxu0 }
 0x2b7   : > { %v2521_v40 = vadd.f32 %v4440_v23, %v3983_v7  ;;  %v2515_v44 = vpop.f32.mrb[37].mxu0 }
 0x2b8   : > { %v2516_v35 = vadd.f32 %v3983_v7, %v2515_v44  ;;  %4467 = vmatprep.mubr.msk.f32.mxu1 %vm525_vm3, %v2544_v13 }
 0x2b9   : > { %v2547_v41 = vmax.f32 %v2521_v40, 0.0  ;;  %4468 = vmatmul.mubr.msk.f32.gmra.mrb[50].mxu1 %vm525_vm3, %v2545_v17 }
 0x2ba   : > { %v2546_v24 = vmax.f32 %v2516_v35, 0.0  ;;  %v4443_v9 = vpop.f32.mrb[38].mxu0 }
 0x2bb   : > { %v2531_v51 = vadd.f32 %v4443_v9, %v3983_v7  ;;  %v2525_v8 = vpop.f32.mrb[39].mxu0 }
 0x2bc   : > { %v2526_v2 = vadd.f32 %v3983_v7, %v2525_v8  ;;  %4470 = vmatprep.mubr.msk.f32.mxu1 %vm525_vm3, %v2546_v24 }
 0x2bd   : > { %v2549_v33 = vmax.f32 %v2531_v51, 0.0  ;;  %4471 = vmatmul.mubr.msk.f32.gmra.mrb[52].mxu1 %vm525_vm3, %v2547_v41 }
 0x2be   : > { %v2548_v19 = vmax.f32 %v2526_v2, 0.0 }
 0x2c0   : > { %4473 = vmatprep.mubr.msk.f32.mxu1 %vm525_vm3, %v2548_v19 }
 0x2c1   : > { %4474 = vmatmul.mubr.msk.f32.gmra.mrb[54].mxu1 %vm525_vm3, %v2549_v33 }
 0x305   : > { %v4326_v28 = vpop.f32.mrb[8].mxu1 }
 0x306   : > { %v5750_v63 = vadd.f32 %v4326_v28, %v3905_v11  ;;  %v1117_v1 = vpop.f32.mrb[9].mxu1 }
 0x307   : > { %v5752_v50 = vadd.f32 %v3905_v11, %v1117_v1 }
 0x308   : > { %v1203_v21 = vsel %vm525_vm3, %v5750_v63, 0.0 }
 0x309   : > { %1204 = vadd.xlane.f32.xlu1 %v1203_v21  ;;  %v4329_v31 = vpop.f32.mrb[10].mxu1  ;;  %v1200_v34 = vsel %vm525_vm3, %v5752_v50, 0.0 }
 0x30a   : > { %v5758_v43 = vadd.f32 %v4329_v31, %v3905_v11  ;;  %1201 = vadd.xlane.f32.xlu0 %v1200_v34  ;;  %v1127_v25 = vpop.f32.mrb[11].mxu1 }
 0x30b   : > { %v5760_v10 = vadd.f32 %v3905_v11, %v1127_v25 }
 0x30c   : > { %v1209_v57 = vsel %vm525_vm3, %v5758_v43, 0.0 }
 0x30d   : > { %1210 = vadd.xlane.f32.xlu1 %v1209_v57  ;;  %v4332_v39 = vpop.f32.mrb[12].mxu1  ;;  %v1206_v42 = vsel %vm525_vm3, %v5760_v10, 0.0 }
 0x30e   : > { %v5766_v36 = vadd.f32 %v4332_v39, %v3905_v11  ;;  %1207 = vadd.xlane.f32.xlu0 %v1206_v42  ;;  %v1137_v7 = vpop.f32.mrb[13].mxu1 }
 0x30f   : > { %v5768_v27 = vadd.f32 %v3905_v11, %v1137_v7 }
 0x310   : > { %v1215_v47 = vsel %vm525_vm3, %v5766_v36, 0.0 }
 0x311   : > { %1216 = vadd.xlane.f32.xlu1 %v1215_v47  ;;  %v4335_v49 = vpop.f32.mrb[14].mxu1  ;;  %v1212_v45 = vsel %vm525_vm3, %v5768_v27, 0.0 }
 0x312   : > { %v5774_v5 = vadd.f32 %v4335_v49, %v3905_v11  ;;  %1213 = vadd.xlane.f32.xlu0 %v1212_v45  ;;  %v1147_v52 = vpop.f32.mrb[15].mxu1 }
 0x313   : > { %v5776_v37 = vadd.f32 %v3905_v11, %v1147_v52 }
 0x314   : > { %v1221_v32 = vsel %vm525_vm3, %v5774_v5, 0.0 }
 0x315   : > { %1222 = vadd.xlane.f32.xlu1 %v1221_v32  ;;  %v4338_v53 = vpop.f32.mrb[16].mxu1  ;;  %v1218_v62 = vsel %vm525_vm3, %v5776_v37, 0.0 }
 0x316   : > { %v5782_v55 = vadd.f32 %v4338_v53, %v3905_v11  ;;  %1219 = vadd.xlane.f32.xlu0 %v1218_v62  ;;  %v1157_v26 = vpop.f32.mrb[17].mxu1 }
 0x317   : > { %v5784_v58 = vadd.f32 %v3905_v11, %v1157_v26 }
 0x318   : > { %v1227_v56 = vsel %vm525_vm3, %v5782_v55, 0.0 }
 0x319   : > { %1228 = vadd.xlane.f32.xlu1 %v1227_v56  ;;  %v4341_v61 = vpop.f32.mrb[18].mxu1  ;;  %v1224_v22 = vsel %vm525_vm3, %v5784_v58, 0.0 }
 0x31a   : > { %v5790_v59 = vadd.f32 %v4341_v61, %v3905_v11  ;;  %1225 = vadd.xlane.f32.xlu0 %v1224_v22  ;;  %v1167_v60 = vpop.f32.mrb[19].mxu1 }
 0x31b   : > { %v5792_v54 = vadd.f32 %v3905_v11, %v1167_v60 }
 0x31c   : > { %v1233_v20 = vsel %vm525_vm3, %v5790_v59, 0.0 }
 0x31d   : > { %1234 = vadd.xlane.f32.xlu1 %v1233_v20  ;;  %v4344_v46 = vpop.f32.mrb[20].mxu1  ;;  %v1230_v3 = vsel %vm525_vm3, %v5792_v54, 0.0 }
 0x31e   : > { %v5798_v6 = vadd.f32 %v4344_v46, %v3905_v11  ;;  %1231 = vadd.xlane.f32.xlu0 %v1230_v3  ;;  %v1177_v4 = vpop.f32.mrb[21].mxu1 }
 0x31f   : > { %v5800_v15 = vadd.f32 %v3905_v11, %v1177_v4 }
 0x320   : > { %v1239_v30 = vsel %vm525_vm3, %v5798_v6, 0.0 }
 0x321   : > { %1240 = vadd.xlane.f32.xlu1 %v1239_v30  ;;  %v4347_v0 = vpop.f32.mrb[22].mxu1  ;;  %v1236_v48 = vsel %vm525_vm3, %v5800_v15, 0.0 }
 0x322   : > { %v5806_v18 = vadd.f32 %v4347_v0, %v3905_v11  ;;  %1237 = vadd.xlane.f32.xlu0 %v1236_v48  ;;  %v1187_v16 = vpop.f32.mrb[23].mxu1 }
 0x323   : > { %v5808_v29 = vadd.f32 %v3905_v11, %v1187_v16 }
 0x324   : > { %v1245_v38 = vsel %vm525_vm3, %v5806_v18, 0.0 }
 0x325   : > { %1246 = vadd.xlane.f32.xlu1 %v1245_v38  ;;  %v4390_v12 = vpop.f32.mrb[24].mxu1  ;;  %v1242_v17 = vsel %vm525_vm3, %v5808_v29, 0.0 }
 0x326   : > { %v5818_v13 = vadd.f32 %v4390_v12, %v5811_v14  ;;  %1243 = vadd.xlane.f32.xlu0 %v1242_v17  ;;  %v2025_v23 = vpop.f32.mrb[25].mxu1 }
 0x327   : > { %v5821_v40 = vadd.f32 %v5811_v14, %v2025_v23  ;;  %v2773_v23 = vld [vmem:[%s5901_s10 + $0x8] sm:$0xff] }
 0x328   : > { %v2111_v44 = vsel %vm525_vm3, %v5818_v13, 0.0 }
 0x329   : > { %2112 = vadd.xlane.f32.xlu1 %v2111_v44  ;;  %v4393_v35 = vpop.f32.mrb[26].mxu1  ;;  %v2108_v41 = vsel %vm525_vm3, %v5821_v40, 0.0  ;;  %v4061_v44 = vld [vmem:[%s5901_s10 + $0x40] sm:$0xff] }
 0x32a   : > { %v5828_v24 = vadd.f32 %v4393_v35, %v5811_v14  ;;  %2109 = vadd.xlane.f32.xlu0 %v2108_v41  ;;  %v2035_v9 = vpop.f32.mrb[27].mxu1  ;;  %v4062_v41 = vld [vmem:[%s5901_s10 + $0x48] sm:$0xff] }
 0x32b   : > { %v5831_v51 = vadd.f32 %v5811_v14, %v2035_v9  ;;  %v4636_v9 = vpack.c.bf16 %v4062_v41, %v4061_v44 }
 0x32c   : > { %v2117_v8 = vsel %vm525_vm3, %v5828_v24, 0.0 }
 0x32d   : > { %2118 = vadd.xlane.f32.xlu1 %v2117_v8  ;;  %v4396_v2 = vpop.f32.mrb[28].mxu1  ;;  %v2114_v33 = vsel %vm525_vm3, %v5831_v51, 0.0  ;;  %4637 = vmatprep.subr.bf16.mxu1 %v4636_v9 }
 0x32e   : > { %v5838_v19 = vadd.f32 %v4396_v2, %v5811_v14  ;;  %2115 = vadd.xlane.f32.xlu0 %v2114_v33  ;;  %v2045_v11 = vpop.f32.mrb[29].mxu1  ;;  %4639 = vmatpush3.bf16.msra.mxu1 %v4636_v9 }
 0x32f   : > { %v5841_v28 = vadd.f32 %v5811_v14, %v2045_v11 }
 0x330   : > { %v2123_v1 = vsel %vm525_vm3, %v5838_v19, 0.0 }
 0x331   : > { %2124 = vadd.xlane.f32.xlu1 %v2123_v1  ;;  %v4399_v21 = vpop.f32.mrb[30].mxu1  ;;  %v2120_v31 = vsel %vm525_vm3, %v5841_v28, 0.0 }
 0x332   : > { %v5848_v34 = vadd.f32 %v4399_v21, %v5811_v14  ;;  %2121 = vadd.xlane.f32.xlu0 %v2120_v31  ;;  %v2055_v25 = vpop.f32.mrb[31].mxu1 }
 0x333   : > { %v5851_v57 = vadd.f32 %v5811_v14, %v2055_v25 }
 0x334   : > { %v2129_v39 = vsel %vm525_vm3, %v5848_v34, 0.0 }
 0x335   : > { %2130 = vadd.xlane.f32.xlu1 %v2129_v39  ;;  %v4402_v42 = vpop.f32.mrb[32].mxu1  ;;  %v2126_v7 = vsel %vm525_vm3, %v5851_v57, 0.0 }
 0x336   : > { %v5858_v47 = vadd.f32 %v4402_v42, %v5811_v14  ;;  %2127 = vadd.xlane.f32.xlu0 %v2126_v7  ;;  %v2065_v49 = vpop.f32.mrb[33].mxu1 }
 0x337   : > { %v5861_v45 = vadd.f32 %v5811_v14, %v2065_v49 }
 0x338   : > { %v2135_v52 = vsel %vm525_vm3, %v5858_v47, 0.0 }
 0x339   : > { %2136 = vadd.xlane.f32.xlu1 %v2135_v52  ;;  %v4405_v32 = vpop.f32.mrb[34].mxu1  ;;  %v2132_v53 = vsel %vm525_vm3, %v5861_v45, 0.0 }
 0x33a   : > { %v5868_v62 = vadd.f32 %v4405_v32, %v5811_v14  ;;  %2133 = vadd.xlane.f32.xlu0 %v2132_v53  ;;  %v2075_v26 = vpop.f32.mrb[35].mxu1 }
 0x33b   : > { %v5871_v56 = vadd.f32 %v5811_v14, %v2075_v26 }
 0x33c   : > { %v2141_v61 = vsel %vm525_vm3, %v5868_v62, 0.0 }
 0x33d   : > { %2142 = vadd.xlane.f32.xlu1 %v2141_v61  ;;  %v4408_v22 = vpop.f32.mrb[36].mxu1  ;;  %v2138_v60 = vsel %vm525_vm3, %v5871_v56, 0.0 }
 0x33e   : > { %v5878_v20 = vadd.f32 %v4408_v22, %v5811_v14  ;;  %2139 = vadd.xlane.f32.xlu0 %v2138_v60  ;;  %v2085_v46 = vpop.f32.mrb[37].mxu1 }
 0x33f   : > { %v5881_v3 = vadd.f32 %v5811_v14, %v2085_v46 }
 0x340   : > { %v2147_v4 = vsel %vm525_vm3, %v5878_v20, 0.0 }
 0x341   : > { %2148 = vadd.xlane.f32.xlu1 %v2147_v4  ;;  %v4411_v30 = vpop.f32.mrb[38].mxu1  ;;  %v2144_v0 = vsel %vm525_vm3, %v5881_v3, 0.0 }
 0x342   : > { %v5888_v48 = vadd.f32 %v4411_v30, %v5811_v14  ;;  %2145 = vadd.xlane.f32.xlu0 %v2144_v0  ;;  %v2095_v16 = vpop.f32.mrb[39].mxu1 }
 0x343   : > { %v5891_v38 = vadd.f32 %v5811_v14, %v2095_v16  ;;  %v2772_v14 = vld [vmem:[%s5901_s10] sm:$0xff] }
 0x344   : > { %v2153_v12 = vsel %vm525_vm3, %v5888_v48, 0.0  ;;  %v4620_v35 = vpack.c.bf16 %v2773_v23, %v2772_v14 }
 0x345   : > { %2154 = vadd.xlane.f32.xlu1 %v2153_v12  ;;  %v2150_v17 = vsel %vm525_vm3, %v5891_v38, 0.0 }
 0x346   : > { %2151 = vadd.xlane.f32.xlu0 %v2150_v17  ;;  %4621 = vmatprep.subr.bf16.mxu0 %v4620_v35 }
 0x347   : > { %4623 = vmatpush3.bf16.msra.mxu0 %v4620_v35 }
 0x396   : > { %v1205_v8 = vpop.xlane.xlu1 %1204 }
 0x397   : > { %v1249_v2 = vmul.f32 0.03125, %v1205_v8  ;;  %v1202_v33 = vpop.xlane.xlu0 %1201 }
 0x398   : > { %v1248_v11 = vmul.f32 0.03125, %v1202_v33 }
 0x399   : > { %v5908_v1 = vsub.f32 %v5750_v63, %v1249_v2 }
 0x39a   : > { %v5911_v21 = vsub.f32 %v5752_v50, %v1248_v11  ;;  %v1211_v31 = vpop.xlane.xlu1 %1210 }
 0x39b   : > { %v1251_v25 = vmul.f32 0.03125, %v1211_v31  ;;  %v1208_v39 = vpop.xlane.xlu0 %1207  ;;  %v1281_v42 = vmul.f32 %v5908_v1, %v5908_v1 }
 0x39c   : > { %v1250_v7 = vmul.f32 0.03125, %v1208_v39  ;;  %v1280_v49 = vmul.f32 %v5911_v21, %v5911_v21 }
 0x39d   : > { %v5918_v52 = vsub.f32 %v5758_v43, %v1251_v25  ;;  %v1299_v32 = vsel %vm525_vm3, %v1281_v42, 0.0 }
 0x39e   : > { %v5922_v63 = vsub.f32 %v5760_v10, %v1250_v7  ;;  %v1217_v50 = vpop.xlane.xlu1 %1216  ;;  %1300 = vadd.xlane.f32.xlu1 %v1299_v32  ;;  %v1296_v53 = vsel %vm525_vm3, %v1280_v49, 0.0 }
 0x39f   : > { %v1253_v26 = vmul.f32 0.03125, %v1217_v50  ;;  %1297 = vadd.xlane.f32.xlu0 %v1296_v53  ;;  %v1214_v61 = vpop.xlane.xlu0 %1213  ;;  %v1283_v22 = vmul.f32 %v5918_v52, %v5918_v52 }
 0x3a0   : > { %v1252_v60 = vmul.f32 0.03125, %v1214_v61  ;;  %v1282_v43 = vmul.f32 %v5922_v63, %v5922_v63 }
 0x3a1   : > { %v5930_v46 = vsub.f32 %v5766_v36, %v1253_v26  ;;  %v1305_v10 = vsel %vm525_vm3, %v1283_v22, 0.0 }
 0x3a2   : > { %v5934_v4 = vsub.f32 %v5768_v27, %v1252_v60  ;;  %v1223_v30 = vpop.xlane.xlu1 %1222  ;;  %1306 = vadd.xlane.f32.xlu1 %v1305_v10  ;;  %v1302_v0 = vsel %vm525_vm3, %v1282_v43, 0.0 }
 0x3a3   : > { %v1255_v16 = vmul.f32 0.03125, %v1223_v30  ;;  %1303 = vadd.xlane.f32.xlu0 %v1302_v0  ;;  %v1220_v12 = vpop.xlane.xlu0 %1219  ;;  %v1285_v17 = vmul.f32 %v5930_v46, %v5930_v46 }
 0x3a4   : > { %v1254_v14 = vmul.f32 0.03125, %v1220_v12  ;;  %v1284_v36 = vmul.f32 %v5934_v4, %v5934_v4 }
 0x3a5   : > { %v5942_v23 = vsub.f32 %v5774_v5, %v1255_v16  ;;  %v1311_v27 = vsel %vm525_vm3, %v1285_v17, 0.0 }
 0x3a6   : > { %v5946_v44 = vsub.f32 %v5776_v37, %v1254_v14  ;;  %v1229_v35 = vpop.xlane.xlu1 %1228  ;;  %1312 = vadd.xlane.f32.xlu1 %v1311_v27  ;;  %v1308_v41 = vsel %vm525_vm3, %v1284_v36, 0.0 }
 0x3a7   : > { %v1257_v9 = vmul.f32 0.03125, %v1229_v35  ;;  %1309 = vadd.xlane.f32.xlu0 %v1308_v41  ;;  %v1226_v8 = vpop.xlane.xlu0 %1225  ;;  %v1287_v2 = vmul.f32 %v5942_v23, %v5942_v23 }
 0x3a8   : > { %v1256_v33 = vmul.f32 0.03125, %v1226_v8  ;;  %v1286_v5 = vmul.f32 %v5946_v44, %v5946_v44 }
 0x3a9   : > { %v5954_v11 = vsub.f32 %v5782_v55, %v1257_v9  ;;  %v1317_v37 = vsel %vm525_vm3, %v1287_v2, 0.0 }
 0x3aa   : > { %v5958_v31 = vsub.f32 %v5784_v58, %v1256_v33  ;;  %v1235_v25 = vpop.xlane.xlu1 %1234  ;;  %1318 = vadd.xlane.f32.xlu1 %v1317_v37  ;;  %v1314_v39 = vsel %vm525_vm3, %v1286_v5, 0.0 }
 0x3ab   : > { %v1259_v42 = vmul.f32 0.03125, %v1235_v25  ;;  %1315 = vadd.xlane.f32.xlu0 %v1314_v39  ;;  %v1232_v7 = vpop.xlane.xlu0 %1231  ;;  %v1289_v49 = vmul.f32 %v5954_v11, %v5954_v11 }
 0x3ac   : > { %v1258_v32 = vmul.f32 0.03125, %v1232_v7  ;;  %v1288_v55 = vmul.f32 %v5958_v31, %v5958_v31 }
 0x3ad   : > { %v5966_v50 = vsub.f32 %v5790_v59, %v1259_v42  ;;  %v1323_v58 = vsel %vm525_vm3, %v1289_v49, 0.0 }
 0x3ae   : > { %v5970_v53 = vsub.f32 %v5792_v54, %v1258_v32  ;;  %v1241_v26 = vpop.xlane.xlu1 %1240  ;;  %1324 = vadd.xlane.f32.xlu1 %v1323_v58  ;;  %v1320_v61 = vsel %vm525_vm3, %v1288_v55, 0.0 }
 0x3af   : > { %v1261_v22 = vmul.f32 0.03125, %v1241_v26  ;;  %1321 = vadd.xlane.f32.xlu0 %v1320_v61  ;;  %v1238_v60 = vpop.xlane.xlu0 %1237  ;;  %v1291_v43 = vmul.f32 %v5966_v50, %v5966_v50 }
 0x3b0   : > { %v1260_v10 = vmul.f32 0.03125, %v1238_v60  ;;  %v1290_v59 = vmul.f32 %v5970_v53, %v5970_v53 }
 0x3b1   : > { %v5978_v30 = vsub.f32 %v5798_v6, %v1261_v22  ;;  %v1329_v54 = vsel %vm525_vm3, %v1291_v43, 0.0 }
 0x3b2   : > { %v5982_v0 = vsub.f32 %v5800_v15, %v1260_v10  ;;  %v1247_v16 = vpop.xlane.xlu1 %1246  ;;  %1330 = vadd.xlane.f32.xlu1 %v1329_v54  ;;  %v1326_v12 = vsel %vm525_vm3, %v1290_v59, 0.0  ;;  %v4063_v54 = vld [vmem:[%s5901_s10 + $0x50] sm:$0xff] }
 0x3b3   : > { %v1263_v17 = vmul.f32 0.03125, %v1247_v16  ;;  %1327 = vadd.xlane.f32.xlu0 %v1326_v12  ;;  %v1244_v14 = vpop.xlane.xlu0 %1243  ;;  %v1293_v36 = vmul.f32 %v5978_v30, %v5978_v30  ;;  %v4454_v16 = vpop.f32.mrb[40].mxu1 }
 0x3b4   : > { %v1262_v27 = vmul.f32 0.03125, %v1244_v14  ;;  %v1292_v6 = vmul.f32 %v5982_v0, %v5982_v0  ;;  %v2775_v14 = vld [vmem:[%s5901_s10 + $0x18] sm:$0xff] }
 0x3b5   : > { %v5990_v35 = vsub.f32 %v5806_v18, %v1263_v17  ;;  %v1335_v15 = vsel %vm525_vm3, %v1293_v36, 0.0 }
 0x3b6   : > { %v5994_v41 = vsub.f32 %v5808_v29, %v1262_v27  ;;  %v2113_v9 = vpop.xlane.xlu1 %2112  ;;  %1336 = vadd.xlane.f32.xlu1 %v1335_v15  ;;  %v1332_v8 = vsel %vm525_vm3, %v1292_v6, 0.0  ;;  %v6030_v27 = vld [vmem:[%s5171_s18 + $0x5] ss:$0 sm:$0xff]  ;;  %v2677_v6 = vpop.f32.mrb[41].mxu1 }
 0x3b7   : > { %v2157_v2 = vmul.f32 0.03125, %v2113_v9  ;;  %1333 = vadd.xlane.f32.xlu0 %v1332_v8  ;;  %v2110_v33 = vpop.xlane.xlu0 %2109  ;;  %v1295_v5 = vmul.f32 %v5990_v35, %v5990_v35 }
 0x3b8   : > { %v2156_v37 = vmul.f32 0.03125, %v2110_v33  ;;  %v1294_v18 = vmul.f32 %v5994_v41, %v5994_v41 }
 0x3b9   : > { %v6002_v25 = vsub.f32 %v5818_v13, %v2157_v2  ;;  %v1341_v29 = vsel %vm525_vm3, %v1295_v5, 0.0  ;;  %v2683_v2 = vadd.f32 %v4454_v16, %v6030_v27 }
 0x3ba   : > { %v6006_v39 = vsub.f32 %v5821_v40, %v2156_v37  ;;  %v2119_v42 = vpop.xlane.xlu1 %2118  ;;  %1342 = vadd.xlane.f32.xlu1 %v1341_v29  ;;  %v1338_v7 = vsel %vm525_vm3, %v1294_v18, 0.0  ;;  %v2678_v18 = vadd.f32 %v6030_v27, %v2677_v6 }
 0x3bb   : > { %v2159_v49 = vmul.f32 0.03125, %v2119_v42  ;;  %1339 = vadd.xlane.f32.xlu0 %v1338_v7  ;;  %v2116_v32 = vpop.xlane.xlu0 %2115  ;;  %v2189_v55 = vmul.f32 %v6002_v25, %v6002_v25  ;;  %v2757_v7 = vmax.f32 %v2683_v2, 0.0 }
 0x3bc   : > { %v2158_v58 = vmul.f32 0.03125, %v2116_v32  ;;  %v2188_v13 = vmul.f32 %v6006_v39, %v6006_v39 }
 0x3bd   : > { %v6014_v40 = vsub.f32 %v5828_v24, %v2159_v49  ;;  %v2207_v26 = vsel %vm525_vm3, %v2189_v55, 0.0  ;;  %v4064_v24 = vld [vmem:[%s5901_s10 + $0x58] sm:$0xff]  ;;  %v4457_v49 = vpop.f32.mrb[42].mxu1  ;;  %v2756_v55 = vmax.f32 %v2678_v18, 0.0 }
 0x3be   : > { %v6018_v61 = vsub.f32 %v5831_v51, %v2158_v58  ;;  %v2125_v22 = vpop.xlane.xlu1 %2124  ;;  %2208 = vadd.xlane.f32.xlu1 %v2207_v26  ;;  %v2204_v60 = vsel %vm525_vm3, %v2188_v13, 0.0  ;;  %v2774_v51 = vld [vmem:[%s5901_s10 + $0x10] sm:$0xff]  ;;  %v4640_v36 = vpack.c.bf16 %v4064_v24, %v4063_v54  ;;  %v2687_v58 = vpop.f32.mrb[43].mxu1 }
 0x3bf   : > { %v2161_v43 = vmul.f32 0.03125, %v2125_v22  ;;  %2205 = vadd.xlane.f32.xlu0 %v2204_v60  ;;  %v2122_v10 = vpop.xlane.xlu0 %2121  ;;  %v2191_v59 = vmul.f32 %v6014_v40, %v6014_v40  ;;  %v4624_v8 = vpack.c.bf16 %v2775_v14, %v2774_v51  ;;  %v2693_v22 = vadd.f32 %v4457_v49, %v6030_v27  ;;  %4548 = vmatprep.mubr.msk.f32.mxu1 %vm525_vm3, %v2756_v55  ;;  %v4039_v14 = vld [vmem:[%s5901_s10 + $0x20] sm:$0xff] }
 0x3c0   : > { %v2160_v12 = vmul.f32 0.03125, %v2122_v10  ;;  %v2190_v17 = vmul.f32 %v6018_v61, %v6018_v61  ;;  %4641 = vmatprep.subr.bf16.mxu1 %v4640_v36  ;;  %v2688_v60 = vadd.f32 %v6030_v27, %v2687_v58 }
 0x3c1   : > { %v6033_v15 = vsub.f32 %v5838_v19, %v2161_v43  ;;  %v2213_v9 = vsel %vm525_vm3, %v2191_v59, 0.0  ;;  %4625 = vmatprep.subr.bf16.mxu0 %v4624_v8  ;;  %4643 = vmatpush3.bf16.msra.mxu1 %v4640_v36  ;;  %v2759_v51 = vmax.f32 %v2693_v22, 0.0  ;;  %v4040_v36 = vld [vmem:[%s5901_s10 + $0x28] sm:$0xff] }
 0x3c2   : > { %v6038_v33 = vsub.f32 %v5841_v28, %v2160_v12  ;;  %v2131_v5 = vpop.xlane.xlu1 %2130  ;;  %2214 = vadd.xlane.f32.xlu1 %v2213_v9  ;;  %v2210_v37 = vsel %vm525_vm3, %v2190_v17, 0.0  ;;  %4627 = vmatpush3.bf16.msra.mxu0 %v4624_v8  ;;  %v2758_v16 = vmax.f32 %v2688_v60, 0.0  ;;  %v4460_v12 = vpop.f32.mrb[44].mxu1  ;;  %v6068_v2 = vpack.c.bf16 %v4040_v36, %v4039_v14 }
 0x3c3   : > { %v2163_v29 = vmul.f32 0.03125, %v2131_v5  ;;  %2211 = vadd.xlane.f32.xlu0 %v2210_v37  ;;  %v2128_v42 = vpop.xlane.xlu0 %2127  ;;  %v2193_v19 = vmul.f32 %v6033_v15, %v6033_v15  ;;  %v2697_v6 = vpop.f32.mrb[45].mxu1  ;;  %v2703_v5 = vadd.f32 %v4460_v12, %v6030_v27 }
 0x3c4   : > { %v2162_v32 = vmul.f32 0.03125, %v2128_v42  ;;  %v2192_v28 = vmul.f32 %v6038_v33, %v6038_v33  ;;  %4549 = vmatmul.mubr.msk.f32.vlgmr.msra.gmra.mrb[56].mxu1 %vm525_vm3, %v2757_v7  ;;  %v2698_v42 = vadd.f32 %v6030_v27, %v2697_v6  ;;  %4629 = vmatprep.subr.bf16.mxu0 %v6068_v2  ;;  %v4463_v49 = vpop.f32.mrb[46].mxu1 }
 0x3c5   : > { %v6047_v13 = vsub.f32 %v5848_v34, %v2163_v29  ;;  %v2219_v26 = vsel %vm525_vm3, %v2193_v19, 0.0  ;;  %4551 = vmatprep.mubr.msk.f32.mxu1 %vm525_vm3, %v2758_v16  ;;  %v2707_v58 = vpop.f32.mrb[47].mxu1  ;;  %v2713_v60 = vadd.f32 %v4463_v49, %v6030_v27 }
 0x3c6   : > { %v6053_v43 = vsub.f32 %v5851_v57, %v2162_v32  ;;  %v2137_v10 = vpop.xlane.xlu1 %2136  ;;  %2220 = vadd.xlane.f32.xlu1 %v2219_v26  ;;  %v2216_v59 = vsel %vm525_vm3, %v2192_v28, 0.0  ;;  %v2761_v28 = vmax.f32 %v2703_v5, 0.0  ;;  %v2760_v55 = vmax.f32 %v2698_v42, 0.0 }
 0x3c7   : > { %v2165_v54 = vmul.f32 0.03125, %v2137_v10  ;;  %2217 = vadd.xlane.f32.xlu0 %v2216_v59  ;;  %v2134_v34 = vpop.xlane.xlu0 %2133  ;;  %v2195_v24 = vmul.f32 %v6047_v13, %v6047_v13  ;;  %v2708_v10 = vadd.f32 %v6030_v27, %v2707_v58 }
 0x3c8   : > { %v2164_v17 = vmul.f32 0.03125, %v2134_v34  ;;  %v2194_v57 = vmul.f32 %v6053_v43, %v6053_v43  ;;  %4552 = vmatmul.mubr.msk.f32.gmra.mrb[58].mxu1 %vm525_vm3, %v2759_v51 }
 0x3c9   : > { %v6065_v9 = vsub.f32 %v5858_v47, %v2165_v54  ;;  %v2225_v8 = vsel %vm525_vm3, %v2195_v24, 0.0  ;;  %4554 = vmatprep.mubr.msk.f32.mxu1 %vm525_vm3, %v2760_v55  ;;  %v2762_v12 = vmax.f32 %v2708_v10, 0.0 }
 0x3ca   : > { %v6073_v37 = vsub.f32 %v5861_v45, %v2164_v17  ;;  %v2143_v18 = vpop.xlane.xlu1 %2142  ;;  %2226 = vadd.xlane.f32.xlu1 %v2225_v8  ;;  %v2222_v29 = vsel %vm525_vm3, %v2194_v57, 0.0  ;;  %v4466_v17 = vpop.f32.mrb[48].mxu1 }
 0x3cb   : > { %v2167_v19 = vmul.f32 0.03125, %v2143_v18  ;;  %2223 = vadd.xlane.f32.xlu0 %v2222_v29  ;;  %v2140_v47 = vpop.xlane.xlu0 %2139  ;;  %v2197_v7 = vmul.f32 %v6065_v9, %v6065_v9  ;;  %v2717_v14 = vpop.f32.mrb[49].mxu1  ;;  %v2723_v42 = vadd.f32 %v4466_v17, %v6030_v27 }
 0x3cc   : > { %v2166_v32 = vmul.f32 0.03125, %v2140_v47  ;;  %v2196_v45 = vmul.f32 %v6073_v37, %v6073_v37  ;;  %4555 = vmatmul.mubr.msk.f32.gmra.mrb[60].mxu1 %vm525_vm3, %v2761_v28  ;;  %v2718_v8 = vadd.f32 %v6030_v27, %v2717_v14  ;;  %v4469_v49 = vpop.f32.mrb[50].mxu1 }
 0x3cd   : > { %v6084_v26 = vsub.f32 %v5868_v62, %v2167_v19  ;;  %v2231_v22 = vsel %vm525_vm3, %v2197_v7, 0.0  ;;  %4557 = vmatprep.mubr.msk.f32.mxu1 %vm525_vm3, %v2762_v12  ;;  %v2727_v28 = vpop.f32.mrb[51].mxu1 }
 0x3ce   : > { %v6090_v59 = vsub.f32 %v5871_v56, %v2166_v32  ;;  %v2149_v54 = vpop.xlane.xlu1 %2148  ;;  %2232 = vadd.xlane.f32.xlu1 %v2231_v22  ;;  %v2228_v34 = vsel %vm525_vm3, %v2196_v45, 0.0  ;;  %v2763_v56 = vmax.f32 %v2713_v60, 0.0  ;;  %v2764_v7 = vmax.f32 %v2718_v8, 0.0 }
 0x3cf   : > { %v2169_v24 = vmul.f32 0.03125, %v2149_v54  ;;  %2229 = vadd.xlane.f32.xlu0 %v2228_v34  ;;  %v2146_v16 = vpop.xlane.xlu0 %2145  ;;  %v2199_v62 = vmul.f32 %v6084_v26, %v6084_v26  ;;  %v2728_v22 = vadd.f32 %v6030_v27, %v2727_v28  ;;  %v2733_v54 = vadd.f32 %v4469_v49, %v6030_v27 }
 0x3d0   : > { %v2168_v57 = vmul.f32 0.03125, %v2146_v16  ;;  %v2198_v51 = vmul.f32 %v6090_v59, %v6090_v59  ;;  %4558 = vmatmul.mubr.msk.f32.gmra.mrb[62].mxu1 %vm525_vm3, %v2763_v56 }
 0x3d1   : > { %v6100_v36 = vsub.f32 %v5878_v20, %v2169_v24  ;;  %v2237_v6 = vsel %vm525_vm3, %v2199_v62, 0.0  ;;  %4560 = vmatprep.mubr.msk.f32.mxu1 %vm525_vm3, %v2764_v7  ;;  %v4472_v24 = vpop.f32.mrb[52].mxu1  ;;  %v2767_v62 = vmax.f32 %v2733_v54, 0.0 }
 0x3d2   : > { %v6106_v5 = vsub.f32 %v5881_v3, %v2168_v57  ;;  %2238 = vadd.xlane.f32.xlu1 %v2237_v6  ;;  %v2155_v18 = vpop.xlane.xlu1 %2154  ;;  %v2234_v29 = vsel %vm525_vm3, %v2198_v51, 0.0  ;;  %v2765_v3 = vmax.f32 %v2723_v42, 0.0  ;;  %v2737_v12 = vpop.f32.mrb[53].mxu1  ;;  %v2743_v51 = vadd.f32 %v4472_v24, %v6030_v27 }
 0x3d3   : > { %v2171_v19 = vmul.f32 0.03125, %v2155_v18  ;;  %2235 = vadd.xlane.f32.xlu0 %v2234_v29  ;;  %v2152_v47 = vpop.xlane.xlu0 %2151  ;;  %v2201_v20 = vmul.f32 %v6100_v36, %v6100_v36  ;;  %v2738_v17 = vadd.f32 %v6030_v27, %v2737_v12  ;;  %v4475_v14 = vpop.f32.mrb[54].mxu1 }
 0x3d4   : > { %v2170_v32 = vmul.f32 0.03125, %v2152_v47  ;;  %v2200_v45 = vmul.f32 %v6106_v5, %v6106_v5  ;;  %4561 = vmatmul.mubr.msk.f32.gmra.mrb[64].mxu1 %vm525_vm3, %v2765_v3  ;;  %v2769_v6 = vmax.f32 %v2743_v51, 0.0  ;;  %v2747_v8 = vpop.f32.mrb[55].mxu1  ;;  %v2753_v29 = vadd.f32 %v4475_v14, %v6030_v27 }
 0x3d5   : > { %v6116_v55 = vsub.f32 %v5888_v48, %v2171_v19  ;;  %v2243_v58 = vsel %vm525_vm3, %v2201_v20, 0.0  ;;  %v2766_v48 = vmax.f32 %v2728_v22, 0.0  ;;  %v2768_v56 = vmax.f32 %v2738_v17, 0.0 }
 0x3d6   : > { %v6122_v60 = vsub.f32 %v5891_v38, %v2170_v32  ;;  %2244 = vadd.xlane.f32.xlu1 %v2243_v58  ;;  %v2240_v10 = vsel %vm525_vm3, %v2200_v45, 0.0  ;;  %v2748_v18 = vadd.f32 %v6030_v27, %v2747_v8  ;;  %v2771_v19 = vmax.f32 %v2753_v29, 0.0 }
 0x3d7   : > { %2241 = vadd.xlane.f32.xlu0 %v2240_v10  ;;  %v2203_v34 = vmul.f32 %v6116_v55, %v6116_v55  ;;  %4563 = vmatprep.mubr.msk.f32.mxu1 %vm525_vm3, %v2766_v48 }
 0x3d8   : > { %v2202_v16 = vmul.f32 %v6122_v60, %v6122_v60  ;;  %4564 = vmatmul.mubr.msk.f32.gmra.mrb[66].mxu1 %vm525_vm3, %v2767_v62  ;;  %v2770_v42 = vmax.f32 %v2748_v18, 0.0 }
 0x3d9   : > { %v2249_v38 = vsel %vm525_vm3, %v2203_v34, 0.0  ;;  %4566 = vmatprep.mubr.msk.f32.mxu1 %vm525_vm3, %v2768_v56  ;;  %v6144_v56 = vld [vmem:[%s5578_s22 + $0x1] ss:$0 sm:$0xff] }
 0x3da   : > { %2250 = vadd.xlane.f32.xlu1 %v2249_v38  ;;  %v2246_v57 = vsel %vm525_vm3, %v2202_v16, 0.0 }
 0x3db   : > { %2247 = vadd.xlane.f32.xlu0 %v2246_v57 }
 0x3dc   : > { %4567 = vmatmul.mubr.msk.f32.gmra.mrb[68].mxu1 %vm525_vm3, %v2769_v6 }
 0x3dd   : > { %4569 = vmatprep.mubr.msk.f32.mxu1 %vm525_vm3, %v2770_v42  ;;  %v6148_v42 = vld [vmem:[%s5583_s25 + $0x1] ss:$0 sm:$0xff] }
 0x3e0   : > { %4570 = vmatmul.mubr.msk.f32.gmra.mrb[70].mxu1 %vm525_vm3, %v2771_v19 }
 0x42b   : > { %v1301_v47 = vpop.xlane.xlu1 %1300 }
 0x42c   : > { %v1345_v20 = vmul.f32 0.03125, %v1301_v47  ;;  %v1298_v7 = vpop.xlane.xlu0 %1297 }
 0x42d   : > { %v1344_v49 = vmul.f32 0.03125, %v1298_v7 }
 0x42e   : > { %v1361_v32 = vadd.f32 1e-05, %v1345_v20 }
 0x42f   : > { %v1360_v45 = vadd.f32 1e-05, %v1344_v49  ;;  %v1307_v3 = vpop.xlane.xlu1 %1306 }
 0x430   : > { %4772 = vrsqrt.f32 %v1361_v32  ;;  %v1347_v28 = vmul.f32 0.03125, %v1307_v3  ;;  %v1304_v58 = vpop.xlane.xlu0 %1303 }
 0x431   : > { %4774 = vrsqrt.f32 %v1360_v45  ;;  %v1346_v27 = vmul.f32 0.03125, %v1304_v58 }
 0x432   : > { %v1363_v22 = vadd.f32 1e-05, %v1347_v28 }
 0x433   : > { %v1362_v10 = vadd.f32 1e-05, %v1346_v27  ;;  %v1313_v54 = vpop.xlane.xlu1 %1312 }
 0x434   : > { %4776 = vrsqrt.f32 %v1363_v22  ;;  %v1349_v34 = vmul.f32 0.03125, %v1313_v54  ;;  %v1310_v48 = vpop.xlane.xlu0 %1309  ;;  %v4042_v54 = vld [vmem:[%s5901_s10 + $0x38] sm:$0xff] }
 0x435   : > { %4778 = vrsqrt.f32 %v1362_v10  ;;  %v1348_v24 = vmul.f32 0.03125, %v1310_v48  ;;  %v4041_v10 = vld [vmem:[%s5901_s10 + $0x30] sm:$0xff] }
 0x436   : > { %v1365_v16 = vadd.f32 1e-05, %v1349_v34 }
 0x437   : > { %v1364_v62 = vadd.f32 1e-05, %v1348_v24  ;;  %v1319_v12 = vpop.xlane.xlu1 %1318 }
 0x438   : > { %4780 = vrsqrt.f32 %v1365_v16  ;;  %v1351_v38 = vmul.f32 0.03125, %v1319_v12  ;;  %v1316_v17 = vpop.xlane.xlu0 %1315 }
 0x439   : > { %4782 = vrsqrt.f32 %v1364_v62  ;;  %v1350_v57 = vmul.f32 0.03125, %v1316_v17 }
 0x43a   : > { %v4773_v51 = vpop.eup %4772  ;;  %v1367_v14 = vadd.f32 1e-05, %v1351_v38 }
 0x43b   : > { %v4775_v6 = vpop.eup %4774  ;;  %v1393_v8 = vmul.f32 %v4773_v51, %v5908_v1  ;;  %v1366_v18 = vadd.f32 1e-05, %v1350_v57  ;;  %v1325_v29 = vpop.xlane.xlu1 %1324  ;;  %v4632_v51 = vpack.c.bf16 %v4042_v54, %v4041_v10 }
 0x43c   : > { %4784 = vrsqrt.f32 %v1367_v14  ;;  %v1353_v19 = vmul.f32 0.03125, %v1325_v29  ;;  %v1322_v47 = vpop.xlane.xlu0 %1321  ;;  %v1392_v20 = vmul.f32 %v4775_v6, %v5911_v21 }
 0x43d   : > { %v1415_v7 = vmul.f32 %v6144_v56, %v1393_v8  ;;  %4786 = vrsqrt.f32 %v1366_v18  ;;  %v1352_v49 = vmul.f32 0.03125, %v1322_v47 }
 0x43e   : > { %v4777_v32 = vpop.eup %4776  ;;  %v1369_v45 = vadd.f32 1e-05, %v1353_v19  ;;  %v1414_v3 = vmul.f32 %v6144_v56, %v1392_v20 }
 0x43f   : > { %v4779_v1 = vpop.eup %4778  ;;  %v1437_v28 = vadd.f32 %v6148_v42, %v1415_v7  ;;  %v1368_v58 = vadd.f32 1e-05, %v1352_v49  ;;  %v1331_v27 = vpop.xlane.xlu1 %1330  ;;  %v1395_v22 = vmul.f32 %v4777_v32, %v5918_v52 }
 0x440   : > { %4788 = vrsqrt.f32 %v1369_v45  ;;  %v1355_v34 = vmul.f32 0.03125, %v1331_v27  ;;  %v1328_v21 = vpop.xlane.xlu0 %1327  ;;  %v1436_v48 = vadd.f32 %v6148_v42, %v1414_v3  ;;  %v1394_v24 = vmul.f32 %v4779_v1, %v5922_v63 }
 0x441   : > { %4790 = vrsqrt.f32 %v1368_v58  ;;  %v1354_v16 = vmul.f32 0.03125, %v1328_v21  ;;  %v1417_v62 = vmul.f32 %v6144_v56, %v1395_v22  ;;  %v1453_v14 = vmax.f32 %v1437_v28, 0.0 }
 0x442   : > { %v4781_v12 = vpop.eup %4780  ;;  %v1371_v38 = vadd.f32 1e-05, %v1355_v34  ;;  %v1452_v17 = vmax.f32 %v1436_v48, 0.0  ;;  %v1416_v57 = vmul.f32 %v6144_v56, %v1394_v24 }
 0x443   : > { %v4783_v52 = vpop.eup %4782  ;;  %v1370_v6 = vadd.f32 1e-05, %v1354_v16  ;;  %v1337_v8 = vpop.xlane.xlu1 %1336  ;;  %v1439_v18 = vadd.f32 %v6148_v42, %v1417_v62  ;;  %v1397_v29 = vmul.f32 %v4781_v12, %v5930_v46 }
 0x444   : > { %4792 = vrsqrt.f32 %v1371_v38  ;;  %v1357_v63 = vmul.f32 0.03125, %v1337_v8  ;;  %4484 = vmatprep.mubr.msk.f32.mxu0 %vm525_vm3, %v1452_v17  ;;  %v1334_v19 = vpop.xlane.xlu0 %1333  ;;  %v1438_v47 = vadd.f32 %v6148_v42, %v1416_v57  ;;  %v1396_v20 = vmul.f32 %v4783_v52, %v5934_v4 }
 0x445   : > { %4794 = vrsqrt.f32 %v1370_v6  ;;  %v1356_v7 = vmul.f32 0.03125, %v1334_v19  ;;  %4485 = vmatmul.mubr.msk.f32.vlgmr.msra.gmra.mrb[40].mxu0 %vm525_vm3, %v1453_v14  ;;  %v1419_v49 = vmul.f32 %v6144_v56, %v1397_v29  ;;  %v1455_v27 = vmax.f32 %v1439_v18, 0.0 }
 0x446   : > { %v4785_v32 = vpop.eup %4784  ;;  %v1373_v45 = vadd.f32 1e-05, %v1357_v63  ;;  %4631 = vmatpush3.bf16.msra.mxu0 %v6068_v2  ;;  %v1454_v46 = vmax.f32 %v1438_v47, 0.0  ;;  %v1418_v3 = vmul.f32 %v6144_v56, %v1396_v20 }
 0x447   : > { %v4787_v1 = vpop.eup %4786  ;;  %v1372_v28 = vadd.f32 1e-05, %v1356_v7  ;;  %v1343_v58 = vpop.xlane.xlu1 %1342  ;;  %v1441_v22 = vadd.f32 %v6148_v42, %v1419_v49  ;;  %v1399_v4 = vmul.f32 %v4785_v32, %v5942_v23  ;;  %4633 = vmatprep.subr.bf16.mxu0 %v4632_v51 }
 0x448   : > { %4796 = vrsqrt.f32 %v1373_v45  ;;  %v1359_v10 = vmul.f32 0.03125, %v1343_v58  ;;  %4487 = vmatprep.mubr.msk.f32.mxu0 %vm525_vm3, %v1454_v46  ;;  %v1340_v54 = vpop.xlane.xlu0 %1339  ;;  %v1440_v34 = vadd.f32 %v6148_v42, %v1418_v3  ;;  %v1398_v2 = vmul.f32 %v4787_v1, %v5946_v44 }
 0x449   : > { %4798 = vrsqrt.f32 %v1372_v28  ;;  %v1358_v21 = vmul.f32 0.03125, %v1340_v54  ;;  %4488 = vmatmul.mubr.msk.f32.gmra.mrb[42].mxu0 %vm525_vm3, %v1455_v27  ;;  %v1421_v48 = vmul.f32 %v6144_v56, %v1399_v4  ;;  %v1457_v57 = vmax.f32 %v1441_v22, 0.0 }
 0x44a   : > { %v4789_v24 = vpop.eup %4788  ;;  %v1375_v16 = vadd.f32 1e-05, %v1359_v10  ;;  %v1456_v62 = vmax.f32 %v1440_v34, 0.0  ;;  %v1420_v23 = vmul.f32 %v6144_v56, %v1398_v2  ;;  %4635 = vmatpush3.bf16.msra.mxu0 %v4632_v51 }
 0x44b   : > { %v4791_v12 = vpop.eup %4790  ;;  %v1374_v38 = vadd.f32 1e-05, %v1358_v21  ;;  %v2209_v17 = vpop.xlane.xlu1 %2208  ;;  %v1443_v52 = vadd.f32 %v6148_v42, %v1421_v48  ;;  %v1401_v44 = vmul.f32 %v4789_v24, %v5954_v11 }
 0x44c   : > { %4800 = vrsqrt.f32 %v1375_v16  ;;  %v2253_v14 = vmul.f32 0.03125, %v2209_v17  ;;  %4490 = vmatprep.mubr.msk.f32.mxu0 %vm525_vm3, %v1456_v62  ;;  %v2206_v6 = vpop.xlane.xlu0 %2205  ;;  %v1442_v8 = vadd.f32 %v6148_v42, %v1420_v23  ;;  %v1400_v18 = vmul.f32 %v4791_v12, %v5958_v31 }
 0x44d   : > { %4802 = vrsqrt.f32 %v1374_v38  ;;  %v2252_v29 = vmul.f32 0.03125, %v2206_v6  ;;  %4491 = vmatmul.mubr.msk.f32.gmra.mrb[44].mxu0 %vm525_vm3, %v1457_v57  ;;  %v1423_v51 = vmul.f32 %v6144_v56, %v1401_v44  ;;  %v1459_v32 = vmax.f32 %v1443_v52, 0.0 }
 0x44e   : > { %v4793_v63 = vpop.eup %4792  ;;  %v2269_v19 = vadd.f32 1e-05, %v2253_v14  ;;  %v1458_v47 = vmax.f32 %v1442_v8, 0.0  ;;  %v1422_v11 = vmul.f32 %v6144_v56, %v1400_v18 }
 0x44f   : > { %v4795_v20 = vpop.eup %4794  ;;  %v2268_v7 = vadd.f32 1e-05, %v2252_v29  ;;  %v2215_v49 = vpop.xlane.xlu1 %2214  ;;  %v1445_v45 = vadd.f32 %v6148_v42, %v1423_v51  ;;  %v1403_v46 = vmul.f32 %v4793_v63, %v5966_v50 }
 0x450   : > { %4804 = vrsqrt.f32 %v2269_v19  ;;  %v2255_v31 = vmul.f32 0.03125, %v2215_v49  ;;  %4493 = vmatprep.mubr.msk.f32.mxu0 %vm525_vm3, %v1458_v47  ;;  %v2212_v3 = vpop.xlane.xlu0 %2211  ;;  %v1444_v1 = vadd.f32 %v6148_v42, %v1422_v11  ;;  %v1402_v28 = vmul.f32 %v4795_v20, %v5970_v53 }
 0x451   : > { %4806 = vrsqrt.f32 %v2268_v7  ;;  %v2254_v58 = vmul.f32 0.03125, %v2212_v3  ;;  %4494 = vmatmul.mubr.msk.f32.gmra.mrb[46].mxu0 %vm525_vm3, %v1459_v32  ;;  %v1425_v27 = vmul.f32 %v6144_v56, %v1403_v46  ;;  %v1461_v21 = vmax.f32 %v1445_v45, 0.0  ;;  %v6210_v7 = vld [vmem:[%s5578_s22 + $0x3] ss:$0 sm:$0xff] }
 0x452   : > { %v4797_v22 = vpop.eup %4796  ;;  %v2271_v4 = vadd.f32 1e-05, %v2255_v31  ;;  %v1460_v10 = vmax.f32 %v1444_v1, 0.0  ;;  %v1424_v50 = vmul.f32 %v6144_v56, %v1402_v28  ;;  %v6216_v28 = vld [vmem:[%s5583_s25 + $0x3] ss:$0 sm:$0xff] }
 0x453   : > { %v4799_v54 = vpop.eup %4798  ;;  %v2270_v34 = vadd.f32 1e-05, %v2254_v58  ;;  %v2221_v2 = vpop.xlane.xlu1 %2220  ;;  %v1447_v48 = vadd.f32 %v6148_v42, %v1425_v27  ;;  %v1405_v24 = vmul.f32 %v4797_v22, %v5978_v30 }
 0x454   : > { %4808 = vrsqrt.f32 %v2271_v4  ;;  %v2257_v53 = vmul.f32 0.03125, %v2221_v2  ;;  %4496 = vmatprep.mubr.msk.f32.mxu0 %vm525_vm3, %v1460_v10  ;;  %v2218_v16 = vpop.xlane.xlu0 %2217  ;;  %v1446_v62 = vadd.f32 %v6148_v42, %v1424_v50  ;;  %v1404_v23 = vmul.f32 %v4799_v54, %v5982_v0 }
 0x455   : > { %4810 = vrsqrt.f32 %v2270_v34  ;;  %v2256_v12 = vmul.f32 0.03125, %v2218_v16  ;;  %4497 = vmatmul.mubr.msk.f32.gmra.mrb[48].mxu0 %vm525_vm3, %v1461_v21  ;;  %v1427_v38 = vmul.f32 %v6144_v56, %v1405_v24  ;;  %v1463_v8 = vmax.f32 %v1447_v48, 0.0 }
 0x456   : > { %v4801_v17 = vpop.eup %4800  ;;  %v2273_v57 = vadd.f32 1e-05, %v2257_v53  ;;  %v1462_v52 = vmax.f32 %v1446_v62, 0.0  ;;  %v1426_v30 = vmul.f32 %v6144_v56, %v1404_v23 }
 0x457   : > { %v4803_v44 = vpop.eup %4802  ;;  %v2272_v14 = vadd.f32 1e-05, %v2256_v12  ;;  %v2227_v6 = vpop.xlane.xlu1 %2226  ;;  %v1449_v18 = vadd.f32 %v6148_v42, %v1427_v38  ;;  %v1407_v0 = vmul.f32 %v4801_v17, %v5990_v35 }
 0x458   : > { %4812 = vrsqrt.f32 %v2273_v57  ;;  %v2259_v29 = vmul.f32 0.03125, %v2227_v6  ;;  %4499 = vmatprep.mubr.msk.f32.mxu0 %vm525_vm3, %v1462_v52  ;;  %v2224_v51 = vpop.xlane.xlu0 %2223  ;;  %v1448_v63 = vadd.f32 %v6148_v42, %v1426_v30  ;;  %v1406_v19 = vmul.f32 %v4803_v44, %v5994_v41 }
 0x459   : > { %4814 = vrsqrt.f32 %v2272_v14  ;;  %v2258_v47 = vmul.f32 0.03125, %v2224_v51  ;;  %4500 = vmatmul.mubr.msk.f32.gmra.mrb[50].mxu0 %vm525_vm3, %v1463_v8  ;;  %v1429_v11 = vmul.f32 %v6144_v56, %v1407_v0  ;;  %v1465_v41 = vmax.f32 %v1449_v18, 0.0 }
 0x45a   : > { %v4805_v20 = vpop.eup %4804  ;;  %v2275_v35 = vadd.f32 1e-05, %v2259_v29  ;;  %v1464_v49 = vmax.f32 %v1448_v63, 0.0  ;;  %v1428_v32 = vmul.f32 %v6144_v56, %v1406_v19 }
 0x45b   : > { %v4807_v45 = vpop.eup %4806  ;;  %v2301_v46 = vmul.f32 %v4805_v20, %v6002_v25  ;;  %v2274_v31 = vadd.f32 1e-05, %v2258_v47  ;;  %v2233_v3 = vpop.xlane.xlu1 %2232  ;;  %v1451_v1 = vadd.f32 %v6148_v42, %v1429_v11 }
 0x45c   : > { %4816 = vrsqrt.f32 %v2275_v35  ;;  %v2261_v58 = vmul.f32 0.03125, %v2233_v3  ;;  %4502 = vmatprep.mubr.msk.f32.mxu0 %vm525_vm3, %v1464_v49  ;;  %v2230_v27 = vpop.xlane.xlu0 %2229  ;;  %v1450_v22 = vadd.f32 %v6148_v42, %v1428_v32  ;;  %v2300_v4 = vmul.f32 %v4807_v45, %v6006_v39 }
 0x45d   : > { %v2323_v56 = vmul.f32 %v6210_v7, %v2301_v46  ;;  %4818 = vrsqrt.f32 %v2274_v31  ;;  %v2260_v25 = vmul.f32 0.03125, %v2230_v27  ;;  %4503 = vmatmul.mubr.msk.f32.gmra.mrb[52].mxu0 %vm525_vm3, %v1465_v41  ;;  %v1467_v53 = vmax.f32 %v1451_v1, 0.0 }
 0x45e   : > { %v4809_v10 = vpop.eup %4808  ;;  %v2277_v50 = vadd.f32 1e-05, %v2261_v58  ;;  %v1466_v54 = vmax.f32 %v1450_v22, 0.0  ;;  %v2322_v34 = vmul.f32 %v6210_v7, %v2300_v4 }
 0x45f   : > { %v4811_v2 = vpop.eup %4810  ;;  %v2345_v21 = vadd.f32 %v6216_v28, %v2323_v56  ;;  %v2276_v48 = vadd.f32 1e-05, %v2260_v25  ;;  %v2239_v24 = vpop.xlane.xlu1 %2238  ;;  %v2303_v42 = vmul.f32 %v4809_v10, %v6014_v40 }
 0x460   : > { %4820 = vrsqrt.f32 %v2277_v50  ;;  %v2263_v39 = vmul.f32 0.03125, %v2239_v24  ;;  %4505 = vmatprep.mubr.msk.f32.mxu0 %vm525_vm3, %v1466_v54  ;;  %v2236_v16 = vpop.xlane.xlu0 %2235  ;;  %v2344_v62 = vadd.f32 %v6216_v28, %v2322_v34  ;;  %v2302_v23 = vmul.f32 %v4811_v2, %v6018_v61 }
 0x461   : > { %4822 = vrsqrt.f32 %v2276_v48  ;;  %v2262_v12 = vmul.f32 0.03125, %v2236_v16  ;;  %4506 = vmatmul.mubr.msk.f32.gmra.mrb[54].mxu0 %vm525_vm3, %v1467_v53  ;;  %v2325_v38 = vmul.f32 %v6210_v7, %v2303_v42  ;;  %v2361_v44 = vmax.f32 %v2345_v21, 0.0 }
 0x462   : > { %v4813_v17 = vpop.eup %4812  ;;  %v2279_v57 = vadd.f32 1e-05, %v2263_v39  ;;  %v2360_v52 = vmax.f32 %v2344_v62, 0.0  ;;  %v2324_v40 = vmul.f32 %v6210_v7, %v2302_v23 }
 0x463   : > { %v4815_v30 = vpop.eup %4814  ;;  %v2278_v14 = vadd.f32 1e-05, %v2262_v12  ;;  %v2245_v6 = vpop.xlane.xlu1 %2244  ;;  %v2347_v8 = vadd.f32 %v6216_v28, %v2325_v38  ;;  %v2305_v18 = vmul.f32 %v4813_v17, %v6033_v15 }
 0x464   : > { %4824 = vrsqrt.f32 %v2279_v57  ;;  %v2265_v61 = vmul.f32 0.03125, %v2245_v6  ;;  %4516 = vmatprep.mubr.msk.f32.mxu0 %vm525_vm3, %v2360_v52  ;;  %v2242_v0 = vpop.xlane.xlu0 %2241  ;;  %v2346_v29 = vadd.f32 %v6216_v28, %v2324_v40  ;;  %v2304_v51 = vmul.f32 %v4815_v30, %v6038_v33 }
 0x465   : > { %4826 = vrsqrt.f32 %v2278_v14  ;;  %v2264_v63 = vmul.f32 0.03125, %v2242_v0  ;;  %4517 = vmatmul.mubr.msk.f32.vlgmr.msra.gmra.mrb[40].mxu0 %vm525_vm3, %v2361_v44  ;;  %v2327_v19 = vmul.f32 %v6210_v7, %v2305_v18  ;;  %v2363_v45 = vmax.f32 %v2347_v8, 0.0 }
 0x466   : > { %v4817_v47 = vpop.eup %4816  ;;  %v2281_v11 = vadd.f32 1e-05, %v2265_v61  ;;  %v2362_v20 = vmax.f32 %v2346_v29, 0.0  ;;  %v2326_v15 = vmul.f32 %v6210_v7, %v2304_v51 }
 0x467   : > { %v4819_v35 = vpop.eup %4818  ;;  %v2280_v49 = vadd.f32 1e-05, %v2264_v63  ;;  %v2251_v32 = vpop.xlane.xlu1 %2250  ;;  %v2349_v46 = vadd.f32 %v6216_v28, %v2327_v19  ;;  %v2307_v31 = vmul.f32 %v4817_v47, %v6047_v13 }
 0x468   : > { %4828 = vrsqrt.f32 %v2281_v11  ;;  %v2267_v33 = vmul.f32 0.03125, %v2251_v32  ;;  %4519 = vmatprep.mubr.msk.f32.mxu0 %vm525_vm3, %v2362_v20  ;;  %v2248_v3 = vpop.xlane.xlu0 %2247  ;;  %v2348_v41 = vadd.f32 %v6216_v28, %v2326_v15  ;;  %v2306_v1 = vmul.f32 %v4819_v35, %v6053_v43 }
 0x469   : > { %4830 = vrsqrt.f32 %v2280_v49  ;;  %v2266_v58 = vmul.f32 0.03125, %v2248_v3  ;;  %4520 = vmatmul.mubr.msk.f32.gmra.mrb[42].mxu0 %vm525_vm3, %v2363_v45  ;;  %v2329_v27 = vmul.f32 %v6210_v7, %v2307_v31  ;;  %v2365_v50 = vmax.f32 %v2349_v46, 0.0 }
 0x46a   : > { %v4821_v22 = vpop.eup %4820  ;;  %v2283_v4 = vadd.f32 1e-05, %v2267_v33  ;;  %v2364_v56 = vmax.f32 %v2348_v41, 0.0  ;;  %v2328_v13 = vmul.f32 %v6210_v7, %v2306_v1 }
 0x46b   : > { %v4823_v25 = vpop.eup %4822  ;;  %v2282_v10 = vadd.f32 1e-05, %v2266_v58  ;;  %v2351_v54 = vadd.f32 %v6216_v28, %v2329_v27  ;;  %v2309_v34 = vmul.f32 %v4821_v22, %v6065_v9 }
 0x46c   : > { %4832 = vrsqrt.f32 %v2283_v4  ;;  %4522 = vmatprep.mubr.msk.f32.mxu0 %vm525_vm3, %v2364_v56  ;;  %v2350_v43 = vadd.f32 %v6216_v28, %v2328_v13  ;;  %v2308_v2 = vmul.f32 %v4823_v25, %v6073_v37  ;;  %v3389_v4 = vld [vmem:[%s6322_s13 + $0x8] sm:$0xff]  ;;  %v3388_v56 = vld [vmem:[%s6322_s13] sm:$0xff]  ;;  %v3391_v25 = vld [vmem:[%s6322_s13 + $0x18] sm:$0xff] }
 0x46d   : > { %4834 = vrsqrt.f32 %v2282_v10  ;;  %4523 = vmatmul.mubr.msk.f32.gmra.mrb[44].mxu0 %vm525_vm3, %v2365_v50  ;;  %v2331_v21 = vmul.f32 %v6210_v7, %v2309_v34  ;;  %v2367_v39 = vmax.f32 %v2351_v54, 0.0  ;;  %v3405_v13 = vmax.f32 %v3389_v4, 0.0  ;;  %v3390_v50 = vld [vmem:[%s6322_s13 + $0x10] sm:$0xff] }
 0x46e   : > { %v4825_v48 = vpop.eup %4824  ;;  %v2366_v24 = vmax.f32 %v2350_v43, 0.0  ;;  %v2330_v53 = vmul.f32 %v6210_v7, %v2308_v2  ;;  %v3404_v10 = vmax.f32 %v3388_v56, 0.0  ;;  %v3407_v54 = vmax.f32 %v3391_v25, 0.0  ;;  %v3393_v2 = vld [vmem:[%s6322_s13 + $0x28] sm:$0xff] }
 0x46f   : > { %v4827_v42 = vpop.eup %4826  ;;  %v2353_v9 = vadd.f32 %v6216_v28, %v2331_v21  ;;  %v2311_v16 = vmul.f32 %v4825_v48, %v6084_v26  ;;  %v3421_v34 = vmin.f32 %v3405_v13, 1.0  ;;  %v3406_v43 = vmax.f32 %v3390_v50, 0.0  ;;  %v3392_v48 = vld [vmem:[%s6322_s13 + $0x20] sm:$0xff] }
 0x470   : > { %4525 = vmatprep.mubr.msk.f32.mxu0 %vm525_vm3, %v2366_v24  ;;  %v2352_v62 = vadd.f32 %v6216_v28, %v2330_v53  ;;  %v2310_v37 = vmul.f32 %v4827_v42, %v6090_v59  ;;  %v3420_v21 = vmin.f32 %v3404_v10, 1.0  ;;  %v6330_v24 = vmin.f32 %v3407_v54, 1.0  ;;  %v3400_v13 = vld [vmem:[%s6322_s13 + $0x60] sm:$0xff] }
 0x471   : > { %4526 = vmatmul.mubr.msk.f32.gmra.mrb[46].mxu0 %vm525_vm3, %v2367_v39  ;;  %v2333_v23 = vmul.f32 %v6210_v7, %v2311_v16  ;;  %v2369_v52 = vmax.f32 %v2353_v9, 0.0  ;;  %v3409_v53 = vmax.f32 %v3393_v2, 0.0  ;;  %v3453_v42 = vsub.f32 1.0, %v3421_v34 }
 0x472   : > { %v4829_v12 = vpop.eup %4828  ;;  %v2368_v38 = vmax.f32 %v2352_v62, 0.0  ;;  %v2332_v17 = vmul.f32 %v6210_v7, %v2310_v37  ;;  %v6332_v39 = vmin.f32 %v3406_v43, 1.0  ;;  %v3408_v9 = vmax.f32 %v3392_v48, 0.0  ;;  %v3395_v62 = vld [vmem:[%s6322_s13 + $0x38] sm:$0xff] }
 0x473   : > { %v4831_v57 = vpop.eup %4830  ;;  %v2355_v40 = vadd.f32 %v6216_v28, %v2333_v23  ;;  %v2313_v26 = vmul.f32 %v4829_v12, %v6100_v36  ;;  %v3452_v16 = vsub.f32 1.0, %v3420_v21  ;;  %v3455_v37 = vsub.f32 1.0, %v6330_v24  ;;  %v3403_v48 = vld [vmem:[%s6322_s13 + $0x78] sm:$0xff] }
 0x474   : > { %4528 = vmatprep.mubr.msk.f32.mxu0 %vm525_vm3, %v2368_v38  ;;  %v2354_v30 = vadd.f32 %v6216_v28, %v2332_v17  ;;  %v2312_v59 = vmul.f32 %v4831_v57, %v6106_v5  ;;  %v6336_v23 = vmin.f32 %v3409_v53, 1.0  ;;  %v3469_v12 = vmax.f32 %v3453_v42, 1e-05 }
 0x475   : > { %4529 = vmatmul.mubr.msk.f32.gmra.mrb[48].mxu0 %vm525_vm3, %v2369_v52  ;;  %v2335_v44 = vmul.f32 %v6210_v7, %v2313_v26  ;;  %v2371_v0 = vmax.f32 %v2355_v40, 0.0  ;;  %v3454_v38 = vsub.f32 1.0, %v6332_v39  ;;  %v6339_v17 = vmin.f32 %v3408_v9, 1.0  ;;  %v3402_v9 = vld [vmem:[%s6322_s13 + $0x70] sm:$0xff] }
 0x476   : > { %v4833_v14 = vpop.eup %4832  ;;  %v2370_v6 = vmax.f32 %v2354_v30, 0.0  ;;  %v2334_v8 = vmul.f32 %v6210_v7, %v2312_v59  ;;  %v3468_v57 = vmax.f32 %v3452_v16, 1e-05  ;;  %v3411_v52 = vmax.f32 %v3395_v62, 0.0 }
 0x477   : > { %v4835_v18 = vpop.eup %4834  ;;  %v2315_v61 = vmul.f32 %v4833_v14, %v6116_v55  ;;  %v2357_v36 = vadd.f32 %v6216_v28, %v2335_v44  ;;  %v3471_v40 = vmax.f32 %v3455_v37, 1e-05  ;;  %v3457_v26 = vsub.f32 1.0, %v6336_v23  ;;  %v3394_v44 = vld [vmem:[%s6322_s13 + $0x30] sm:$0xff] }
 0x478   : > { %v2314_v29 = vmul.f32 %v4835_v18, %v6122_v60  ;;  %4531 = vmatprep.mubr.msk.f32.mxu0 %vm525_vm3, %v2370_v6  ;;  %v2356_v5 = vadd.f32 %v6216_v28, %v2334_v8  ;;  %4836 = vrcp.f32 %v3469_v12  ;;  %v3470_v30 = vmax.f32 %v3454_v38, 1e-05  ;;  %v3397_v18 = vld [vmem:[%s6322_s13 + $0x48] sm:$0xff] }
 0x479   : > { %4532 = vmatmul.mubr.msk.f32.gmra.mrb[50].mxu0 %vm525_vm3, %v2371_v0  ;;  %v2337_v51 = vmul.f32 %v6210_v7, %v2315_v61  ;;  %v2373_v47 = vmax.f32 %v2357_v36, 0.0  ;;  %v3456_v59 = vsub.f32 1.0, %v6339_v17  ;;  %4838 = vrcp.f32 %v3468_v57  ;;  %v3396_v0 = vld [vmem:[%s6322_s13 + $0x40] sm:$0xff] }
 0x47a   : > { %v2372_v63 = vmax.f32 %v2356_v5, 0.0  ;;  %v2336_v19 = vmul.f32 %v6210_v7, %v2314_v29  ;;  %v6344_v14 = vmin.f32 %v3411_v52, 1.0  ;;  %4840 = vrcp.f32 %v3471_v40 }
 0x47b   : > { %v2359_v11 = vadd.f32 %v6216_v28, %v2337_v51  ;;  %v3473_v6 = vmax.f32 %v3457_v26, 1e-05  ;;  %v3410_v8 = vmax.f32 %v3394_v44, 0.0  ;;  %4842 = vrcp.f32 %v3470_v30 }
 0x47c   : > { %4534 = vmatprep.mubr.msk.f32.mxu0 %vm525_vm3, %v2372_v63  ;;  %v2358_v55 = vadd.f32 %v6216_v28, %v2336_v19  ;;  %v3472_v61 = vmax.f32 %v3456_v59, 1e-05  ;;  %v3459_v36 = vsub.f32 1.0, %v6344_v14  ;;  %v3413_v29 = vmax.f32 %v3397_v18, 0.0  ;;  %v3399_v63 = vld [vmem:[%s6322_s13 + $0x58] sm:$0xff]  ;;  %v3398_v19 = vld [vmem:[%s6322_s13 + $0x50] sm:$0xff] }
 0x47d   : > { %4535 = vmatmul.mubr.msk.f32.gmra.mrb[52].mxu0 %vm525_vm3, %v2373_v47  ;;  %v2375_v20 = vmax.f32 %v2359_v11, 0.0  ;;  %4844 = vrcp.f32 %v3473_v6  ;;  %v6349_v5 = vmin.f32 %v3410_v8, 1.0  ;;  %v3412_v51 = vmax.f32 %v3396_v0, 0.0 }
 0x47e   : > { %v2374_v60 = vmax.f32 %v2358_v55, 0.0  ;;  %4846 = vrcp.f32 %v3472_v61  ;;  %v3437_v47 = vmax.f32 %v3421_v34, 1e-05  ;;  %v3475_v11 = vmax.f32 %v3459_v36, 1e-05  ;;  %v3401_v55 = vld [vmem:[%s6322_s13 + $0x68] sm:$0xff] }
 0x47f   : > { %v6354_v4 = vmin.f32 %v3413_v29, 1.0  ;;  %v3415_v56 = vmax.f32 %v3399_v63, 0.0  ;;  %v3458_v10 = vsub.f32 1.0, %v6349_v5  ;;  %v6358_v50 = vmin.f32 %v3412_v51, 1.0 }
 0x480   : > { %4537 = vmatprep.mubr.msk.f32.mxu0 %vm525_vm3, %v2374_v60  ;;  %v3414_v54 = vmax.f32 %v3398_v19, 0.0  ;;  %v3439_v43 = vmax.f32 %v6330_v24, 1e-05  ;;  %v3417_v2 = vmax.f32 %v3401_v55, 0.0  ;;  %v3438_v42 = vmax.f32 %v6332_v39, 1e-05 }
 0x481   : > { %4538 = vmatmul.mubr.msk.f32.gmra.mrb[54].mxu0 %vm525_vm3, %v2375_v20  ;;  %v3436_v20 = vmax.f32 %v3420_v21, 1e-05  ;;  %4848 = vrcp.f32 %v3475_v11  ;;  %v3416_v21 = vmax.f32 %v3400_v13, 0.0  ;;  %v3461_v37 = vsub.f32 1.0, %v6354_v4 }
 0x482   : > { %v4837_v60 = vpop.eup %4836  ;;  %v6365_v12 = vmin.f32 %v3415_v56, 1.0  ;;  %v3474_v38 = vmax.f32 %v3458_v10, 1e-05  ;;  %v3460_v57 = vsub.f32 1.0, %v6358_v50  ;;  %v6368_v52 = vmin.f32 %v3414_v54, 1.0 }
 0x483   : > { %v4839_v25 = vpop.eup %4838  ;;  %v3487_v53 = vmul.f32 %v4837_v60, %v3437_v47  ;;  %v3419_v24 = vmax.f32 %v3403_v48, 0.0  ;;  %v3441_v26 = vmax.f32 %v6336_v23, 1e-05  ;;  %v6371_v30 = vmin.f32 %v3417_v2, 1.0 }
 0x484   : > { %v4841_v34 = vpop.eup %4840  ;;  %v3485_v62 = vmul.f32 %v4839_v25, %v3436_v20  ;;  %v3418_v39 = vmax.f32 %v3402_v9, 0.0  ;;  %v3440_v6 = vmax.f32 %v6339_v17, 1e-05  ;;  %v6374_v8 = vmin.f32 %v3416_v21, 1.0 }
 0x485   : > { %v4843_v16 = vpop.eup %4842  ;;  %v3491_v40 = vmul.f32 %v4841_v34, %v3439_v43  ;;  %4850 = vlog2.f32 %v3487_v53  ;;  %v3477_v61 = vmax.f32 %v3461_v37, 1e-05  ;;  %v3463_v0 = vsub.f32 1.0, %v6365_v12 }
 0x486   : > { %v3489_v44 = vmul.f32 %v4843_v16, %v3438_v42  ;;  %4852 = vlog2.f32 %v3485_v62  ;;  %v3476_v36 = vmax.f32 %v3460_v57, 1e-05  ;;  %v3462_v29 = vsub.f32 1.0, %v6368_v52  ;;  %v6396_v62 = vld [vmem:[%s6392_s17 + $0x2] ss:$0 sm:$0xff] }
 0x487   : > { %v4845_v59 = vpop.eup %4844  ;;  %4854 = vrcp.f32 %v3474_v38  ;;  %v6378_v23 = vmin.f32 %v3419_v24, 1.0  ;;  %v3465_v63 = vsub.f32 1.0, %v6371_v30  ;;  %v6381_v19 = vmin.f32 %v3418_v39, 1.0 }
 0x488   : > { %v4847_v18 = vpop.eup %4846  ;;  %4856 = vlog2.f32 %v3491_v40  ;;  %v3495_v51 = vmul.f32 %v4845_v59, %v3441_v26  ;;  %v3464_v47 = vsub.f32 1.0, %v6374_v8  ;;  %v3443_v11 = vmax.f32 %v6344_v14, 1e-05 }
 0x489   : > { %4858 = vlog2.f32 %v3489_v44  ;;  %v3493_v17 = vmul.f32 %v4847_v18, %v3440_v6  ;;  %v3479_v55 = vmax.f32 %v3463_v0, 1e-05  ;;  %v3478_v20 = vmax.f32 %v3462_v29, 1e-05 }
 0x48a   : > { %4860 = vrcp.f32 %v3477_v61  ;;  %v3467_v56 = vsub.f32 1.0, %v6378_v23  ;;  %v3481_v13 = vmax.f32 %v3465_v63, 1e-05  ;;  %v3466_v25 = vsub.f32 1.0, %v6381_v19 }
 0x48b   : > { %v4849_v60 = vpop.eup %4848  ;;  %4862 = vrcp.f32 %v3476_v36  ;;  %v3480_v10 = vmax.f32 %v3464_v47, 1e-05  ;;  %v3442_v48 = vmax.f32 %v6349_v5, 1e-05  ;;  %v3445_v9 = vmax.f32 %v6354_v4, 1e-05 }
 0x48c   : > { %4864 = vlog2.f32 %v3495_v51  ;;  %v3499_v54 = vmul.f32 %v4849_v60, %v3443_v11  ;;  %v3483_v2 = vmax.f32 %v3467_v56, 1e-05  ;;  %v3482_v34 = vmax.f32 %v3466_v25, 1e-05 }
 0x48d   : > { %4866 = vlog2.f32 %v3493_v17  ;;  %v3444_v37 = vmax.f32 %v6358_v50, 1e-05  ;;  %v3447_v59 = vmax.f32 %v6365_v12, 1e-05  ;;  %v3446_v6 = vmax.f32 %v6368_v52, 1e-05 }
 0x48e   : > { %4868 = vrcp.f32 %v3479_v55  ;;  %v3449_v61 = vmax.f32 %v6371_v30, 1e-05  ;;  %v3451_v30 = vmax.f32 %v6378_v23, 1e-05 }
 0x48f   : > { %v4851_v43 = vpop.eup %4850  ;;  %4870 = vrcp.f32 %v3478_v20 }
 0x490   : > { %v4853_v14 = vpop.eup %4852  ;;  %4872 = vrcp.f32 %v3481_v13  ;;  %v3519_v26 = vmul.f32 0.6931472, %v4851_v43 }
 0x491   : > { %v4855_v53 = vpop.eup %4854  ;;  %4874 = vrcp.f32 %v3480_v10  ;;  %v3517_v36 = vmul.f32 0.6931472, %v4853_v14 }
 0x492   : > { %v4857_v42 = vpop.eup %4856  ;;  %4876 = vlog2.f32 %v3499_v54  ;;  %v3497_v5 = vmul.f32 %v4855_v53, %v3442_v48 }
 0x493   : > { %v4859_v21 = vpop.eup %4858  ;;  %4878 = vrcp.f32 %v3483_v2  ;;  %v3523_v29 = vmul.f32 0.6931472, %v4857_v42 }
 0x494   : > { %v4861_v16 = vpop.eup %4860  ;;  %4880 = vrcp.f32 %v3482_v34  ;;  %v3521_v55 = vmul.f32 0.6931472, %v4859_v21 }
 0x495   : > { %v4863_v38 = vpop.eup %4862  ;;  %v3503_v39 = vmul.f32 %v4861_v16, %v3445_v9  ;;  %4882 = vlog2.f32 %v3497_v5 }
 0x496   : > { %v4865_v57 = vpop.eup %4864  ;;  %v3501_v4 = vmul.f32 %v4863_v38, %v3444_v37 }
 0x497   : > { %v6286_v15 = vpop.f32.mrb[56].mxu1  ;;  %v4867_v24 = vpop.eup %4866  ;;  %4884 = vlog2.f32 %v3503_v39  ;;  %v3527_v13 = vmul.f32 0.6931472, %v4865_v57 }
 0x498   : > { %v6288_v35 = vpop.f32.mrb[57].mxu1  ;;  %v3315_v40 = vadd.f32 %v6286_v15, %v6396_v62  ;;  %v4869_v44 = vpop.eup %4868  ;;  %v3448_v15 = vmax.f32 %v6374_v8, 1e-05  ;;  %4886 = vlog2.f32 %v3501_v4  ;;  %v3525_v43 = vmul.f32 0.6931472, %v4867_v24 }
 0x499   : > { %v4871_v18 = vpop.eup %4870  ;;  %v3310_v0 = vadd.f32 %v6396_v62, %v6288_v35  ;;  %v3507_v17 = vmul.f32 %v4869_v44, %v3447_v59  ;;  %v3450_v35 = vmax.f32 %v6381_v19, 1e-05 }
 0x49a   : > { %v4873_v50 = vpop.eup %4872  ;;  %v3549_v63 = vadd.f32 %v3519_v26, %v3315_v40  ;;  %v3505_v52 = vmul.f32 %v4871_v18, %v3446_v6 }
 0x49b   : > { %v6290_v7 = vpop.f32.mrb[58].mxu1  ;;  %v4875_v51 = vpop.eup %4874  ;;  %v3511_v60 = vmul.f32 %v4873_v50, %v3449_v61  ;;  %v3548_v56 = vadd.f32 %v3517_v36, %v3310_v0  ;;  %4888 = vlog2.f32 %v3507_v17 }
 0x49c   : > { %v6292_v49 = vpop.f32.mrb[59].mxu1  ;;  %v3325_v12 = vadd.f32 %v6290_v7, %v6396_v62  ;;  %v4877_v47 = vpop.eup %4876  ;;  %v3509_v25 = vmul.f32 %v4875_v51, %v3448_v15  ;;  %v4084_v7 = vmul.f32 -1.442695, %v3549_v63  ;;  %4890 = vlog2.f32 %v3505_v52 }
 0x49d   : > { %v4879_v11 = vpop.eup %4878  ;;  %v3320_v8 = vadd.f32 %v6396_v62, %v6292_v49  ;;  %v3531_v2 = vmul.f32 0.6931472, %v4877_v47  ;;  %4892 = vlog2.f32 %v3511_v60  ;;  %v4083_v48 = vmul.f32 -1.442695, %v3548_v56 }
 0x49e   : > { %v4881_v20 = vpop.eup %4880  ;;  %v3551_v10 = vadd.f32 %v3523_v29, %v3325_v12  ;;  %v3515_v23 = vmul.f32 %v4879_v11, %v3451_v30  ;;  %4894 = vlog2.f32 %v3509_v25 }
 0x49f   : > { %v6294_v32 = vpop.f32.mrb[60].mxu1  ;;  %v3513_v14 = vmul.f32 %v4881_v20, %v3450_v35  ;;  %v4883_v19 = vpop.eup %4882  ;;  %v3550_v34 = vadd.f32 %v3521_v55, %v3320_v8  ;;  %4896 = vpow2.f32 %v4084_v7 }
 0x4a0   : > { %v6296_v28 = vpop.f32.mrb[61].mxu1  ;;  %v3335_v54 = vadd.f32 %v6294_v32, %v6396_v62  ;;  %v4086_v53 = vmul.f32 -1.442695, %v3551_v10  ;;  %4898 = vlog2.f32 %v3515_v23  ;;  %v3529_v9 = vmul.f32 0.6931472, %v4883_v19 }
 0x4a1   : > { %v3330_v49 = vadd.f32 %v6396_v62, %v6296_v28  ;;  %v4885_v21 = vpop.eup %4884  ;;  %4900 = vlog2.f32 %v3513_v14  ;;  %v4085_v5 = vmul.f32 -1.442695, %v3550_v34 }
 0x4a2   : > { %v3553_v42 = vadd.f32 %v3527_v13, %v3335_v54  ;;  %v4887_v16 = vpop.eup %4886  ;;  %4902 = vpow2.f32 %v4083_v48  ;;  %v3535_v26 = vmul.f32 0.6931472, %v4885_v21  ;;  %v3660_v48 = vlaneseq }
 0x4a3   : > { %v6298_v45 = vpop.f32.mrb[62].mxu1  ;;  %v3552_v37 = vadd.f32 %v3525_v43, %v3330_v49  ;;  %4904 = vpow2.f32 %v4086_v53 }
 0x4a4   : > { %v6300_v46 = vpop.f32.mrb[63].mxu1  ;;  %v3345_v32 = vadd.f32 %v6298_v45, %v6396_v62  ;;  %v4088_v28 = vmul.f32 -1.442695, %v3553_v42  ;;  %v3533_v45 = vmul.f32 0.6931472, %v4887_v16  ;;  %4906 = vpow2.f32 %v4085_v5 }
 0x4a5   : > { %v3340_v38 = vadd.f32 %v6396_v62, %v6300_v46  ;;  %v4889_v24 = vpop.eup %4888  ;;  %v4087_v59 = vmul.f32 -1.442695, %v3552_v37  ;;  %v6439_v16 = vand.u32 127, %v3660_v48 }
 0x4a6   : > { %v3555_v57 = vadd.f32 %v3531_v2, %v3345_v32  ;;  %v4891_v39 = vpop.eup %4890  ;;  %4908 = vpow2.f32 %v4088_v28  ;;  %v3539_v36 = vmul.f32 0.6931472, %v4889_v24 }
 0x4a7   : > { %v6302_v31 = vpop.f32.mrb[64].mxu1  ;;  %v3554_v44 = vadd.f32 %v3529_v9, %v3340_v38  ;;  %v4893_v6 = vpop.eup %4892  ;;  %4910 = vpow2.f32 %v4087_v59  ;;  %v4044_v9 = vld [vmem:[%s6392_s17 + $0x1] ss:$0 sm:$0xff]  ;;  %vm3662_vm1 = vcmp.ge.s32.totalorder %v6439_v16, 12 }
 0x4a8   : > { %v6304_v33 = vpop.f32.mrb[65].mxu1  ;;  %v3355_v40 = vadd.f32 %v6302_v31, %v6396_v62  ;;  %v4090_v18 = vmul.f32 -1.442695, %v3555_v57  ;;  %v4895_v46 = vpop.eup %4894  ;;  %v3537_v31 = vmul.f32 0.6931472, %v4891_v39 }
 0x4a9   : > { %v3350_v4 = vadd.f32 %v6396_v62, %v6304_v33  ;;  %v4897_v61 = vpop.eup %4896  ;;  %v4089_v15 = vmul.f32 -1.442695, %v3554_v44  ;;  %v3543_v47 = vmul.f32 0.6931472, %v4893_v6  ;;  %v3541_v55 = vmul.f32 0.6931472, %v4895_v46 }
 0x4aa   : > { %v3557_v50 = vadd.f32 %v3535_v26, %v3355_v40  ;;  %v4899_v29 = vpop.eup %4898  ;;  %4912 = vpow2.f32 %v4090_v18  ;;  %v3613_v17 = vadd.f32 1.0, %v4897_v61 }
 0x4ab   : > { %v6306_v3 = vpop.f32.mrb[66].mxu1  ;;  %v3556_v51 = vadd.f32 %v3533_v45, %v3350_v4  ;;  %v4901_v12 = vpop.eup %4900  ;;  %4914 = vpow2.f32 %v4089_v15  ;;  %v3547_v13 = vmul.f32 0.6931472, %v4899_v29 }
 0x4ac   : > { %v6308_v41 = vpop.f32.mrb[67].mxu1  ;;  %v3365_v0 = vadd.f32 %v6306_v3, %v6396_v62  ;;  %v4903_v33 = vpop.eup %4902  ;;  %v4092_v30 = vmul.f32 -1.442695, %v3557_v50  ;;  %4916 = vrcp.f32 %v3613_v17  ;;  %v3545_v25 = vmul.f32 0.6931472, %v4901_v12 }
 0x4ad   : > { %v3360_v63 = vadd.f32 %v6396_v62, %v6308_v41  ;;  %v4905_v52 = vpop.eup %4904  ;;  %v4091_v60 = vmul.f32 -1.442695, %v3556_v51  ;;  %v3612_v56 = vadd.f32 1.0, %v4903_v33 }
 0x4ae   : > { %v3559_v11 = vadd.f32 %v3539_v36, %v3365_v0  ;;  %v4907_v41 = vpop.eup %4906  ;;  %v3615_v8 = vadd.f32 1.0, %v4905_v52  ;;  %4918 = vpow2.f32 %v4092_v30 }
 0x4af   : > { %v6310_v1 = vpop.f32.mrb[68].mxu1  ;;  %v3558_v35 = vadd.f32 %v3537_v31, %v3360_v63  ;;  %4920 = vpow2.f32 %v4091_v60 }
 0x4b0   : > { %v6312_v58 = vpop.f32.mrb[69].mxu1  ;;  %v3375_v3 = vadd.f32 %v6310_v1, %v6396_v62  ;;  %v4909_v7 = vpop.eup %4908  ;;  %v4094_v10 = vmul.f32 -1.442695, %v3559_v11  ;;  %4922 = vrcp.f32 %v3612_v56 }
 0x4b1   : > { %v3370_v20 = vadd.f32 %v6396_v62, %v6312_v58  ;;  %v4093_v23 = vmul.f32 -1.442695, %v3558_v35  ;;  %v3614_v58 = vadd.f32 1.0, %v4907_v41  ;;  %v4911_v14 = vpop.eup %4910  ;;  %4924 = vrcp.f32 %v3615_v8 }
 0x4b2   : > { %v3561_v54 = vadd.f32 %v3543_v47, %v3375_v3  ;;  %v3617_v19 = vadd.f32 1.0, %v4909_v7  ;;  %4926 = vpow2.f32 %v4094_v10  ;;  %v3616_v32 = vadd.f32 1.0, %v4911_v14 }
 0x4b3   : > { %v6314_v27 = vpop.f32.mrb[70].mxu1  ;;  %v3560_v43 = vadd.f32 %v3541_v55, %v3370_v20  ;;  %4928 = vpow2.f32 %v4093_v23 }
 0x4b4   : > { %v6316_v22 = vpop.f32.mrb[71].mxu1  ;;  %v3385_v1 = vadd.f32 %v6314_v27, %v6396_v62  ;;  %v4913_v34 = vpop.eup %4912  ;;  %v4096_v49 = vmul.f32 -1.442695, %v3561_v54  ;;  %4930 = vrcp.f32 %v3614_v58 }
 0x4b5   : > { %v3380_v2 = vadd.f32 %v6396_v62, %v6316_v22  ;;  %v4095_v27 = vmul.f32 -1.442695, %v3560_v43  ;;  %v4915_v21 = vpop.eup %4914  ;;  %4932 = vrcp.f32 %v3617_v19  ;;  %v3619_v22 = vadd.f32 1.0, %v4913_v34  ;;  %v4022_v62 = vld [vmem:[%s6392_s17] ss:$0 sm:$0xff] }
 0x4b6   : > { %v3563_v53 = vadd.f32 %v3547_v13, %v3385_v1  ;;  %4934 = vpow2.f32 %v4096_v49  ;;  %v4917_v37 = vpop.eup %4916  ;;  %v3618_v24 = vadd.f32 1.0, %v4915_v21  ;;  %v6441_v26 = vadd.f32 %v4044_v9, %v4022_v62 }
 0x4b7   : > { %v3562_v42 = vadd.f32 %v3545_v25, %v3380_v2  ;;  %4936 = vpow2.f32 %v4095_v27 }
 0x4b8   : > { %v4098_v5 = vmul.f32 -1.442695, %v3563_v53  ;;  %v4919_v57 = vpop.eup %4918  ;;  %4938 = vrcp.f32 %v3616_v32 }
 0x4b9   : > { %v4097_v38 = vmul.f32 -1.442695, %v3562_v42  ;;  %v4921_v39 = vpop.eup %4920  ;;  %4940 = vrcp.f32 %v3619_v22  ;;  %v3621_v18 = vadd.f32 1.0, %v4919_v57 }
 0x4ba   : > { %v4923_v44 = vpop.eup %4922  ;;  %4942 = vpow2.f32 %v4098_v5  ;;  %v3620_v0 = vadd.f32 1.0, %v4921_v39 }
 0x4bb   : > { %v4925_v6 = vpop.eup %4924  ;;  %4944 = vpow2.f32 %v4097_v38 }
 0x4bc   : > { %v4927_v50 = vpop.eup %4926  ;;  %4946 = vrcp.f32 %v3618_v24 }
 0x4bd   : > { %v4929_v15 = vpop.eup %4928  ;;  %4948 = vrcp.f32 %v3621_v18  ;;  %v3623_v47 = vadd.f32 1.0, %v4927_v50 }
 0x4be   : > { %v4931_v12 = vpop.eup %4930  ;;  %4950 = vrcp.f32 %v3620_v0  ;;  %v3622_v3 = vadd.f32 1.0, %v4929_v15 }
 0x4bf   : > { %v4933_v17 = vpop.eup %4932  ;;  %4952 = vrcp.f32 %v3623_v47 }
 0x4c0   : > { %v4935_v11 = vpop.eup %4934  ;;  %4954 = vrcp.f32 %v3622_v3 }
 0x4c1   : > { %v4937_v35 = vpop.eup %4936  ;;  %v3625_v13 = vadd.f32 1.0, %v4935_v11 }
 0x4c2   : > { %v4939_v56 = vpop.eup %4938  ;;  %v3624_v54 = vadd.f32 1.0, %v4937_v35 }
 0x4c3   : > { %v4941_v8 = vpop.eup %4940  ;;  %4956 = vrcp.f32 %v3625_v13 }
 0x4c4   : > { %v4943_v10 = vpop.eup %4942  ;;  %4958 = vrcp.f32 %v3624_v54 }
 0x4c5   : > { %v4945_v43 = vpop.eup %4944  ;;  %v3627_v19 = vadd.f32 1.0, %v4943_v10 }
 0x4c6   : > { %v4947_v58 = vpop.eup %4946  ;;  %v3626_v49 = vadd.f32 1.0, %v4945_v43 }
 0x4c7   : > { %v4949_v42 = vpop.eup %4948  ;;  %4960 = vrcp.f32 %v3627_v19 }
 0x4c8   : > { %v4951_v21 = vpop.eup %4950  ;;  %4962 = vrcp.f32 %v3626_v49 }
 0x4c9   : > { %v4953_v38 = vpop.eup %4952 }
 0x4ca   : > { %v4955_v57 = vpop.eup %4954 }
 0x538   : > { %v4518_v28 = vpop.f32.mrb[40].mxu0 }
 0x539   : > { %v4648_v40 = vadd.f32 %v4518_v28, %v4022_v62  ;;  %v3103_v45 = vpop.f32.mrb[41].mxu0 }
 0x53a   : > { %v4650_v59 = vadd.f32 %v4022_v62, %v3103_v45 }
 0x53b   : > { %v4649_v4 = vadd.f32 %v4648_v40, %v4044_v9 }
 0x53c   : > { %v4651_v46 = vadd.f32 %v4650_v59, %v4044_v9  ;;  %v4521_v61 = vpop.f32.mrb[42].mxu0 }
 0x53d   : > { %v3680_v36 = vsel %vm3662_vm1, %v4917_v37, %v4649_v4  ;;  %v4653_v31 = vadd.f32 %v6441_v26, %v4521_v61  ;;  %v3113_v29 = vpop.f32.mrb[43].mxu0 }
 0x53e   : > { %3696 = vst [vmem:[%s6448_s19 + $0x8] sm:$0xff] %v3680_v36  ;;  %v3679_v51 = vsel %vm3662_vm1, %v4923_v44, %v4651_v46  ;;  %v4655_v63 = vadd.f32 %v6441_v26, %v3113_v29  ;;  %v4957_v44 = vpop.eup %4956 }
 0x53f   : > { %3695 = vst [vmem:[%s6448_s19] sm:$0xff] %v3679_v51  ;;  %v3682_v33 = vsel %vm3662_vm1, %v4925_v6, %v4653_v31  ;;  %v4959_v6 = vpop.eup %4958 }
 0x540   : > { %3698 = vst [vmem:[%s6448_s19 + $0x18] sm:$0xff] %v3682_v33  ;;  %v3681_v52 = vsel %vm3662_vm1, %v4931_v12, %v4655_v63  ;;  %v4524_v30 = vpop.f32.mrb[44].mxu0  ;;  %v4961_v36 = vpop.eup %4960 }
 0x541   : > { %3697 = vst [vmem:[%s6448_s19 + $0x10] sm:$0xff] %v3681_v52  ;;  %v4657_v55 = vadd.f32 %v6441_v26, %v4524_v30  ;;  %v3123_v60 = vpop.f32.mrb[45].mxu0  ;;  %v4963_v29 = vpop.eup %4962 }
 0x542   : > { %v4659_v20 = vadd.f32 %v6441_v26, %v3123_v60 }
 0x543   : > { %v3684_v41 = vsel %vm3662_vm1, %v4933_v17, %v4657_v55 }
 0x544   : > { %3700 = vst [vmem:[%s6448_s19 + $0x28] sm:$0xff] %v3684_v41  ;;  %v3683_v25 = vsel %vm3662_vm1, %v4939_v56, %v4659_v20  ;;  %v4527_v7 = vpop.f32.mrb[46].mxu0 }
 0x545   : > { %3699 = vst [vmem:[%s6448_s19 + $0x20] sm:$0xff] %v3683_v25  ;;  %v4661_v1 = vadd.f32 %v6441_v26, %v4527_v7  ;;  %v3133_v23 = vpop.f32.mrb[47].mxu0 }
 0x546   : > { %v4663_v2 = vadd.f32 %v6441_v26, %v3133_v23 }
 0x547   : > { %v3686_v14 = vsel %vm3662_vm1, %v4941_v8, %v4661_v1 }
 0x548   : > { %3702 = vst [vmem:[%s6448_s19 + $0x38] sm:$0xff] %v3686_v14  ;;  %v3685_v48 = vsel %vm3662_vm1, %v4947_v58, %v4663_v2  ;;  %v4530_v34 = vpop.f32.mrb[48].mxu0 }
 0x549   : > { %3701 = vst [vmem:[%s6448_s19 + $0x30] sm:$0xff] %v3685_v48  ;;  %v4665_v53 = vadd.f32 %v6441_v26, %v4530_v34  ;;  %v3143_v27 = vpop.f32.mrb[49].mxu0 }
 0x54a   : > { %v4667_v32 = vadd.f32 %v6441_v26, %v3143_v27 }
 0x54b   : > { %v3688_v22 = vsel %vm3662_vm1, %v4949_v42, %v4665_v53 }
 0x54c   : > { %3704 = vst [vmem:[%s6448_s19 + $0x48] sm:$0xff] %v3688_v22  ;;  %v3687_v62 = vsel %vm3662_vm1, %v4951_v21, %v4667_v32  ;;  %v4533_v9 = vpop.f32.mrb[50].mxu0 }
 0x54d   : > { %3703 = vst [vmem:[%s6448_s19 + $0x40] sm:$0xff] %v3687_v62  ;;  %v4669_v5 = vadd.f32 %v6441_v26, %v4533_v9  ;;  %v3153_v37 = vpop.f32.mrb[51].mxu0 }
 0x54e   : > { %v4671_v28 = vadd.f32 %v6441_v26, %v3153_v37 }
 0x54f   : > { %v3690_v24 = vsel %vm3662_vm1, %v4953_v38, %v4669_v5 }
 0x550   : > { %3706 = vst [vmem:[%s6448_s19 + $0x58] sm:$0xff] %v3690_v24  ;;  %v3689_v40 = vsel %vm3662_vm1, %v4955_v57, %v4671_v28  ;;  %v4536_v45 = vpop.f32.mrb[52].mxu0 }
 0x551   : > { %3705 = vst [vmem:[%s6448_s19 + $0x50] sm:$0xff] %v3689_v40  ;;  %v4673_v39 = vadd.f32 %v6441_v26, %v4536_v45  ;;  %v3163_v59 = vpop.f32.mrb[53].mxu0 }
 0x552   : > { %v4675_v4 = vadd.f32 %v6441_v26, %v3163_v59 }
 0x553   : > { %v3692_v18 = vsel %vm3662_vm1, %v4957_v44, %v4673_v39 }
 0x554   : > { %3708 = vst [vmem:[%s6448_s19 + $0x68] sm:$0xff] %v3692_v18  ;;  %v3691_v46 = vsel %vm3662_vm1, %v4959_v6, %v4675_v4  ;;  %v4539_v61 = vpop.f32.mrb[54].mxu0 }
 0x555   : > { %3707 = vst [vmem:[%s6448_s19 + $0x60] sm:$0xff] %v3691_v46  ;;  %v4677_v50 = vadd.f32 %v6441_v26, %v4539_v61  ;;  %v3173_v0 = vpop.f32.mrb[55].mxu0 }
 0x556   : > { %v4679_v31 = vadd.f32 %v6441_v26, %v3173_v0 }
 0x557   : > { %v3694_v15 = vsel %vm3662_vm1, %v4961_v36, %v4677_v50 }
 0x558   : > { %3710 = vst [vmem:[%s6448_s19 + $0x78] sm:$0xff] %v3694_v15  ;;  %v3693_v51 = vsel %vm3662_vm1, %v4963_v29, %v4679_v31 }
 0x559   : > { %3709 = vst [vmem:[%s6448_s19 + $0x70] sm:$0xff] %v3693_v51 }
 0x55a PF: > { %s18_s27 = sadd.s32 1, %s4970_s27  }
 0x55b   : > { %p15_p4 = scmp.ge.s32.totalorder %s18_s27, 4  }
 0x55d   :  { %17 = sbr.rel (!%p15_p4) target bundleno = 1 (0x1), region = 123 }

</bundles_post_ra>
